<compile_context>
chip_gen: v5e
topology: v5e:2x2
jax: 0.10.0
libtpu: 0.0.40
codegen_flags: <defaults>
</compile_context>

<pallas_src>
import functools

import jax
import jax.numpy as jnp
from jax.experimental import pallas as pl
from jax.experimental.pallas import tpu as pltpu


def _round_up(x, m):
    return ((x + m - 1) // m) * m


def _pgd_kernel(*refs, num_steps, step_size, epsilon, random_start, norm):
    it = iter(refs)
    inputs_ref = next(it)                             # [TILE_N, D] f32 clean images
    noise_ref = next(it) if random_start else None    # [TILE_N, D] f32 uniform(-eps, eps)
    targets_ref = next(it)                            # [TILE_N, 1] int32 labels
    w_ref = next(it)                                  # [D, C_PAD] bf16 (norm folded, zero-padded cols)
    wt_ref = next(it)                                 # [C_PAD, D] bf16 (== W'^T, zero-padded rows)
    b_ref = next(it)                                  # [1, C_PAD] f32 (padded cols = -1e30)
    mean_ref = next(it) if norm else None             # [1, D] f32
    inv_std_ref = next(it) if norm else None          # [1, D] f32
    logits_out_ref = next(it)                         # [TILE_N, C_PAD] f32
    xnorm_out_ref = next(it)                          # [TILE_N, D] f32
    x_scr = next(it)                                  # [TILE_N, D] f32 adversarial iterate
    oh_scr = next(it)                                 # [TILE_N, C_PAD] f32 one-hot targets

    tile_n, c_pad = logits_out_ref.shape

    # ---------------- prologue ----------------
    x0 = inputs_ref[...]
    if random_start:
        x0 = x0 + noise_ref[...]
    x_scr[...] = x0
    cls = jax.lax.broadcasted_iota(jnp.int32, (tile_n, c_pad), 1)
    oh_scr[...] = (cls == targets_ref[...]).astype(jnp.float32)
    bias = b_ref[...]                                 # loop-invariant load, hoisted

    # ---------------- PGD step ----------------
    def pgd_step():
        x = x_scr[...]
        # forward: bf16 operands, f32 accumulation on the MXU
        logits = jnp.dot(x.astype(jnp.bfloat16), w_ref[...],
                         preferred_element_type=jnp.float32) + bias
        # numerically stable softmax; padded classes have bias -1e30 -> exp == 0
        m = jnp.max(logits, axis=-1, keepdims=True)
        e = jnp.exp(logits - m)
        p = e / jnp.sum(e, axis=-1, keepdims=True)
        # d(mean xent)/d logits up to a positive 1/N factor (sign-only use)
        g_logits = (p - oh_scr[...]).astype(jnp.bfloat16)
        grad_x = jnp.dot(g_logits, wt_ref[...],
                         preferred_element_type=jnp.float32)
        # step_size * sign(grad): grad == 0 takes +step_size (measure-zero
        # difference vs torch.sign which returns 0 there).
        x = x + jnp.where(grad_x >= 0.0, step_size, -step_size)
        # Tightened projection bounds recomputed from the resident inputs block
        # (project-to-eps-ball then clamp-to-[0,1] == one clamp onto the
        # intersection, which is non-empty since inputs are in [0,1]).
        clean = inputs_ref[...]
        lo = jnp.maximum(clean - epsilon, 0.0)
        hi = jnp.minimum(clean + epsilon, 1.0)
        x_scr[...] = jnp.minimum(jnp.maximum(x, lo), hi)

    if num_steps <= 12:
        # short attacks: full unroll gives the LLO scheduler cross-step visibility
        for _ in range(num_steps):
            pgd_step()
    else:
        def body(_, carry):
            pgd_step()
            return carry
        jax.lax.fori_loop(0, num_steps, body, 0)

    # ---------------- epilogue ----------------
    x = x_scr[...]
    if norm:
        xnorm_out_ref[...] = (x - mean_ref[...]) * inv_std_ref[...]
    else:
        xnorm_out_ref[...] = x
    # x @ W' + b'  ==  x_norm @ W + b  (normalization folded into W'/b')
    logits_out_ref[...] = (jnp.dot(x.astype(jnp.bfloat16), w_ref[...],
                                   preferred_element_type=jnp.float32) + bias)


def _physical_vmem_bytes():
    try:
        info = pltpu.get_tpu_info()
        return int(getattr(info, "vmem_capacity_bytes", 64 * 1024 * 1024))
    except Exception:
        return 64 * 1024 * 1024     # conservative v7x figure


def attack_pgd(inputs_nchw, targets, w, b, *,
               epsilon, step_size, num_steps,
               random_start=True, norm=False, t=None,
               key=None, tile_n=512):
    """JAX wrapper reproducing AttackPGD.forward for a linear basic_net.

    Returns (logits_of_adv_x, x_norm) with x_norm reshaped back to NCHW.
    """
    if key is None:
        key = jax.random.PRNGKey(0)
    N, C, H, W_sp = inputs_nchw.shape
    D = C * H * W_sp
    num_classes = w.shape[1]
    C_PAD = _round_up(num_classes, 128)      # lane-dense logits tile

    x = inputs_nchw.reshape(N, D).astype(jnp.float32)

    k_noise, k_t = jax.random.split(key)
    if t is None:
        t = jax.random.uniform(k_t, (1,))    # mirrors `inputs.data.new(1).uniform_`
    # TODO(synk): the original basic_net also takes the scalar `t`; the
    # synthetic linear classifier ignores it.

    if norm:
        assert C == 3, "CIFAR normalization constants are for 3 channels"
        mean = jnp.array([0.4914, 0.4822, 0.4465], jnp.float32)
        std = jnp.array([0.247, 0.243, 0.261], jnp.float32)
        mean_vec = jnp.repeat(mean, H * W_sp).reshape(1, D)
        inv_std_vec = (1.0 / jnp.repeat(std, H * W_sp)).reshape(1, D)
    else:
        mean_vec = None
        inv_std_vec = None

    # Fold normalization into the classifier:
    #   ((x - mean) * inv_std) @ W + b == x @ (inv_std[:,None]*W) + (b - (mean*inv_std) @ W)
    # and pad the class dim to 128 lanes (zero weight cols, -1e30 bias) so the
    # logits store is lane-dense and padded classes vanish under softmax.
    w = jnp.asarray(w, jnp.float32)
    b = jnp.asarray(b, jnp.float32).reshape(1, num_classes)
    if norm:
        w_eff = inv_std_vec.reshape(D, 1) * w
        b_eff = b - (mean_vec * inv_std_vec) @ w
    else:
        w_eff, b_eff = w, b
    w_pad = jnp.zeros((D, C_PAD), jnp.float32).at[:, :num_classes].set(w_eff)
    b_pad = jnp.full((1, C_PAD), -1e30, jnp.float32).at[:, :num_classes].set(b_eff)
    # bf16 weights for the MXU (f32 accumulation stays via preferred_element_type);
    # gradient is used sign-only so bf16 is numerically safe.
    w_bf16 = w_pad.astype(jnp.bfloat16)
    wt_bf16 = w_pad.T.astype(jnp.bfloat16)   # zero rows => no grad contribution
    # TODO(synk): optionally evaluate fp8 (e4m3) weights on v7x only.

    # ---------------- VMEM-budgeted batch tiling ----------------
    rs = 1 if random_start else 0
    # per-row bytes: inputs(x2) + noise(x2) + xnorm out(x2) + x_scr + compute temps(~2)
    # in D-wide f32, plus logits out(x2) + one-hot + softmax temps(~3) in C_PAD-wide f32.
    per_row = (7 + 2 * rs) * D * 4 + 6 * C_PAD * 4
    fixed = (2 * 2 * D * C_PAD * 2            # W', W'^T bf16, double-buffered
             + 2 * 2 * C_PAD * 4              # bias
             + (2 * 2 * D * 4 if norm else 0) # mean / inv_std
             + 4 * 1024 * 1024)               # Mosaic internal scratch + headroom
    cap = int(0.9 * _physical_vmem_bytes())   # never request more than physical VMEM
    budget = max(cap - fixed, per_row * 8)
    max_tile = max(8, (budget // per_row) // 8 * 8)

    TILE_N = min(_round_up(max(int(tile_n), 8), 8), max_tile)
    if N >= 16:
        # keep >= 2 grid tiles so the "parallel" axis shards across both v7x TCs
        TILE_N = min(TILE_N, _round_up(-(-N // 2), 8))
    TILE_N = max(8, min(TILE_N, _round_up(N, 8)))
    N_pad = _round_up(N, TILE_N)

    vmem_est = fixed + TILE_N * per_row
    vmem_limit = int(min(cap, max(vmem_est, 32 * 1024 * 1024)))

    # ---------------- operand padding / assembly ----------------
    targets_i32 = jnp.asarray(targets, jnp.int32)
    noise = None
    if random_start:
        # wrapper-side random start (in-kernel prng_seed has no interpret lowering)
        noise = jax.random.uniform(k_noise, (N, D), jnp.float32,
                                   minval=-epsilon, maxval=epsilon)
    if N_pad != N:
        x = jnp.pad(x, ((0, N_pad - N), (0, 0)))
        targets_i32 = jnp.pad(targets_i32, (0, N_pad - N))
        if random_start:
            noise = jnp.pad(noise, ((0, N_pad - N), (0, 0)))
    targets_col = targets_i32.reshape(N_pad, 1)

    operands = [x]
    in_specs = [pl.BlockSpec((TILE_N, D), lambda i: (i, 0))]        # inputs
    if random_start:
        operands.append(noise)
        in_specs.append(pl.BlockSpec((TILE_N, D), lambda i: (i, 0)))  # noise
    operands += [targets_col, w_bf16, wt_bf16, b_pad]
    in_specs += [
        pl.BlockSpec((TILE_N, 1), lambda i: (i, 0)),                # targets
        pl.BlockSpec((D, C_PAD), lambda i: (0, 0)),                 # W'   (replicated)
        pl.BlockSpec((C_PAD, D), lambda i: (0, 0)),                 # W'^T (replicated)
        pl.BlockSpec((1, C_PAD), lambda i: (0, 0)),                 # b'
    ]
    if norm:
        operands += [mean_vec, inv_std_vec]
        in_specs += [pl.BlockSpec((1, D), lambda i: (0, 0)),
                     pl.BlockSpec((1, D), lambda i: (0, 0))]

    kernel = functools.partial(_pgd_kernel,
                               num_steps=int(num_steps),
                               step_size=float(step_size),
                               epsilon=float(epsilon),
                               random_start=bool(random_start),
                               norm=bool(norm))

    grid_spec = pltpu.PrefetchScalarGridSpec(
        num_scalar_prefetch=0,
        grid=(N_pad // TILE_N,),
        in_specs=in_specs,
        out_specs=(
            pl.BlockSpec((TILE_N, C_PAD), lambda i: (i, 0)),        # logits (lane-dense)
            pl.BlockSpec((TILE_N, D), lambda i: (i, 0)),            # x_norm
        ),
        scratch_shapes=[
            pltpu.VMEM((TILE_N, D), jnp.float32),                   # x (adversarial iterate)
            pltpu.VMEM((TILE_N, C_PAD), jnp.float32),               # one-hot targets
        ],
    )

    logits_pad, xnorm_pad = pl.pallas_call(
        kernel,
        out_shape=(jax.ShapeDtypeStruct((N_pad, C_PAD), jnp.float32),
                   jax.ShapeDtypeStruct((N_pad, D), jnp.float32)),
        grid_spec=grid_spec,
        compiler_params=pltpu.CompilerParams(
            dimension_semantics=("parallel",),
            vmem_limit_bytes=vmem_limit),
    )(*operands)

    logits = logits_pad[:N, :num_classes]
    x_norm = xnorm_pad[:N].reshape(N, C, H, W_sp)
    return logits, x_norm


if __name__ == "__main__":
    # Small, CIFAR-like shapes: batch=8, channels=3, spatial=16x16, 10 classes.
    N, C, H, W = 8, 3, 16, 16
    D = C * H * W
    NUM_CLASSES = 10

    key = jax.random.PRNGKey(0)
    k_x, k_y, k_w, k_attack = jax.random.split(key, 4)

    inputs = jax.random.uniform(k_x, (N, C, H, W), dtype=jnp.float32)      # images in [0,1]
    targets = jax.random.randint(k_y, (N,), 0, NUM_CLASSES, dtype=jnp.int32)

    # Deterministic synthetic basic_net parameters (linear classifier).
    w = 0.05 * jax.random.normal(k_w, (D, NUM_CLASSES), dtype=jnp.float32)
    b = jnp.zeros((NUM_CLASSES,), dtype=jnp.float32)

    config = dict(random_start=True, step_size=2.0 / 255.0,
                  epsilon=8.0 / 255.0, num_steps=5)

    logits, x_norm = attack_pgd(inputs, targets, w, b,
                                epsilon=config["epsilon"],
                                step_size=config["step_size"],
                                num_steps=config["num_steps"],
                                random_start=config["random_start"],
                                norm=False,
                                key=k_attack)

    jax.block_until_ready((logits, x_norm))
    assert logits.shape == (N, NUM_CLASSES)
    assert x_norm.shape == (N, C, H, W)
    assert bool(jnp.all(jnp.isfinite(logits)))
    assert bool(jnp.all(x_norm >= 0.0)) and bool(jnp.all(x_norm <= 1.0))
    assert bool(jnp.all(jnp.abs(x_norm - inputs) <= config["epsilon"] + 1e-6))
    print("KERNEL_OK")
</pallas_src>

<mosaic_0001>
module attributes {stable_mosaic.version = 11 : i64} {
  func.func @_pgd_kernel(%arg0: i32, %arg1: memref<8x768xf32, #tpu.memory_space<vmem>>, %arg2: memref<8x768xf32, #tpu.memory_space<vmem>>, %arg3: memref<8x1xi32, #tpu.memory_space<vmem>>, %arg4: memref<768x128xbf16, #tpu.memory_space<vmem>>, %arg5: memref<128x768xbf16, #tpu.memory_space<vmem>>, %arg6: memref<1x128xf32, #tpu.memory_space<vmem>>, %arg7: memref<8x128xf32, #tpu.memory_space<vmem>>, %arg8: memref<8x768xf32, #tpu.memory_space<vmem>>, %arg9: memref<8x768xf32, #tpu.memory_space<vmem>>, %arg10: memref<8x128xf32, #tpu.memory_space<vmem>>) attributes {dimension_semantics = [#tpu.dimension_semantics<parallel>], iteration_bounds = array<i64: 1>, scalar_prefetch = 0 : i64, scratch_operands = 2 : i64, tpu.core_type = #tpu.core_type<tc>, window_params = [{transform_indices = @transform_0, window_bounds = array<i64: 8, 768>}, {transform_indices = @transform_1, window_bounds = array<i64: 8, 768>}, {transform_indices = @transform_2, window_bounds = array<i64: 8, 1>}, {pipeline_mode = #tpu.pipeline_mode<synchronous>, transform_indices = @transform_3, window_bounds = array<i64: 768, 128>}, {pipeline_mode = #tpu.pipeline_mode<synchronous>, transform_indices = @transform_4, window_bounds = array<i64: 128, 768>}, {pipeline_mode = #tpu.pipeline_mode<synchronous>, transform_indices = @transform_5, window_bounds = array<i64: 1, 128>}, {transform_indices = @transform_6, window_bounds = array<i64: 8, 128>}, {transform_indices = @transform_7, window_bounds = array<i64: 8, 768>}]} {
    %c0 = arith.constant 0 : index
    %c0_0 = arith.constant 0 : index
    %0 = vector.load %arg1[%c0, %c0_0] : memref<8x768xf32, #tpu.memory_space<vmem>>, vector<8x768xf32>
    %c0_1 = arith.constant 0 : index
    %c0_2 = arith.constant 0 : index
    %1 = vector.load %arg2[%c0_1, %c0_2] : memref<8x768xf32, #tpu.memory_space<vmem>>, vector<8x768xf32>
    %2 = arith.addf %0, %1 : vector<8x768xf32>
    %c0_3 = arith.constant 0 : index
    %c0_4 = arith.constant 0 : index
    %3 = vector.load %arg9[%c0_3, %c0_4] : memref<8x768xf32, #tpu.memory_space<vmem>>, vector<8x768xf32>
    tpu.vector_store %arg9[%c0_3, %c0_4], %2 {strides = array<i32>} : memref<8x768xf32, #tpu.memory_space<vmem>>, vector<8x768xf32>,
    %4 = tpu.iota {dimensions = array<i32: 1>} : vector<8x128xi32>
    %c0_5 = arith.constant 0 : index
    %c0_6 = arith.constant 0 : index
    %5 = vector.load %arg3[%c0_5, %c0_6] : memref<8x1xi32, #tpu.memory_space<vmem>>, vector<8x1xi32>
    %6 = vector.broadcast %5 : vector<8x1xi32> to vector<8x128xi32>
    %7 = arith.cmpi eq, %4, %6 : vector<8x128xi32>
    %8 = arith.extui %7 : vector<8x128xi1> to vector<8x128xi32>
    %9 = arith.sitofp %8 : vector<8x128xi32> to vector<8x128xf32>
    %c0_7 = arith.constant 0 : index
    %c0_8 = arith.constant 0 : index
    %10 = vector.load %arg10[%c0_7, %c0_8] : memref<8x128xf32, #tpu.memory_space<vmem>>, vector<8x128xf32>
    tpu.vector_store %arg10[%c0_7, %c0_8], %9 {strides = array<i32>} : memref<8x128xf32, #tpu.memory_space<vmem>>, vector<8x128xf32>,
    %c0_9 = arith.constant 0 : index
    %c0_10 = arith.constant 0 : index
    %11 = vector.load %arg6[%c0_9, %c0_10] : memref<1x128xf32, #tpu.memory_space<vmem>>, vector<1x128xf32>
    %c0_11 = arith.constant 0 : index
    %c0_12 = arith.constant 0 : index
    %12 = vector.load %arg9[%c0_11, %c0_12] : memref<8x768xf32, #tpu.memory_space<vmem>>, vector<8x768xf32>
    %13 = arith.truncf %12 : vector<8x768xf32> to vector<8x768xbf16>
    %c0_13 = arith.constant 0 : index
    %c0_14 = arith.constant 0 : index
    %14 = vector.load %arg4[%c0_13, %c0_14] : memref<768x128xbf16, #tpu.memory_space<vmem>>, vector<768x128xbf16>
    %cst = arith.constant dense<0.000000e+00> : vector<8x128xf32>
    %15 = tpu.matmul %13, %14, %cst {dimension_numbers = #tpu.dot_dimension_numbers<[1], [0], [0], [1], [0, 0, 1, 1], [], []>} : vector<8x768xbf16>, vector<768x128xbf16>, vector<8x128xf32> -> vector<8x128xf32>
    %16 = vector.broadcast %11 : vector<1x128xf32> to vector<8x128xf32>
    %17 = arith.addf %15, %16 : vector<8x128xf32>
    %cst_15 = arith.constant dense<0xFF800000> : vector<8xf32>
    %18 = vector.multi_reduction <maximumf>, %17, %cst_15 [1] : vector<8x128xf32> to vector<8xf32>
    %19 = vector.shape_cast %18 : vector<8xf32> to vector<8x1xf32>
    %20 = vector.broadcast %19 : vector<8x1xf32> to vector<8x128xf32>
    %21 = arith.subf %17, %20 : vector<8x128xf32>
    %22 = math.exp %21 : vector<8x128xf32>
    %cst_16 = arith.constant dense<0.000000e+00> : vector<8xf32>
    %23 = vector.multi_reduction <add>, %22, %cst_16 [1] : vector<8x128xf32> to vector<8xf32>
    %24 = vector.shape_cast %23 : vector<8xf32> to vector<8x1xf32>
    %25 = vector.broadcast %24 : vector<8x1xf32> to vector<8x128xf32>
    %26 = arith.divf %22, %25 : vector<8x128xf32>
    %c0_17 = arith.constant 0 : index
    %c0_18 = arith.constant 0 : index
    %27 = vector.load %arg10[%c0_17, %c0_18] : memref<8x128xf32, #tpu.memory_space<vmem>>, vector<8x128xf32>
    %28 = arith.subf %26, %27 : vector<8x128xf32>
    %29 = arith.truncf %28 : vector<8x128xf32> to vector<8x128xbf16>
    %c0_19 = arith.constant 0 : index
    %c0_20 = arith.constant 0 : index
    %30 = vector.load %arg5[%c0_19, %c0_20] : memref<128x768xbf16, #tpu.memory_space<vmem>>, vector<128x768xbf16>
    %cst_21 = arith.constant dense<0.000000e+00> : vector<8x768xf32>
    %31 = tpu.matmul %29, %30, %cst_21 {dimension_numbers = #tpu.dot_dimension_numbers<[1], [0], [0], [1], [0, 0, 1, 1], [], []>} : vector<8x128xbf16>, vector<128x768xbf16>, vector<8x768xf32> -> vector<8x768xf32>
    %cst_22 = arith.constant 0.000000e+00 : f32
    %32 = vector.broadcast %cst_22 : f32 to vector<8x768xf32>
    %33 = arith.cmpf oge, %31, %32 : vector<8x768xf32>
    %cst_23 = arith.constant 0.00784313772 : f32
    %cst_24 = arith.constant -0.00784313772 : f32
    %34 = vector.broadcast %cst_23 : f32 to vector<8x768xf32>
    %35 = vector.broadcast %cst_24 : f32 to vector<8x768xf32>
    %36 = arith.select %33, %34, %35 : vector<8x768xi1>, vector<8x768xf32>
    %37 = arith.addf %12, %36 : vector<8x768xf32>
    %c0_25 = arith.constant 0 : index
    %c0_26 = arith.constant 0 : index
    %38 = vector.load %arg1[%c0_25, %c0_26] : memref<8x768xf32, #tpu.memory_space<vmem>>, vector<8x768xf32>
    %cst_27 = arith.constant 0.0313725509 : f32
    %39 = vector.broadcast %cst_27 : f32 to vector<8x768xf32>
    %40 = arith.subf %38, %39 : vector<8x768xf32>
    %cst_28 = arith.constant 0.000000e+00 : f32
    %41 = vector.broadcast %cst_28 : f32 to vector<8x768xf32>
    %42 = arith.maximumf %40, %41 : vector<8x768xf32>
    %cst_29 = arith.constant 0.0313725509 : f32
    %43 = vector.broadcast %cst_29 : f32 to vector<8x768xf32>
    %44 = arith.addf %38, %43 : vector<8x768xf32>
    %cst_30 = arith.constant 1.000000e+00 : f32
    %45 = vector.broadcast %cst_30 : f32 to vector<8x768xf32>
    %46 = arith.minimumf %44, %45 : vector<8x768xf32>
    %47 = arith.maximumf %37, %42 : vector<8x768xf32>
    %48 = arith.minimumf %47, %46 : vector<8x768xf32>
    %c0_31 = arith.constant 0 : index
    %c0_32 = arith.constant 0 : index
    %49 = vector.load %arg9[%c0_31, %c0_32] : memref<8x768xf32, #tpu.memory_space<vmem>>, vector<8x768xf32>
    tpu.vector_store %arg9[%c0_31, %c0_32], %48 {strides = array<i32>} : memref<8x768xf32, #tpu.memory_space<vmem>>, vector<8x768xf32>,
    %c0_33 = arith.constant 0 : index
    %c0_34 = arith.constant 0 : index
    %50 = vector.load %arg9[%c0_33, %c0_34] : memref<8x768xf32, #tpu.memory_space<vmem>>, vector<8x768xf32>
    %51 = arith.truncf %50 : vector<8x768xf32> to vector<8x768xbf16>
    %c0_35 = arith.constant 0 : index
    %c0_36 = arith.constant 0 : index
    %52 = vector.load %arg4[%c0_35, %c0_36] : memref<768x128xbf16, #tpu.memory_space<vmem>>, vector<768x128xbf16>
    %cst_37 = arith.constant dense<0.000000e+00> : vector<8x128xf32>
    %53 = tpu.matmul %51, %52, %cst_37 {dimension_numbers = #tpu.dot_dimension_numbers<[1], [0], [0], [1], [0, 0, 1, 1], [], []>} : vector<8x768xbf16>, vector<768x128xbf16>, vector<8x128xf32> -> vector<8x128xf32>
    %54 = vector.broadcast %11 : vector<1x128xf32> to vector<8x128xf32>
    %55 = arith.addf %53, %54 : vector<8x128xf32>
    %cst_38 = arith.constant dense<0xFF800000> : vector<8xf32>
    %56 = vector.multi_reduction <maximumf>, %55, %cst_38 [1] : vector<8x128xf32> to vector<8xf32>
    %57 = vector.shape_cast %56 : vector<8xf32> to vector<8x1xf32>
    %58 = vector.broadcast %57 : vector<8x1xf32> to vector<8x128xf32>
    %59 = arith.subf %55, %58 : vector<8x128xf32>
    %60 = math.exp %59 : vector<8x128xf32>
    %cst_39 = arith.constant dense<0.000000e+00> : vector<8xf32>
    %61 = vector.multi_reduction <add>, %60, %cst_39 [1] : vector<8x128xf32> to vector<8xf32>
    %62 = vector.shape_cast %61 : vector<8xf32> to vector<8x1xf32>
    %63 = vector.broadcast %62 : vector<8x1xf32> to vector<8x128xf32>
    %64 = arith.divf %60, %63 : vector<8x128xf32>
    %c0_40 = arith.constant 0 : index
    %c0_41 = arith.constant 0 : index
    %65 = vector.load %arg10[%c0_40, %c0_41] : memref<8x128xf32, #tpu.memory_space<vmem>>, vector<8x128xf32>
    %66 = arith.subf %64, %65 : vector<8x128xf32>
    %67 = arith.truncf %66 : vector<8x128xf32> to vector<8x128xbf16>
    %c0_42 = arith.constant 0 : index
    %c0_43 = arith.constant 0 : index
    %68 = vector.load %arg5[%c0_42, %c0_43] : memref<128x768xbf16, #tpu.memory_space<vmem>>, vector<128x768xbf16>
    %cst_44 = arith.constant dense<0.000000e+00> : vector<8x768xf32>
    %69 = tpu.matmul %67, %68, %cst_44 {dimension_numbers = #tpu.dot_dimension_numbers<[1], [0], [0], [1], [0, 0, 1, 1], [], []>} : vector<8x128xbf16>, vector<128x768xbf16>, vector<8x768xf32> -> vector<8x768xf32>
    %cst_45 = arith.constant 0.000000e+00 : f32
    %70 = vector.broadcast %cst_45 : f32 to vector<8x768xf32>
    %71 = arith.cmpf oge, %69, %70 : vector<8x768xf32>
    %cst_46 = arith.constant 0.00784313772 : f32
    %cst_47 = arith.constant -0.00784313772 : f32
    %72 = vector.broadcast %cst_46 : f32 to vector<8x768xf32>
    %73 = vector.broadcast %cst_47 : f32 to vector<8x768xf32>
    %74 = arith.select %71, %72, %73 : vector<8x768xi1>, vector<8x768xf32>
    %75 = arith.addf %50, %74 : vector<8x768xf32>
    %c0_48 = arith.constant 0 : index
    %c0_49 = arith.constant 0 : index
    %76 = vector.load %arg1[%c0_48, %c0_49] : memref<8x768xf32, #tpu.memory_space<vmem>>, vector<8x768xf32>
    %cst_50 = arith.constant 0.0313725509 : f32
    %77 = vector.broadcast %cst_50 : f32 to vector<8x768xf32>
    %78 = arith.subf %76, %77 : vector<8x768xf32>
    %cst_51 = arith.constant 0.000000e+00 : f32
    %79 = vector.broadcast %cst_51 : f32 to vector<8x768xf32>
    %80 = arith.maximumf %78, %79 : vector<8x768xf32>
    %cst_52 = arith.constant 0.0313725509 : f32
    %81 = vector.broadcast %cst_52 : f32 to vector<8x768xf32>
    %82 = arith.addf %76, %81 : vector<8x768xf32>
    %cst_53 = arith.constant 1.000000e+00 : f32
    %83 = vector.broadcast %cst_53 : f32 to vector<8x768xf32>
    %84 = arith.minimumf %82, %83 : vector<8x768xf32>
    %85 = arith.maximumf %75, %80 : vector<8x768xf32>
    %86 = arith.minimumf %85, %84 : vector<8x768xf32>
    %c0_54 = arith.constant 0 : index
    %c0_55 = arith.constant 0 : index
    %87 = vector.load %arg9[%c0_54, %c0_55] : memref<8x768xf32, #tpu.memory_space<vmem>>, vector<8x768xf32>
    tpu.vector_store %arg9[%c0_54, %c0_55], %86 {strides = array<i32>} : memref<8x768xf32, #tpu.memory_space<vmem>>, vector<8x768xf32>,
    %c0_56 = arith.constant 0 : index
    %c0_57 = arith.constant 0 : index
    %88 = vector.load %arg9[%c0_56, %c0_57] : memref<8x768xf32, #tpu.memory_space<vmem>>, vector<8x768xf32>
    %89 = arith.truncf %88 : vector<8x768xf32> to vector<8x768xbf16>
    %c0_58 = arith.constant 0 : index
    %c0_59 = arith.constant 0 : index
    %90 = vector.load %arg4[%c0_58, %c0_59] : memref<768x128xbf16, #tpu.memory_space<vmem>>, vector<768x128xbf16>
    %cst_60 = arith.constant dense<0.000000e+00> : vector<8x128xf32>
    %91 = tpu.matmul %89, %90, %cst_60 {dimension_numbers = #tpu.dot_dimension_numbers<[1], [0], [0], [1], [0, 0, 1, 1], [], []>} : vector<8x768xbf16>, vector<768x128xbf16>, vector<8x128xf32> -> vector<8x128xf32>
    %92 = vector.broadcast %11 : vector<1x128xf32> to vector<8x128xf32>
    %93 = arith.addf %91, %92 : vector<8x128xf32>
    %cst_61 = arith.constant dense<0xFF800000> : vector<8xf32>
    %94 = vector.multi_reduction <maximumf>, %93, %cst_61 [1] : vector<8x128xf32> to vector<8xf32>
    %95 = vector.shape_cast %94 : vector<8xf32> to vector<8x1xf32>
    %96 = vector.broadcast %95 : vector<8x1xf32> to vector<8x128xf32>
    %97 = arith.subf %93, %96 : vector<8x128xf32>
    %98 = math.exp %97 : vector<8x128xf32>
    %cst_62 = arith.constant dense<0.000000e+00> : vector<8xf32>
    %99 = vector.multi_reduction <add>, %98, %cst_62 [1] : vector<8x128xf32> to vector<8xf32>
    %100 = vector.shape_cast %99 : vector<8xf32> to vector<8x1xf32>
    %101 = vector.broadcast %100 : vector<8x1xf32> to vector<8x128xf32>
    %102 = arith.divf %98, %101 : vector<8x128xf32>
    %c0_63 = arith.constant 0 : index
    %c0_64 = arith.constant 0 : index
    %103 = vector.load %arg10[%c0_63, %c0_64] : memref<8x128xf32, #tpu.memory_space<vmem>>, vector<8x128xf32>
    %104 = arith.subf %102, %103 : vector<8x128xf32>
    %105 = arith.truncf %104 : vector<8x128xf32> to vector<8x128xbf16>
    %c0_65 = arith.constant 0 : index
    %c0_66 = arith.constant 0 : index
    %106 = vector.load %arg5[%c0_65, %c0_66] : memref<128x768xbf16, #tpu.memory_space<vmem>>, vector<128x768xbf16>
    %cst_67 = arith.constant dense<0.000000e+00> : vector<8x768xf32>
    %107 = tpu.matmul %105, %106, %cst_67 {dimension_numbers = #tpu.dot_dimension_numbers<[1], [0], [0], [1], [0, 0, 1, 1], [], []>} : vector<8x128xbf16>, vector<128x768xbf16>, vector<8x768xf32> -> vector<8x768xf32>
    %cst_68 = arith.constant 0.000000e+00 : f32
    %108 = vector.broadcast %cst_68 : f32 to vector<8x768xf32>
    %109 = arith.cmpf oge, %107, %108 : vector<8x768xf32>
    %cst_69 = arith.constant 0.00784313772 : f32
    %cst_70 = arith.constant -0.00784313772 : f32
    %110 = vector.broadcast %cst_69 : f32 to vector<8x768xf32>
    %111 = vector.broadcast %cst_70 : f32 to vector<8x768xf32>
    %112 = arith.select %109, %110, %111 : vector<8x768xi1>, vector<8x768xf32>
    %113 = arith.addf %88, %112 : vector<8x768xf32>
    %c0_71 = arith.constant 0 : index
    %c0_72 = arith.constant 0 : index
    %114 = vector.load %arg1[%c0_71, %c0_72] : memref<8x768xf32, #tpu.memory_space<vmem>>, vector<8x768xf32>
    %cst_73 = arith.constant 0.0313725509 : f32
    %115 = vector.broadcast %cst_73 : f32 to vector<8x768xf32>
    %116 = arith.subf %114, %115 : vector<8x768xf32>
    %cst_74 = arith.constant 0.000000e+00 : f32
    %117 = vector.broadcast %cst_74 : f32 to vector<8x768xf32>
    %118 = arith.maximumf %116, %117 : vector<8x768xf32>
    %cst_75 = arith.constant 0.0313725509 : f32
    %119 = vector.broadcast %cst_75 : f32 to vector<8x768xf32>
    %120 = arith.addf %114, %119 : vector<8x768xf32>
    %cst_76 = arith.constant 1.000000e+00 : f32
    %121 = vector.broadcast %cst_76 : f32 to vector<8x768xf32>
    %122 = arith.minimumf %120, %121 : vector<8x768xf32>
    %123 = arith.maximumf %113, %118 : vector<8x768xf32>
    %124 = arith.minimumf %123, %122 : vector<8x768xf32>
    %c0_77 = arith.constant 0 : index
    %c0_78 = arith.constant 0 : index
    %125 = vector.load %arg9[%c0_77, %c0_78] : memref<8x768xf32, #tpu.memory_space<vmem>>, vector<8x768xf32>
    tpu.vector_store %arg9[%c0_77, %c0_78], %124 {strides = array<i32>} : memref<8x768xf32, #tpu.memory_space<vmem>>, vector<8x768xf32>,
    %c0_79 = arith.constant 0 : index
    %c0_80 = arith.constant 0 : index
    %126 = vector.load %arg9[%c0_79, %c0_80] : memref<8x768xf32, #tpu.memory_space<vmem>>, vector<8x768xf32>
    %127 = arith.truncf %126 : vector<8x768xf32> to vector<8x768xbf16>
    %c0_81 = arith.constant 0 : index
    %c0_82 = arith.constant 0 : index
    %128 = vector.load %arg4[%c0_81, %c0_82] : memref<768x128xbf16, #tpu.memory_space<vmem>>, vector<768x128xbf16>
    %cst_83 = arith.constant dense<0.000000e+00> : vector<8x128xf32>
    %129 = tpu.matmul %127, %128, %cst_83 {dimension_numbers = #tpu.dot_dimension_numbers<[1], [0], [0], [1], [0, 0, 1, 1], [], []>} : vector<8x768xbf16>, vector<768x128xbf16>, vector<8x128xf32> -> vector<8x128xf32>
    %130 = vector.broadcast %11 : vector<1x128xf32> to vector<8x128xf32>
    %131 = arith.addf %129, %130 : vector<8x128xf32>
    %cst_84 = arith.constant dense<0xFF800000> : vector<8xf32>
    %132 = vector.multi_reduction <maximumf>, %131, %cst_84 [1] : vector<8x128xf32> to vector<8xf32>
    %133 = vector.shape_cast %132 : vector<8xf32> to vector<8x1xf32>
    %134 = vector.broadcast %133 : vector<8x1xf32> to vector<8x128xf32>
    %135 = arith.subf %131, %134 : vector<8x128xf32>
    %136 = math.exp %135 : vector<8x128xf32>
    %cst_85 = arith.constant dense<0.000000e+00> : vector<8xf32>
    %137 = vector.multi_reduction <add>, %136, %cst_85 [1] : vector<8x128xf32> to vector<8xf32>
    %138 = vector.shape_cast %137 : vector<8xf32> to vector<8x1xf32>
    %139 = vector.broadcast %138 : vector<8x1xf32> to vector<8x128xf32>
    %140 = arith.divf %136, %139 : vector<8x128xf32>
    %c0_86 = arith.constant 0 : index
    %c0_87 = arith.constant 0 : index
    %141 = vector.load %arg10[%c0_86, %c0_87] : memref<8x128xf32, #tpu.memory_space<vmem>>, vector<8x128xf32>
    %142 = arith.subf %140, %141 : vector<8x128xf32>
    %143 = arith.truncf %142 : vector<8x128xf32> to vector<8x128xbf16>
    %c0_88 = arith.constant 0 : index
    %c0_89 = arith.constant 0 : index
    %144 = vector.load %arg5[%c0_88, %c0_89] : memref<128x768xbf16, #tpu.memory_space<vmem>>, vector<128x768xbf16>
    %cst_90 = arith.constant dense<0.000000e+00> : vector<8x768xf32>
    %145 = tpu.matmul %143, %144, %cst_90 {dimension_numbers = #tpu.dot_dimension_numbers<[1], [0], [0], [1], [0, 0, 1, 1], [], []>} : vector<8x128xbf16>, vector<128x768xbf16>, vector<8x768xf32> -> vector<8x768xf32>
    %cst_91 = arith.constant 0.000000e+00 : f32
    %146 = vector.broadcast %cst_91 : f32 to vector<8x768xf32>
    %147 = arith.cmpf oge, %145, %146 : vector<8x768xf32>
    %cst_92 = arith.constant 0.00784313772 : f32
    %cst_93 = arith.constant -0.00784313772 : f32
    %148 = vector.broadcast %cst_92 : f32 to vector<8x768xf32>
    %149 = vector.broadcast %cst_93 : f32 to vector<8x768xf32>
    %150 = arith.select %147, %148, %149 : vector<8x768xi1>, vector<8x768xf32>
    %151 = arith.addf %126, %150 : vector<8x768xf32>
    %c0_94 = arith.constant 0 : index
    %c0_95 = arith.constant 0 : index
    %152 = vector.load %arg1[%c0_94, %c0_95] : memref<8x768xf32, #tpu.memory_space<vmem>>, vector<8x768xf32>
    %cst_96 = arith.constant 0.0313725509 : f32
    %153 = vector.broadcast %cst_96 : f32 to vector<8x768xf32>
    %154 = arith.subf %152, %153 : vector<8x768xf32>
    %cst_97 = arith.constant 0.000000e+00 : f32
    %155 = vector.broadcast %cst_97 : f32 to vector<8x768xf32>
    %156 = arith.maximumf %154, %155 : vector<8x768xf32>
    %cst_98 = arith.constant 0.0313725509 : f32
    %157 = vector.broadcast %cst_98 : f32 to vector<8x768xf32>
    %158 = arith.addf %152, %157 : vector<8x768xf32>
    %cst_99 = arith.constant 1.000000e+00 : f32
    %159 = vector.broadcast %cst_99 : f32 to vector<8x768xf32>
    %160 = arith.minimumf %158, %159 : vector<8x768xf32>
    %161 = arith.maximumf %151, %156 : vector<8x768xf32>
    %162 = arith.minimumf %161, %160 : vector<8x768xf32>
    %c0_100 = arith.constant 0 : index
    %c0_101 = arith.constant 0 : index
    %163 = vector.load %arg9[%c0_100, %c0_101] : memref<8x768xf32, #tpu.memory_space<vmem>>, vector<8x768xf32>
    tpu.vector_store %arg9[%c0_100, %c0_101], %162 {strides = array<i32>} : memref<8x768xf32, #tpu.memory_space<vmem>>, vector<8x768xf32>,
    %c0_102 = arith.constant 0 : index
    %c0_103 = arith.constant 0 : index
    %164 = vector.load %arg9[%c0_102, %c0_103] : memref<8x768xf32, #tpu.memory_space<vmem>>, vector<8x768xf32>
    %165 = arith.truncf %164 : vector<8x768xf32> to vector<8x768xbf16>
    %c0_104 = arith.constant 0 : index
    %c0_105 = arith.constant 0 : index
    %166 = vector.load %arg4[%c0_104, %c0_105] : memref<768x128xbf16, #tpu.memory_space<vmem>>, vector<768x128xbf16>
    %cst_106 = arith.constant dense<0.000000e+00> : vector<8x128xf32>
    %167 = tpu.matmul %165, %166, %cst_106 {dimension_numbers = #tpu.dot_dimension_numbers<[1], [0], [0], [1], [0, 0, 1, 1], [], []>} : vector<8x768xbf16>, vector<768x128xbf16>, vector<8x128xf32> -> vector<8x128xf32>
    %168 = vector.broadcast %11 : vector<1x128xf32> to vector<8x128xf32>
    %169 = arith.addf %167, %168 : vector<8x128xf32>
    %cst_107 = arith.constant dense<0xFF800000> : vector<8xf32>
    %170 = vector.multi_reduction <maximumf>, %169, %cst_107 [1] : vector<8x128xf32> to vector<8xf32>
    %171 = vector.shape_cast %170 : vector<8xf32> to vector<8x1xf32>
    %172 = vector.broadcast %171 : vector<8x1xf32> to vector<8x128xf32>
    %173 = arith.subf %169, %172 : vector<8x128xf32>
    %174 = math.exp %173 : vector<8x128xf32>
    %cst_108 = arith.constant dense<0.000000e+00> : vector<8xf32>
    %175 = vector.multi_reduction <add>, %174, %cst_108 [1] : vector<8x128xf32> to vector<8xf32>
    %176 = vector.shape_cast %175 : vector<8xf32> to vector<8x1xf32>
    %177 = vector.broadcast %176 : vector<8x1xf32> to vector<8x128xf32>
    %178 = arith.divf %174, %177 : vector<8x128xf32>
    %c0_109 = arith.constant 0 : index
    %c0_110 = arith.constant 0 : index
    %179 = vector.load %arg10[%c0_109, %c0_110] : memref<8x128xf32, #tpu.memory_space<vmem>>, vector<8x128xf32>
    %180 = arith.subf %178, %179 : vector<8x128xf32>
    %181 = arith.truncf %180 : vector<8x128xf32> to vector<8x128xbf16>
    %c0_111 = arith.constant 0 : index
    %c0_112 = arith.constant 0 : index
    %182 = vector.load %arg5[%c0_111, %c0_112] : memref<128x768xbf16, #tpu.memory_space<vmem>>, vector<128x768xbf16>
    %cst_113 = arith.constant dense<0.000000e+00> : vector<8x768xf32>
    %183 = tpu.matmul %181, %182, %cst_113 {dimension_numbers = #tpu.dot_dimension_numbers<[1], [0], [0], [1], [0, 0, 1, 1], [], []>} : vector<8x128xbf16>, vector<128x768xbf16>, vector<8x768xf32> -> vector<8x768xf32>
    %cst_114 = arith.constant 0.000000e+00 : f32
    %184 = vector.broadcast %cst_114 : f32 to vector<8x768xf32>
    %185 = arith.cmpf oge, %183, %184 : vector<8x768xf32>
    %cst_115 = arith.constant 0.00784313772 : f32
    %cst_116 = arith.constant -0.00784313772 : f32
    %186 = vector.broadcast %cst_115 : f32 to vector<8x768xf32>
    %187 = vector.broadcast %cst_116 : f32 to vector<8x768xf32>
    %188 = arith.select %185, %186, %187 : vector<8x768xi1>, vector<8x768xf32>
    %189 = arith.addf %164, %188 : vector<8x768xf32>
    %c0_117 = arith.constant 0 : index
    %c0_118 = arith.constant 0 : index
    %190 = vector.load %arg1[%c0_117, %c0_118] : memref<8x768xf32, #tpu.memory_space<vmem>>, vector<8x768xf32>
    %cst_119 = arith.constant 0.0313725509 : f32
    %191 = vector.broadcast %cst_119 : f32 to vector<8x768xf32>
    %192 = arith.subf %190, %191 : vector<8x768xf32>
    %cst_120 = arith.constant 0.000000e+00 : f32
    %193 = vector.broadcast %cst_120 : f32 to vector<8x768xf32>
    %194 = arith.maximumf %192, %193 : vector<8x768xf32>
    %cst_121 = arith.constant 0.0313725509 : f32
    %195 = vector.broadcast %cst_121 : f32 to vector<8x768xf32>
    %196 = arith.addf %190, %195 : vector<8x768xf32>
    %cst_122 = arith.constant 1.000000e+00 : f32
    %197 = vector.broadcast %cst_122 : f32 to vector<8x768xf32>
    %198 = arith.minimumf %196, %197 : vector<8x768xf32>
    %199 = arith.maximumf %189, %194 : vector<8x768xf32>
    %200 = arith.minimumf %199, %198 : vector<8x768xf32>
    %c0_123 = arith.constant 0 : index
    %c0_124 = arith.constant 0 : index
    %201 = vector.load %arg9[%c0_123, %c0_124] : memref<8x768xf32, #tpu.memory_space<vmem>>, vector<8x768xf32>
    tpu.vector_store %arg9[%c0_123, %c0_124], %200 {strides = array<i32>} : memref<8x768xf32, #tpu.memory_space<vmem>>, vector<8x768xf32>,
    %c0_125 = arith.constant 0 : index
    %c0_126 = arith.constant 0 : index
    %202 = vector.load %arg9[%c0_125, %c0_126] : memref<8x768xf32, #tpu.memory_space<vmem>>, vector<8x768xf32>
    %c0_127 = arith.constant 0 : index
    %c0_128 = arith.constant 0 : index
    %203 = vector.load %arg8[%c0_127, %c0_128] : memref<8x768xf32, #tpu.memory_space<vmem>>, vector<8x768xf32>
    tpu.vector_store %arg8[%c0_127, %c0_128], %202 {strides = array<i32>} : memref<8x768xf32, #tpu.memory_space<vmem>>, vector<8x768xf32>,
    %204 = arith.truncf %202 : vector<8x768xf32> to vector<8x768xbf16>
    %c0_129 = arith.constant 0 : index
    %c0_130 = arith.constant 0 : index
    %205 = vector.load %arg4[%c0_129, %c0_130] : memref<768x128xbf16, #tpu.memory_space<vmem>>, vector<768x128xbf16>
    %cst_131 = arith.constant dense<0.000000e+00> : vector<8x128xf32>
    %206 = tpu.matmul %204, %205, %cst_131 {dimension_numbers = #tpu.dot_dimension_numbers<[1], [0], [0], [1], [0, 0, 1, 1], [], []>} : vector<8x768xbf16>, vector<768x128xbf16>, vector<8x128xf32> -> vector<8x128xf32>
    %207 = vector.broadcast %11 : vector<1x128xf32> to vector<8x128xf32>
    %208 = arith.addf %206, %207 : vector<8x128xf32>
    %c0_132 = arith.constant 0 : index
    %c0_133 = arith.constant 0 : index
    %209 = vector.load %arg7[%c0_132, %c0_133] : memref<8x128xf32, #tpu.memory_space<vmem>>, vector<8x128xf32>
    tpu.vector_store %arg7[%c0_132, %c0_133], %208 {strides = array<i32>} : memref<8x128xf32, #tpu.memory_space<vmem>>, vector<8x128xf32>,
    return
  }
  func.func @transform_0(%arg0: i32) -> (i32, i32) {
    %c0_i32 = arith.constant 0 : i32
    %c0_i32_0 = arith.constant 0 : i32
    return %arg0, %c0_i32 : i32, i32
  }
  func.func @transform_1(%arg0: i32) -> (i32, i32) {
    %c0_i32 = arith.constant 0 : i32
    %c0_i32_0 = arith.constant 0 : i32
    return %arg0, %c0_i32 : i32, i32
  }
  func.func @transform_2(%arg0: i32) -> (i32, i32) {
    %c0_i32 = arith.constant 0 : i32
    %c0_i32_0 = arith.constant 0 : i32
    return %arg0, %c0_i32 : i32, i32
  }
  func.func @transform_3(%arg0: i32) -> (i32, i32) {
    %c0_i32 = arith.constant 0 : i32
    %c0_i32_0 = arith.constant 0 : i32
    %c0_i32_1 = arith.constant 0 : i32
    return %c0_i32, %c0_i32_0 : i32, i32
  }
  func.func @transform_4(%arg0: i32) -> (i32, i32) {
    %c0_i32 = arith.constant 0 : i32
    %c0_i32_0 = arith.constant 0 : i32
    %c0_i32_1 = arith.constant 0 : i32
    return %c0_i32, %c0_i32_0 : i32, i32
  }
  func.func @transform_5(%arg0: i32) -> (i32, i32) {
    %c0_i32 = arith.constant 0 : i32
    %c0_i32_0 = arith.constant 0 : i32
    %c0_i32_1 = arith.constant 0 : i32
    return %c0_i32, %c0_i32_0 : i32, i32
  }
  func.func @transform_6(%arg0: i32) -> (i32, i32) {
    %c0_i32 = arith.constant 0 : i32
    %c0_i32_0 = arith.constant 0 : i32
    return %arg0, %c0_i32 : i32, i32
  }
  func.func @transform_7(%arg0: i32) -> (i32, i32) {
    %c0_i32 = arith.constant 0 : i32
    %c0_i32_0 = arith.constant 0 : i32
    return %arg0, %c0_i32 : i32, i32
  }
}

</mosaic_0001>

<bundles_post_ra>
// kernel: tpu_custom_call.1
= control target key start
LH: loop header
LB: loop body
LE: loop exit
PB: predicated region body
PF: predicated region fallthrough
CT: control target
= control target key end

     0   :  { %13 = vsyncpa [#allocation5], 0  ;;  %s8510_s0 = inlined_call_operand.hbm [shape: f32[8,768], index: 0, kind: input, shape index: {}]   ;;  %s8511_s1 = inlined_call_operand.hbm [shape: f32[8,768], index: 1, kind: input, shape index: {}]   ;;  %s8512_s2 = inlined_call_operand.vmem [shape: s32[8,1], index: 2, kind: input, shape index: {}]   ;;  %s8513_s3 = inlined_call_operand.hbm [shape: bf16[768,128], index: 3, kind: input, shape index: {}]   ;;  %s8514_s4 = inlined_call_operand.hbm [shape: bf16[128,768], index: 4, kind: input, shape index: {}]   ;;  %s8515_s5 = inlined_call_operand.vmem [shape: f32[1,128], index: 5, kind: input, shape index: {}]   ;;  %s8516_s6 = inlined_call_operand.hbm [shape: f32[8,128], index: 6, kind: output, shape index: {0}]   ;;  %s8517_s7 = inlined_call_operand.hbm [shape: f32[8,768], index: 7, kind: output, shape index: {1}]  }
   0x1   :  { %14 = vsyncpa [#allocation8], 0 }
   0x2   :  { %15 = vsyncpa [#allocation11], 0 }
   0x3   :  { %16 = vsyncpa [#allocation6], 0  ;;  %s34_s26 = sshll.u32 %s8511_s1, 4  ;;  %s35_s26 = int_to_ptr.hbm [resolvable:$true] %s34_s26 }
   0x4   :  { %17 = vsyncpa [#allocation14], 0  ;;  %s8158_s27 = smov [#allocation7]   ;;  %s23_s8 = sshll.u32 %s8510_s0, 4  ;;  %s24_s8 = int_to_ptr.hbm [resolvable:$true] %s23_s8 }
   0x5   :  { %s36_s28 = sshll.u32 %s8158_s27, 4  ;;  %s8159_s9 = smov [#allocation4]   ;;  %s37_s28 = int_to_ptr.vmem [resolvable:$true] %s36_s28 }
   0x6   :  { %39 = dma.hbm_to_vmem [thread:$0]  %s35_s26, 768, %s37_s28, [#allocation8]  }
   0x7   :  { %s25_s10 = sshll.u32 %s8159_s9, 4  ;;  %s46_s13 = sshll.u32 %s8513_s3, 4  ;;  %s26_s10 = int_to_ptr.vmem [resolvable:$true] %s25_s10  ;;  %s47_s13 = int_to_ptr.hbm [resolvable:$true] %s46_s13 }
   0x8   :  { %28 = dma.hbm_to_vmem [thread:$0]  %s24_s8, 768, %s26_s10, [#allocation5]  }
   0x9   :  { %s8160_s1 = smov [#allocation9]   ;;  %s59_s17 = sshll.u32 %s8514_s4, 4  ;;  %s60_s17 = int_to_ptr.hbm [resolvable:$true] %s59_s17 }
   0xa   :  { %s48_s14 = sshll.u32 %s8160_s1, 4  ;;  %s8161_s18 = smov 64   ;;  %s49_s14 = int_to_ptr.vmem [resolvable:$true] %s48_s14 }
   0xb   :  { %s8162_s0 = smov 4   ;;  %s8163_s19 = smov [#allocation10]  }
   0xc   :  { %54 = dma.hbm_to_vmem [thread:$0]  %s47_s13, 6144, %s49_s14, [#allocation8], %s8161_s18, %s8161_s18, %s8162_s0  }
   0xd   :  { %s61_s20 = sshll.u32 %s8163_s19, 4  ;;  %s8164_s21 = smov 384   ;;  %s62_s20 = int_to_ptr.vmem [resolvable:$true] %s61_s20 }
   0xe   :  { %s8165_s22 = smov 24  }
   0xf   :  { %67 = dma.hbm_to_vmem [thread:$0]  %s60_s17, 6144, %s62_s20, [#allocation11], %s8164_s21, %s8164_s21, %s8165_s22  }
  0x10   :  { %8148 = dma.done.wait [#allocation5], 768  }
  0x11   :  { %8149 = vsyncadd [#allocation5], 4294966528 }
  0x12   :  { %8150 = dma.done.wait [#allocation8], 6912  }
  0x13   :  { %8151 = vsyncadd [#allocation8], 4294960384 }
  0x14   :  { %8152 = dma.done.wait [#allocation11], 6144  }
  0x15   :  { %8153 = vsyncadd [#allocation11], 4294961152  ;;  %v7445_v0 = vld [vmem:[#allocation9 + $0x38] sm:$0xff]  ;;  %v7444_v2 = vld [vmem:[#allocation9 + $0x30] sm:$0xff]  ;;  %s5278_s8 = sshll.u32 %s8517_s7, 4  ;;  %s8170_s9 = smov [#allocation12]   ;;  %s5279_s8 = int_to_ptr.hbm [resolvable:$true] %s5278_s8 }
  0x16   :  { %v7453_v1 = vld [vmem:[#allocation9 + $0x78] sm:$0xff]  ;;  %520 = vmatpush.bf16.msra.mxu0 %v7445_v0  ;;  %v7452_v3 = vld [vmem:[#allocation9 + $0x70] sm:$0xff]  ;;  %v7443_v8 = vld [vmem:[#allocation9 + $0x28] sm:$0xff]  ;;  %s5265_s7 = sshll.u32 %s8170_s9, 4  ;;  %s5267_s12 = sshll.u32 %s8516_s6, 4  ;;  %s5266_s7 = int_to_ptr.vmem [resolvable:$true] %s5265_s7  ;;  %s5268_s12 = int_to_ptr.hbm [resolvable:$true] %s5267_s12 }
  0x17   :  { %533 = vmatpush.bf16.msra.mxu1 %v7453_v1  ;;  %v7461_v4 = vld [vmem:[#allocation9 + $0xb8] sm:$0xff]  ;;  %v7460_v6 = vld [vmem:[#allocation9 + $0xb0] sm:$0xff]  ;;  %v7451_v9 = vld [vmem:[#allocation9 + $0x68] sm:$0xff] }
  0x18   :  { %v7469_v5 = vld [vmem:[#allocation9 + $0xf8] sm:$0xff]  ;;  %546 = vmatpush.bf16.msra.mxu2 %v7461_v4  ;;  %v7468_v7 = vld [vmem:[#allocation9 + $0xf0] sm:$0xff]  ;;  %v7459_v10 = vld [vmem:[#allocation9 + $0xa8] sm:$0xff] }
  0x19   :  { %559 = vmatpush.bf16.msra.mxu3 %v7469_v5  ;;  %v7467_v11 = vld [vmem:[#allocation9 + $0xe8] sm:$0xff]  ;;  %v7442_v12 = vld [vmem:[#allocation9 + $0x20] sm:$0xff]  ;;  %v7441_v16 = vld [vmem:[#allocation9 + $0x18] sm:$0xff] }
  0x1a   :  { %521 = vmatpush.bf16.msra.mxu0 %v7444_v2  ;;  %v7450_v13 = vld [vmem:[#allocation9 + $0x60] sm:$0xff]  ;;  %v7449_v17 = vld [vmem:[#allocation9 + $0x58] sm:$0xff]  ;;  %v7440_v20 = vld [vmem:[#allocation9 + $0x10] sm:$0xff] }
  0x1b   :  { %534 = vmatpush.bf16.msra.mxu1 %v7452_v3  ;;  %v7458_v14 = vld [vmem:[#allocation9 + $0xa0] sm:$0xff]  ;;  %v7457_v18 = vld [vmem:[#allocation9 + $0x98] sm:$0xff]  ;;  %v7448_v21 = vld [vmem:[#allocation9 + $0x50] sm:$0xff] }
  0x1c   :  { %547 = vmatpush.bf16.msra.mxu2 %v7460_v6  ;;  %v7466_v15 = vld [vmem:[#allocation9 + $0xe0] sm:$0xff]  ;;  %v7465_v19 = vld [vmem:[#allocation9 + $0xd8] sm:$0xff]  ;;  %v7439_v22 = vld [vmem:[#allocation9 + $0x8] sm:$0xff] }
  0x1d   :  { %560 = vmatpush.bf16.msra.mxu3 %v7468_v7  ;;  %v7456_v23 = vld [vmem:[#allocation9 + $0x90] sm:$0xff]  ;;  %v7447_v24 = vld [vmem:[#allocation9 + $0x48] sm:$0xff]  ;;  %v8223_v26 = vld [vmem:[#allocation4] sm:$0xff] }
  0x1e   :  { %522 = vmatpush.bf16.msra.mxu0 %v7443_v8  ;;  %v7464_v25 = vld [vmem:[#allocation9 + $0xd0] sm:$0xff]  ;;  %v8225_v28 = vld [vmem:[#allocation4 + $0x8] sm:$0xff]  ;;  %v93_v29 = vld [vmem:[#allocation7 + $0x8] sm:$0xff] }
  0x1f   :  { %535 = vmatpush.bf16.msra.mxu1 %v7451_v9  ;;  %v92_v27 = vld [vmem:[#allocation7] sm:$0xff]  ;;  %v7438_v30 = vld [vmem:[#allocation9] sm:$0xff]  ;;  %v7455_v31 = vld [vmem:[#allocation9 + $0x88] sm:$0xff]  ;;  %v8231_v34 = vadd.f32 %v93_v29, %v8225_v28 }
  0x20   :  { %548 = vmatpush.bf16.msra.mxu2 %v7459_v10  ;;  %v8228_v32 = vadd.f32 %v92_v27, %v8223_v26  ;;  %v7463_v33 = vld [vmem:[#allocation9 + $0xc8] sm:$0xff]  ;;  %v8233_v35 = vld [vmem:[#allocation4 + $0x10] sm:$0xff]  ;;  %v94_v36 = vld [vmem:[#allocation7 + $0x10] sm:$0xff] }
  0x21   :  { %561 = vmatpush.bf16.msra.mxu3 %v7467_v11  ;;  %v7446_v37 = vld [vmem:[#allocation9 + $0x40] sm:$0xff]  ;;  %v8235_v38 = vld [vmem:[#allocation4 + $0x18] sm:$0xff]  ;;  %v95_v39 = vld [vmem:[#allocation7 + $0x18] sm:$0xff]  ;;  %v8238_v43 = vadd.f32 %v94_v36, %v8233_v35  ;;  %v128_v45 = vpack.c.bf16 %v8231_v34, %v8231_v34 }
  0x22   :  { %523 = vmatpush.bf16.msra.mxu0 %v7442_v12  ;;  %v7477_v40 = vld [vmem:[#allocation9 + $0x138] sm:$0xff]  ;;  %v7454_v42 = vld [vmem:[#allocation9 + $0x80] sm:$0xff]  ;;  %v127_v44 = vpack.c.bf16 %v8228_v32, %v8228_v32  ;;  %v8245_v46 = vadd.f32 %v95_v39, %v8235_v38  ;;  %v7476_v48 = vld [vmem:[#allocation9 + $0x130] sm:$0xff] }
  0x23   :  { %536 = vmatpush.bf16.msra.mxu1 %v7450_v13  ;;  %v7485_v41 = vld [vmem:[#allocation9 + $0x178] sm:$0xff]  ;;  %v7462_v47 = vld [vmem:[#allocation9 + $0xc0] sm:$0xff]  ;;  %v7484_v49 = vld [vmem:[#allocation9 + $0x170] sm:$0xff]  ;;  %v129_v50 = vpack.c.bf16 %v8238_v43, %v8238_v43 }
  0x24   :  { %549 = vmatpush.bf16.msra.mxu2 %v7458_v14  ;;  %v130_v51 = vpack.c.bf16 %v8245_v46, %v8245_v46  ;;  %v7475_v52 = vld [vmem:[#allocation9 + $0x128] sm:$0xff]  ;;  %v7474_v54 = vld [vmem:[#allocation9 + $0x120] sm:$0xff]  ;;  %v7473_v56 = vld [vmem:[#allocation9 + $0x118] sm:$0xff] }
  0x25   :  { %562 = vmatpush.bf16.msra.mxu3 %v7466_v15  ;;  %v7483_v53 = vld [vmem:[#allocation9 + $0x168] sm:$0xff]  ;;  %v7482_v55 = vld [vmem:[#allocation9 + $0x160] sm:$0xff]  ;;  %v7481_v57 = vld [vmem:[#allocation9 + $0x158] sm:$0xff] }
  0x26   :  { %524 = vmatpush.bf16.msra.mxu0 %v7441_v16  ;;  %v7472_v58 = vld [vmem:[#allocation9 + $0x110] sm:$0xff]  ;;  %v7471_v60 = vld [vmem:[#allocation9 + $0x108] sm:$0xff]  ;;  %v8251_v62 = vld [vmem:[#allocation4 + $0x20] sm:$0xff] }
  0x27   :  { %537 = vmatpush.bf16.msra.mxu1 %v7449_v17  ;;  %v7480_v59 = vld [vmem:[#allocation9 + $0x150] sm:$0xff]  ;;  %v7479_v61 = vld [vmem:[#allocation9 + $0x148] sm:$0xff]  ;;  %v97_v1 = vld [vmem:[#allocation7 + $0x28] sm:$0xff] }
  0x28   :  { %550 = vmatpush.bf16.msra.mxu2 %v7457_v18  ;;  %v96_v63 = vld [vmem:[#allocation7 + $0x20] sm:$0xff]  ;;  %v8253_v0 = vld [vmem:[#allocation4 + $0x28] sm:$0xff]  ;;  %v7470_v4 = vld [vmem:[#allocation9 + $0x100] sm:$0xff] }
  0x29   :  { %563 = vmatpush.bf16.msra.mxu3 %v7465_v19  ;;  %v8256_v2 = vadd.f32 %v96_v63, %v8251_v62  ;;  %v8259_v3 = vadd.f32 %v97_v1, %v8253_v0  ;;  %v7478_v5 = vld [vmem:[#allocation9 + $0x140] sm:$0xff]  ;;  %v5660_v39 = vld [vmem:[#allocation10 + $0x168] sm:$0xf0] }
  0x2a   :  { %525 = vmatpush.bf16.msra.mxu0 %v7440_v20  ;;  %v8268_v14 = vld [vmem:[%s8515_s5] ss:$0 sm:$0xff]  ;;  %v7510_v1 = vld [vmem:[#allocation10 + $0xc4] sm:$0xf] }
  0x2b   :  { %538 = vmatpush.bf16.msra.mxu1 %v7448_v21  ;;  %v131_v6 = vpack.c.bf16 %v8256_v2, %v8256_v2  ;;  %v132_v7 = vpack.c.bf16 %v8259_v3, %v8259_v3  ;;  %v112_v29 = vld [vmem:[%s8512_s2] sm:$0xff] }
  0x2c   :  { %551 = vmatpush.bf16.msra.mxu2 %v7456_v23 }
  0x2d   :  { %564 = vmatpush.bf16.msra.mxu3 %v7464_v25 }
  0x2e   :  { %526 = vmatpush.bf16.msra.mxu0 %v7439_v22 }
  0x2f   :  { %539 = vmatpush.bf16.msra.mxu1 %v7447_v24 }
  0x30   :  { %552 = vmatpush.bf16.msra.mxu2 %v7455_v31  ;;  %v7531_v31 = vld [vmem:[#allocation10 + $0x164] sm:$0xf0] }
  0x31   :  { %565 = vmatpush.bf16.msra.mxu3 %v7463_v33  ;;  %v8166_v33 = vmov 0  }
  0x32   :  { %527 = vmatpush.bf16.msra.mxu0 %v7438_v30  ;;  %v5658_v30 = vld [vmem:[#allocation10 + $0x150] sm:$0xf]  ;;  %7979 = vset.pattern.permute.xlu1 %v8166_v33 }
  0x33   :  { %540 = vmatpush.bf16.msra.mxu1 %v7446_v37  ;;  %v5659_v36 = vor.u32 %v7531_v31, %v5658_v30  ;;  %v7528_v37 = vld [vmem:[#allocation10 + $0x154] sm:$0xf]  ;;  %7980 = vset.pattern.permute.xlu0 %v8166_v33 }
  0x34   :  { %553 = vmatpush.bf16.msra.mxu2 %v7454_v42  ;;  %114 = vperm.xlu1 %7979, %v112_v29   ;;  %v7525_v42 = vld [vmem:[#allocation10 + $0x134] sm:$0xf0] }
  0x35   :  { %528 = vmatmul.bf16.vlgmr.msra.gmra.mxu0 %v127_v44  ;;  %566 = vmatpush.bf16.msra.mxu3 %v7462_v47  ;;  %v7522_v44 = vld [vmem:[#allocation10 + $0x124] sm:$0xf] }
  0x36   :  { %572 = vmatpush.bf16.msrb.mxu0 %v7477_v40  ;;  %541 = vmatmul.bf16.vlgmr.msra.gmra.mxu1 %v128_v45  ;;  %v5634_v40 = vld [vmem:[#allocation10 + $0x120] sm:$0xf]  ;;  %v5636_v45 = vld [vmem:[#allocation10 + $0x138] sm:$0xf0] }
  0x37   :  { %585 = vmatpush.bf16.msrb.mxu1 %v7485_v41  ;;  %554 = vmatmul.bf16.vlgmr.msra.gmra.mxu2 %v129_v50  ;;  %v5663_v41 = vor.u32 %v7528_v37, %v5660_v39  ;;  %v5635_v47 = vor.u32 %v7525_v42, %v5634_v40  ;;  %v7519_v50 = vld [vmem:[#allocation10 + $0x104] sm:$0xf0]  ;;  %v7520_v37 = vld [vmem:[#allocation10 + $0x10c] sm:$0xf0]  ;;  %v7517_v39 = vld [vmem:[#allocation10 + $0xfc] sm:$0xf] }
  0x38   :  { %567 = vmatmul.bf16.vlgmr.msra.gmra.mxu3 %v130_v51  ;;  %911 = vmatpush.bf16.msrb.mxu2 %v5659_v36  ;;  %v7516_v51 = vld [vmem:[#allocation10 + $0xf4] sm:$0xf]  ;;  %v5618_v36 = vld [vmem:[#allocation10 + $0xf8] sm:$0xf] }
  0x39   :  { %924 = vmatpush.bf16.msrb.mxu3 %v5663_v41  ;;  %v5619_v40 = vor.u32 %v7520_v37, %v5618_v36  ;;  %v5620_v41 = vld [vmem:[#allocation10 + $0x110] sm:$0xf0]  ;;  %v7493_v36 = vld [vmem:[#allocation10 + $0x3c] sm:$0xf] }
  0x3a   :  { %573 = vmatpush.bf16.msrb.mxu0 %v7476_v48  ;;  %v5639_v48 = vor.u32 %v7522_v44, %v5636_v45  ;;  %v5623_v42 = vor.u32 %v7517_v39, %v5620_v41  ;;  %v5514_v44 = vld [vmem:[#allocation10 + $0x30] sm:$0xf]  ;;  %v7495_v45 = vld [vmem:[#allocation10 + $0x44] sm:$0xf0]  ;;  %v5524_v39 = vld [vmem:[#allocation10 + $0x50] sm:$0xf0] }
  0x3b   :  { %586 = vmatpush.bf16.msrb.mxu1 %v7484_v49  ;;  %v5610_v49 = vld [vmem:[#allocation10 + $0xf0] sm:$0xf]  ;;  %v7521_v41 = vld [vmem:[#allocation10 + $0x114] sm:$0xf0] }
  0x3c   :  { %912 = vmatpush.bf16.msrb.mxu2 %v5635_v47  ;;  %v7492_v47 = vld [vmem:[#allocation10 + $0x34] sm:$0xf] }
  0x3d   :  { %925 = vmatpush.bf16.msrb.mxu3 %v5639_v48  ;;  %v5516_v48 = vld [vmem:[#allocation10 + $0x48] sm:$0xf0] }
  0x3e   :  { %574 = vmatpush.bf16.msrb.mxu0 %v7475_v52  ;;  %v5612_v52 = vld [vmem:[#allocation10 + $0x108] sm:$0xf0] }
  0x3f   :  { %587 = vmatpush.bf16.msrb.mxu1 %v7483_v53  ;;  %v5666_v53 = vld [vmem:[#allocation10 + $0x158] sm:$0xf]  ;;  %v5615_v63 = vor.u32 %v7516_v51, %v5612_v52  ;;  %v5519_v51 = vor.u32 %v7492_v47, %v5516_v48  ;;  %v5628_v47 = vld [vmem:[#allocation10 + $0x118] sm:$0xf0]  ;;  %v5498_v48 = vld [vmem:[#allocation10 + $0x8] sm:$0xf] }
  0x41   :  { %926 = vmatpush.bf16.msrb.mxu3 %v5615_v63  ;;  %v7508_v63 = vld [vmem:[#allocation10 + $0xac] sm:$0xf0] }
  0x42   :  { %575 = vmatpush.bf16.msrb.mxu0 %v7474_v54  ;;  %v7532_v54 = vld [vmem:[#allocation10 + $0x16c] sm:$0xf0] }
  0x43   :  { %588 = vmatpush.bf16.msrb.mxu1 %v7482_v55  ;;  %v7529_v55 = vld [vmem:[#allocation10 + $0x15c] sm:$0xf] }
  0x46   :  { %576 = vmatpush.bf16.msrb.mxu0 %v7473_v56  ;;  %v5668_v56 = vld [vmem:[#allocation10 + $0x170] sm:$0xf0] }
  0x47   :  { %589 = vmatpush.bf16.msrb.mxu1 %v7481_v57  ;;  %v5611_v57 = vor.u32 %v7519_v50, %v5610_v49  ;;  %v5594_v49 = vld [vmem:[#allocation10 + $0xc8] sm:$0xf]  ;;  %v7514_v50 = vld [vmem:[#allocation10 + $0xdc] sm:$0xf0] }
  0x48   :  { %v5595_v52 = vor.u32 %v7514_v50, %v5594_v49  ;;  %v7490_v49 = vld [vmem:[#allocation10 + $0x1c] sm:$0xf0]  ;;  %v7487_v50 = vld [vmem:[#allocation10 + $0xc] sm:$0xf] }
  0x49   :  { %913 = vmatpush.bf16.msrb.mxu2 %v5611_v57  ;;  %v7489_v57 = vld [vmem:[#allocation10 + $0x14] sm:$0xf0] }
  0x4a   :  { %577 = vmatpush.bf16.msrb.mxu0 %v7472_v58  ;;  %v5586_v58 = vld [vmem:[#allocation10 + $0xc0] sm:$0xf] }
  0x4b   :  { %590 = vmatpush.bf16.msrb.mxu1 %v7480_v59  ;;  %v7513_v59 = vld [vmem:[#allocation10 + $0xd4] sm:$0xf0] }
  0x4e   :  { %578 = vmatpush.bf16.msrb.mxu0 %v7471_v60  ;;  %v5667_v60 = vor.u32 %v7532_v54, %v5666_v53  ;;  %v7511_v53 = vld [vmem:[#allocation10 + $0xcc] sm:$0xf]  ;;  %v5596_v54 = vld [vmem:[#allocation10 + $0xe0] sm:$0xf0] }
  0x4f   :  { %591 = vmatpush.bf16.msrb.mxu1 %v7479_v61  ;;  %v5671_v61 = vor.u32 %v7529_v55, %v5668_v56  ;;  %v5599_v55 = vor.u32 %v7511_v53, %v5596_v54  ;;  %v5490_v56 = vld [vmem:[#allocation10] sm:$0xf]  ;;  %v5602_v53 = vld [vmem:[#allocation10 + $0xd0] sm:$0xf] }
  0x52   :  { %579 = vmatpush.bf16.msrb.mxu0 %v7470_v4  ;;  %v5642_v4 = vld [vmem:[#allocation10 + $0x128] sm:$0xf] }
  0x53   :  { %592 = vmatpush.bf16.msrb.mxu1 %v7478_v5  ;;  %v7526_v5 = vld [vmem:[#allocation10 + $0x13c] sm:$0xf0] }
  0x55   :  { %580 = vmatmul.bf16.vlgmr.msrb.gmra.mxu0 %v131_v6  ;;  %v5588_v6 = vld [vmem:[#allocation10 + $0xd8] sm:$0xf0] }
  0x56   :  { %593 = vmatmul.bf16.vlgmr.msrb.gmra.mxu1 %v132_v7  ;;  %937 = vmatpush.bf16.msra.mxu0 %v5667_v60  ;;  %v5643_v7 = vor.u32 %v7526_v5, %v5642_v4  ;;  %v5492_v60 = vld [vmem:[#allocation10 + $0x18] sm:$0xf0] }
  0x57   :  { %950 = vmatpush.bf16.msra.mxu1 %v5671_v61  ;;  %v5570_v61 = vld [vmem:[#allocation10 + $0x98] sm:$0xf]  ;;  %v7505_v5 = vld [vmem:[#allocation10 + $0x9c] sm:$0xf] }
  0x58   :  { %v5571_v4 = vor.u32 %v7508_v63, %v5570_v61  ;;  %v7509_v61 = vld [vmem:[#allocation10 + $0xb4] sm:$0xf0]  ;;  %v7506_v63 = vld [vmem:[#allocation10 + $0xa4] sm:$0xf] }
  0x5a   :  { %938 = vmatpush.bf16.msra.mxu0 %v5643_v7  ;;  %v5674_v7 = vld [vmem:[#allocation10 + $0x160] sm:$0xf] }
  0x5e   :  { %939 = vmatpush.bf16.msra.mxu0 %v5619_v40  ;;  %v5626_v40 = vld [vmem:[#allocation10 + $0x100] sm:$0xf] }
  0x62   :  { %940 = vmatpush.bf16.msra.mxu0 %v5595_v52  ;;  %v5500_v52 = vld [vmem:[#allocation10 + $0x20] sm:$0xf0] }
  0x63   :  { %v5503_v54 = vor.u32 %v7487_v50, %v5500_v52  ;;  %v7547_v50 = vld [vmem:[#allocation9 + $0x68] sm:$0xff] }
  0x66   :  { %941 = vmatpush.bf16.msra.mxu0 %v5571_v4  ;;  %v5580_v4 = vld [vmem:[#allocation10 + $0xb8] sm:$0xf0] }
  0xb2   :  { %v529_v8 = vpop.f32.mrf.mxu0 }
  0xb3   :  { %v542_v9 = vpop.f32.mrf.mxu1  ;;  %v530_v15 = vadd.f32 %v8268_v14, %v529_v8  ;;  %v7523_v8 = vld [vmem:[#allocation10 + $0x12c] sm:$0xf] }
  0xb5   :  { %v543_v18 = vadd.f32 %v542_v9, %v530_v15  ;;  %v5644_v9 = vld [vmem:[#allocation10 + $0x140] sm:$0xf0]  ;;  %v7507_v15 = vld [vmem:[#allocation10 + $0xa4] sm:$0xf0] }
  0xba   :  { %v531_v10 = vpop.f32.mrf.mxu0  ;;  %v555_v12 = vpop.f32.mrf.mxu2 }
  0xbb   :  { %v544_v11 = vpop.f32.mrf.mxu1  ;;  %v568_v13 = vpop.f32.mrf.mxu3  ;;  %v556_v19 = vadd.f32 %v555_v12, %v543_v18  ;;  %v5647_v10 = vor.u32 %v7523_v8, %v5644_v9  ;;  %v5591_v12 = vor.u32 %v7510_v1, %v5588_v6  ;;  %v5572_v6 = vld [vmem:[#allocation10 + $0xb0] sm:$0xf0]  ;;  %v7533_v9 = vld [vmem:[#allocation10 + $0x174] sm:$0xf0] }
  0xbc   :  { %v5587_v11 = vor.u32 %v7513_v59, %v5586_v58  ;;  %v7486_v58 = vld [vmem:[#allocation10 + $0x4] sm:$0xf]  ;;  %v5491_v59 = vor.u32 %v7489_v57, %v5490_v56  ;;  %v5575_v8 = vor.u32 %v7505_v5, %v5572_v6  ;;  %v7512_v56 = vld [vmem:[#allocation10 + $0xd4] sm:$0xf]  ;;  %v5604_v57 = vld [vmem:[#allocation10 + $0xe8] sm:$0xf0]  ;;  %v5583_v5 = vor.u32 %v7506_v63, %v5580_v4 }
  0xbd   :  { %v569_v20 = vadd.f32 %v568_v13, %v556_v19  ;;  %v5562_v13 = vld [vmem:[#allocation10 + $0x90] sm:$0xf]  ;;  %951 = vmatpush.bf16.msra.mxu1 %v5647_v10  ;;  %927 = vmatpush.bf16.msrb.mxu3 %v5591_v12  ;;  %v5495_v1 = vor.u32 %v7486_v58, %v5492_v60  ;;  %v7530_v10 = vld [vmem:[#allocation10 + $0x164] sm:$0xf]  ;;  %v5675_v12 = vor.u32 %v7533_v9, %v5674_v7  ;;  %v5578_v60 = vld [vmem:[#allocation10 + $0xa0] sm:$0xf] }
  0xbe   :  { %914 = vmatpush.bf16.msrb.mxu2 %v5587_v11  ;;  %v5563_v18 = vor.u32 %v7507_v15, %v5562_v13  ;;  %v5676_v11 = vld [vmem:[#allocation10 + $0x178] sm:$0xf0]  ;;  %v5546_v15 = vld [vmem:[#allocation10 + $0x68] sm:$0xf]  ;;  %v5554_v6 = vld [vmem:[#allocation10 + $0x70] sm:$0xf] }
  0xbf   :  { %v5679_v13 = vor.u32 %v7530_v10, %v5676_v11  ;;  %v7503_v7 = vld [vmem:[#allocation10 + $0x84] sm:$0xf0]  ;;  %v5556_v9 = vld [vmem:[#allocation10 + $0x88] sm:$0xf0]  ;;  %v7565_v63 = vld [vmem:[#allocation9 + $0xf8] sm:$0xff] }
  0xc0   :  { %v5555_v10 = vor.u32 %v7503_v7, %v5554_v6  ;;  %v7545_v4 = vld [vmem:[#allocation9 + $0x58] sm:$0xff]  ;;  %v7536_v6 = vld [vmem:[#allocation9 + $0x10] sm:$0xff] }
  0xc1   :  { %952 = vmatpush.bf16.msra.mxu1 %v5623_v42  ;;  %v5527_v42 = vor.u32 %v7493_v36, %v5524_v39  ;;  %v7541_v36 = vld [vmem:[#allocation9 + $0x38] sm:$0xff]  ;;  %v7544_v7 = vld [vmem:[#allocation9 + $0x50] sm:$0xff] }
  0xc2   :  { %v557_v16 = vpop.f32.mrf.mxu2  ;;  %915 = vmatpush.bf16.msrb.mxu2 %v5563_v18 }
  0xc3   :  { %v570_v17 = vpop.f32.mrf.mxu3  ;;  %v7504_v16 = vld [vmem:[#allocation10 + $0x94] sm:$0xf] }
  0xc4   :  { %v5564_v17 = vld [vmem:[#allocation10 + $0xa8] sm:$0xf0] }
  0xc5   :  { %v5567_v19 = vor.u32 %v7504_v16, %v5564_v17  ;;  %953 = vmatpush.bf16.msra.mxu1 %v5599_v55  ;;  %v7502_v16 = vld [vmem:[#allocation10 + $0x7c] sm:$0xf0]  ;;  %v7499_v17 = vld [vmem:[#allocation10 + $0x6c] sm:$0xf]  ;;  %v7515_v55 = vld [vmem:[#allocation10 + $0xe4] sm:$0xf0] }
  0xc6   :  { %v5547_v18 = vor.u32 %v7502_v16, %v5546_v15  ;;  %v5603_v58 = vor.u32 %v7515_v55, %v5602_v53  ;;  %v7494_v15 = vld [vmem:[#allocation10 + $0x44] sm:$0xf]  ;;  %v5532_v16 = vld [vmem:[#allocation10 + $0x58] sm:$0xf0]  ;;  %v8167_v53 = vmov 0.0  }
  0xc7   :  { %928 = vmatpush.bf16.msrb.mxu3 %v5567_v19  ;;  %v5548_v19 = vld [vmem:[#allocation10 + $0x80] sm:$0xf0] }
  0xc8   :  { %942 = vmatpush.bf16.msra.mxu0 %v5547_v18  ;;  %v5535_v18 = vor.u32 %v7494_v15, %v5532_v16  ;;  %v7553_v15 = vld [vmem:[#allocation9 + $0x98] sm:$0xff] }
  0xc9   :  { %954 = vmatpush.bf16.msra.mxu1 %v5575_v8  ;;  %v7500_v8 = vld [vmem:[#allocation10 + $0x74] sm:$0xf]  ;;  %v7561_v16 = vld [vmem:[#allocation9 + $0xd8] sm:$0xff] }
  0xca   :  { %v5559_v11 = vor.u32 %v7500_v8, %v5556_v9  ;;  %v7555_v8 = vld [vmem:[#allocation9 + $0xa8] sm:$0xff] }
  0xcb   :  { %v7563_v9 = vld [vmem:[#allocation9 + $0xe8] sm:$0xff] }
  0xd2   :  { %v581_v21 = vpop.f32.mrf.mxu0 }
  0xd3   :  { %v594_v22 = vpop.f32.mrf.mxu1  ;;  %v582_v23 = vadd.f32 %v581_v21, %v569_v20  ;;  %v5538_v20 = vld [vmem:[#allocation10 + $0x60] sm:$0xf]  ;;  %v7501_v21 = vld [vmem:[#allocation10 + $0x74] sm:$0xf0] }
  0xd5   :  { %v8271_v24 = vadd.f32 %v594_v22, %v582_v23  ;;  %v7498_v22 = vld [vmem:[#allocation10 + $0x64] sm:$0xf]  ;;  %v5540_v23 = vld [vmem:[#allocation10 + $0x78] sm:$0xf0] }
  0xd6   :  { %v5543_v29 = vor.u32 %v7498_v22, %v5540_v23  ;;  %v5551_v22 = vor.u32 %v7499_v17, %v5548_v19  ;;  %v5506_v19 = vld [vmem:[#allocation10 + $0x10] sm:$0xf] }
  0xd7   :  { %598 = vmax.xlane.f32.xlu0 %v8271_v24 }
  0xd8   :  { %929 = vmatpush.bf16.msrb.mxu3 %v5543_v29  ;;  %955 = vmatpush.bf16.msra.mxu1 %v5551_v22  ;;  %v7488_v22 = vld [vmem:[#allocation10 + $0x14] sm:$0xf] }
  0xda   :  { %v583_v25 = vpop.f32.mrf.mxu0 }
  0xdb   :  { %v596_v27 = vpop.f32.mrf.mxu1  ;;  %v5539_v25 = vor.u32 %v7501_v21, %v5538_v20  ;;  %v5650_v20 = vld [vmem:[#allocation10 + $0x130] sm:$0xf]  ;;  %v7527_v21 = vld [vmem:[#allocation10 + $0x144] sm:$0xf0] }
  0xdc   :  { %930 = vmatpush.bf16.msrb.mxu3 %v5519_v51  ;;  %v5651_v23 = vor.u32 %v7527_v21, %v5650_v20  ;;  %956 = vmatpush.bf16.msra.mxu1 %v5527_v42  ;;  %v5499_v51 = vor.u32 %v7490_v49, %v5498_v48  ;;  %v7491_v21 = vld [vmem:[#allocation10 + $0x24] sm:$0xf0]  ;;  %v7548_v42 = vld [vmem:[#allocation9 + $0x70] sm:$0xff] }
  0xdd   :  { %916 = vmatpush.bf16.msrb.mxu2 %v5539_v25  ;;  %v7524_v25 = vld [vmem:[#allocation10 + $0x134] sm:$0xf]  ;;  %v7539_v49 = vld [vmem:[#allocation9 + $0x28] sm:$0xff] }
  0xe0   :  { %931 = vmatpush.bf16.msrb.mxu3 %v5495_v1  ;;  %957 = vmatpush.bf16.msra.mxu1 %v5503_v54  ;;  %v5579_v1 = vor.u32 %v7509_v61, %v5578_v60  ;;  %v7557_v61 = vld [vmem:[#allocation9 + $0xb8] sm:$0xff] }
  0xe4   :  { %976 = vmatpush.bf16.msra.mxu3 %v5679_v13  ;;  %v7497_v13 = vld [vmem:[#allocation10 + $0x54] sm:$0xf0] }
 0x14a   :  { %v599_v27 = vpop.xlane.xlu0 %598 }
 0x14b   :  { %v600_v30 = vsub.f32 %v8271_v24, %v599_v27  ;;  %v5515_v24 = vor.u32 %v7495_v45, %v5514_v44  ;;  %v5652_v27 = vld [vmem:[#allocation10 + $0x148] sm:$0xf0]  ;;  %v5627_v44 = vor.u32 %v7521_v41, %v5626_v40  ;;  %v7518_v45 = vld [vmem:[#allocation10 + $0x104] sm:$0xf]  ;;  %v7540_v41 = vld [vmem:[#allocation9 + $0x30] sm:$0xff] }
 0x14c   :  { %v5655_v29 = vor.u32 %v7524_v25, %v5652_v27  ;;  %v5507_v25 = vor.u32 %v7491_v21, %v5506_v19  ;;  %v7534_v19 = vld [vmem:[#allocation9] sm:$0xff]  ;;  %v7573_v21 = vld [vmem:[#allocation9 + $0x138] sm:$0xff] }
 0x14d   :  { %v601_v31 = vmul.f32 1.442695, %v600_v30  ;;  %917 = vmatpush.bf16.msrb.mxu2 %v5515_v24  ;;  %v5522_v30 = vld [vmem:[#allocation10 + $0x38] sm:$0xf]  ;;  %v5631_v24 = vor.u32 %v7518_v45, %v5628_v47  ;;  %v115_v45 = vpop.permute.xlu1 %114 }
 0x14e   :  { %977 = vmatpush.bf16.msra.mxu3 %v5655_v29  ;;  %v110_v29 = vlaneseq }
 0x14f   :  { %7982 = vpow2.f32 %v601_v31  ;;  %v7496_v31 = vld [vmem:[#allocation10 + $0x4c] sm:$0xf0] }
 0x150   :  { %v5523_v37 = vor.u32 %v7496_v31, %v5522_v30  ;;  %v111_v40 = vand.u32 127, %v110_v29  ;;  %v7580_v29 = vld [vmem:[#allocation9 + $0x170] sm:$0xff] }
 0x151   :  { %918 = vmatpush.bf16.msrb.mxu2 %v5491_v59  ;;  %v5607_v59 = vor.u32 %v7512_v56, %v5604_v57  ;;  %v7538_v57 = vld [vmem:[#allocation9 + $0x20] sm:$0xff] }
 0x152   :  { %943 = vmatpush.bf16.msra.mxu0 %v5523_v37  ;;  %978 = vmatpush.bf16.msra.mxu3 %v5631_v24  ;;  %v7549_v37 = vld [vmem:[#allocation9 + $0x78] sm:$0xff]  ;;  %vm116_vm2 = vcmp.eq.s32.totalorder %v111_v40, %v115_v45  ;;  %v7578_v40 = vld [vmem:[#allocation9 + $0x160] sm:$0xff]  ;;  %v7576_v45 = vld [vmem:[#allocation9 + $0x150] sm:$0xff] }
 0x153   :  { %1464 = vmatpush.bf16.msrb.mxu1 %v7549_v37  ;;  %v8281_v54 = vsel %vm116_vm2, 1.0, %v8167_v53  ;;  %v7579_v37 = vld [vmem:[#allocation9 + $0x168] sm:$0xff]  ;;  %v1028_v53 = vadd.f32 0.03137255, %v8235_v38 }
 0x155   :  { %v8278_v33 = vpop.eup %7982  ;;  %963 = vmatpush.bf16.msra.mxu2 %v5675_v12  ;;  %v5530_v12 = vld [vmem:[#allocation10 + $0x40] sm:$0xf] }
 0x156   :  { %603 = vadd.xlane.f32.xlu0 %v8278_v33  ;;  %944 = vmatpush.bf16.msra.mxu0 %v5499_v51  ;;  %v5531_v17 = vor.u32 %v7497_v13, %v5530_v12  ;;  %v7554_v12 = vld [vmem:[#allocation9 + $0xa0] sm:$0xff] }
 0x157   :  { %979 = vmatpush.bf16.msra.mxu3 %v5607_v59  ;;  %1465 = vmatpush.bf16.msrb.mxu1 %v7548_v42  ;;  %v7562_v13 = vld [vmem:[#allocation9 + $0xe0] sm:$0xff]  ;;  %v7577_v42 = vld [vmem:[#allocation9 + $0x158] sm:$0xff] }
 0x159   :  { %964 = vmatpush.bf16.msra.mxu2 %v5651_v23  ;;  %v5508_v23 = vld [vmem:[#allocation10 + $0x28] sm:$0xf0] }
 0x15a   :  { %v5511_v27 = vor.u32 %v7488_v22, %v5508_v23  ;;  %1451 = vmatpush.bf16.msrb.mxu0 %v7541_v36  ;;  %v7581_v22 = vld [vmem:[#allocation9 + $0x178] sm:$0xff]  ;;  %v7551_v23 = vld [vmem:[#allocation9 + $0x88] sm:$0xff] }
 0x15b   :  { %980 = vmatpush.bf16.msra.mxu3 %v5583_v5  ;;  %1466 = vmatpush.bf16.msrb.mxu1 %v7547_v50  ;;  %v7564_v5 = vld [vmem:[#allocation9 + $0xf0] sm:$0xff]  ;;  %v7571_v36 = vld [vmem:[#allocation9 + $0x128] sm:$0xff]  ;;  %v7574_v50 = vld [vmem:[#allocation9 + $0x140] sm:$0xff] }
 0x15d   :  { %965 = vmatpush.bf16.msra.mxu2 %v5627_v44 }
 0x15e   :  { %1452 = vmatpush.bf16.msrb.mxu0 %v7540_v41  ;;  %v7569_v41 = vld [vmem:[#allocation9 + $0x118] sm:$0xff] }
 0x15f   :  { %981 = vmatpush.bf16.msra.mxu3 %v5559_v11  ;;  %v7543_v11 = vld [vmem:[#allocation9 + $0x48] sm:$0xff] }
 0x161   :  { %966 = vmatpush.bf16.msra.mxu2 %v5603_v58  ;;  %v7546_v58 = vld [vmem:[#allocation9 + $0x60] sm:$0xff] }
 0x162   :  { %1453 = vmatpush.bf16.msrb.mxu0 %v7539_v49  ;;  %1467 = vmatpush.bf16.msrb.mxu1 %v7546_v58  ;;  %v7566_v49 = vld [vmem:[#allocation9 + $0x100] sm:$0xff] }
 0x163   :  { %982 = vmatpush.bf16.msra.mxu3 %v5535_v18  ;;  %v7560_v18 = vld [vmem:[#allocation9 + $0xd0] sm:$0xff] }
 0x165   :  { %967 = vmatpush.bf16.msra.mxu2 %v5579_v1  ;;  %v7537_v1 = vld [vmem:[#allocation9 + $0x18] sm:$0xff] }
 0x166   :  { %1454 = vmatpush.bf16.msrb.mxu0 %v7538_v57  ;;  %1468 = vmatpush.bf16.msrb.mxu1 %v7545_v4 }
 0x167   :  { %983 = vmatpush.bf16.msra.mxu3 %v5511_v27  ;;  %v7572_v27 = vld [vmem:[#allocation9 + $0x130] sm:$0xff] }
 0x169   :  { %968 = vmatpush.bf16.msra.mxu2 %v5555_v10  ;;  %v7535_v10 = vld [vmem:[#allocation9 + $0x8] sm:$0xff] }
 0x16a   :  { %1455 = vmatpush.bf16.msrb.mxu0 %v7537_v1  ;;  %1469 = vmatpush.bf16.msrb.mxu1 %v7544_v7  ;;  %v5681_v1 = vadd.f32 -0.03137255, %v8225_v28 }
 0x16d   :  { %969 = vmatpush.bf16.msra.mxu2 %v5531_v17  ;;  %v7552_v17 = vld [vmem:[#allocation9 + $0x90] sm:$0xff] }
 0x16e   :  { %1456 = vmatpush.bf16.msrb.mxu0 %v7536_v6  ;;  %1470 = vmatpush.bf16.msrb.mxu1 %v7543_v11  ;;  %v1026_v6 = vadd.f32 0.03137255, %v8225_v28 }
 0x171   :  { %970 = vmatpush.bf16.msra.mxu2 %v5507_v25  ;;  %v7559_v25 = vld [vmem:[#allocation9 + $0xc8] sm:$0xff] }
 0x172   :  { %1457 = vmatpush.bf16.msrb.mxu0 %v7535_v10 }
 0x176   :  { %1458 = vmatpush.bf16.msrb.mxu0 %v7534_v19 }
 0x1c9   :  { %v604_v20 = vpop.xlane.xlu0 %603 }
 0x1ca   :  { %7984 = vrcp.f32 %v604_v20  ;;  %v616_v44 = vand.u32 2147483648, %v604_v20  ;;  %v614_v24 = vand.u32 2147483647, %v604_v20  ;;  %vm610_vm1 = vweird.f32 %v604_v20 }
 0x1cc   :  { %v617_v51 = vor.u32 1.1754944e-38, %v616_v44  ;;  %vm615_vm4 = vcmp.eq.f32.partialorder %v614_v24, 8.507059e+37  ;;  %v7568_v44 = vld [vmem:[#allocation9 + $0x110] sm:$0xff]  ;;  %v7575_v24 = vld [vmem:[#allocation9 + $0x148] sm:$0xff] }
 0x1d0   :  { %v7985_v30 = vpop.eup %7984 }
 0x1d1   :  { %v606_v31 = vmul.f32 %v7985_v30, %v604_v20  ;;  %vm611_vm0 = vweird.f32 %v7985_v30  ;;  %v7542_v20 = vld [vmem:[#allocation9 + $0x40] sm:$0xff] }
 0x1d2   :  { %vm612_vm3 = vmor %vm610_vm1, %vm611_vm0  ;;  %1471 = vmatpush.bf16.msrb.mxu1 %v7542_v20 }
 0x1d3   :  { %v607_v39 = vsub.f32 1.0, %v606_v31  ;;  %v7558_v31 = vld [vmem:[#allocation9 + $0xc0] sm:$0xff] }
 0x1d5   :  { %v608_v47 = vmul.f32 %v7985_v30, %v607_v39  ;;  %v7570_v39 = vld [vmem:[#allocation9 + $0x120] sm:$0xff] }
 0x1d7   :  { %v609_v48 = vadd.f32 %v7985_v30, %v608_v47  ;;  %v7567_v47 = vld [vmem:[#allocation9 + $0x108] sm:$0xff] }
 0x1d9   :  { %v613_v52 = vsel %vm612_vm3, %v7985_v30, %v609_v48  ;;  %v7550_v30 = vld [vmem:[#allocation9 + $0x80] sm:$0xff]  ;;  %v5682_v48 = vadd.f32 -0.03137255, %v8233_v35 }
 0x1da   :  { %v618_v55 = vsel %vm615_vm4, %v617_v51, %v613_v52  ;;  %v5683_v51 = vadd.f32 -0.03137255, %v8235_v38  ;;  %v1027_v52 = vadd.f32 0.03137255, %v8233_v35 }
 0x1db   :  { %v619_v56 = vmul.f32 %v8278_v33, %v618_v55  ;;  %v7556_v33 = vld [vmem:[#allocation9 + $0xb0] sm:$0xff] }
 0x1dc   :  { %v1022_v58 = vmax.f32 %v5683_v51, 0.0  ;;  %v1033_v35 = vmin.f32 %v1027_v52, 1.0 }
 0x1dd   :  { %v621_v59 = vsub.f32 %v619_v56, %v8281_v54  ;;  %v1021_v56 = vmax.f32 %v5682_v48, 0.0 }
 0x1df   :  { %v622_v60 = vpack.c.bf16 %v621_v59, %v621_v59  ;;  %v5680_v59 = vadd.f32 -0.03137255, %v8223_v26 }
 0x1e1   :  { %919 = vmatmul.bf16.vlgmr.msrb.gmra.mxu2 %v622_v60  ;;  %932 = vmatmul.bf16.vlgmr.msrb.gmra.mxu3 %v622_v60  ;;  %v1019_v11 = vmax.f32 %v5680_v59, 0.0 }
 0x1e2   :  { %945 = vmatmul.bf16.vlgmr.msra.gmra.mxu0 %v622_v60  ;;  %958 = vmatmul.bf16.vlgmr.msra.gmra.mxu1 %v622_v60 }
 0x1e3   :  { %1477 = vmatpush.bf16.msrb.mxu2 %v7557_v61  ;;  %1490 = vmatpush.bf16.msrb.mxu3 %v7565_v63 }
 0x1e4   :  { %1503 = vmatpush.bf16.msra.mxu0 %v7573_v21  ;;  %1516 = vmatpush.bf16.msra.mxu1 %v7581_v22 }
 0x1e7   :  { %1478 = vmatpush.bf16.msrb.mxu2 %v7556_v33  ;;  %1491 = vmatpush.bf16.msrb.mxu3 %v7564_v5  ;;  %v1034_v33 = vmin.f32 %v1028_v53, 1.0  ;;  %v1025_v5 = vadd.f32 0.03137255, %v8223_v26 }
 0x1e8   :  { %1504 = vmatpush.bf16.msra.mxu0 %v7572_v27  ;;  %1517 = vmatpush.bf16.msra.mxu1 %v7580_v29 }
 0x1eb   :  { %1479 = vmatpush.bf16.msrb.mxu2 %v7555_v8  ;;  %1492 = vmatpush.bf16.msrb.mxu3 %v7563_v9 }
 0x1ec   :  { %1505 = vmatpush.bf16.msra.mxu0 %v7571_v36  ;;  %1518 = vmatpush.bf16.msra.mxu1 %v7579_v37  ;;  %v5685_v36 = vadd.f32 -0.03137255, %v8253_v0  ;;  %v1029_v37 = vadd.f32 0.03137255, %v8251_v62 }
 0x1ee   :  { %v1035_v48 = vmin.f32 %v1029_v37, 1.0  ;;  %v6058_v37 = vld [vmem:[#allocation10 + $0x170] sm:$0xf0] }
 0x1ef   :  { %1480 = vmatpush.bf16.msrb.mxu2 %v7554_v12  ;;  %1493 = vmatpush.bf16.msrb.mxu3 %v7562_v13  ;;  %v1020_v12 = vmax.f32 %v5681_v1, 0.0 }
 0x1f0   :  { %1506 = vmatpush.bf16.msra.mxu0 %v7570_v39  ;;  %1519 = vmatpush.bf16.msra.mxu1 %v7578_v40  ;;  %v1030_v39 = vadd.f32 0.03137255, %v8253_v0 }
 0x1f1   :  { %971 = vmatmul.bf16.vlgmr.msra.gmra.mxu2 %v622_v60  ;;  %984 = vmatmul.bf16.vlgmr.msra.gmra.mxu3 %v622_v60  ;;  %v8168_v60 = vmov -0.007843138  }
 0x1f3   :  { %1481 = vmatpush.bf16.msrb.mxu2 %v7553_v15  ;;  %1494 = vmatpush.bf16.msrb.mxu3 %v7561_v16  ;;  %v1031_v16 = vmin.f32 %v1025_v5, 1.0 }
 0x1f4   :  { %1507 = vmatpush.bf16.msra.mxu0 %v7569_v41  ;;  %1520 = vmatpush.bf16.msra.mxu1 %v7577_v42 }
 0x1f7   :  { %1482 = vmatpush.bf16.msrb.mxu2 %v7552_v17  ;;  %1495 = vmatpush.bf16.msrb.mxu3 %v7560_v18  ;;  %v1032_v17 = vmin.f32 %v1026_v6, 1.0 }
 0x1f8   :  { %1508 = vmatpush.bf16.msra.mxu0 %v7568_v44  ;;  %1521 = vmatpush.bf16.msra.mxu1 %v7576_v45  ;;  %v1024_v44 = vmax.f32 %v5685_v36, 0.0  ;;  %v7625_v36 = vld [vmem:[#allocation10 + $0x15c] sm:$0xf] }
 0x1fb   :  { %1483 = vmatpush.bf16.msrb.mxu2 %v7551_v23  ;;  %1496 = vmatpush.bf16.msrb.mxu3 %v7559_v25 }
 0x1fc   :  { %1509 = vmatpush.bf16.msra.mxu0 %v7567_v47  ;;  %1522 = vmatpush.bf16.msra.mxu1 %v7575_v24 }
 0x1ff   :  { %1484 = vmatpush.bf16.msrb.mxu2 %v7550_v30  ;;  %1497 = vmatpush.bf16.msrb.mxu3 %v7558_v31  ;;  %v5684_v31 = vadd.f32 -0.03137255, %v8251_v62 }
 0x200   :  { %1510 = vmatpush.bf16.msra.mxu0 %v7566_v49  ;;  %1523 = vmatpush.bf16.msra.mxu1 %v7574_v50  ;;  %v1036_v50 = vmin.f32 %v1030_v39, 1.0 }
 0x201   :  { %v1023_v42 = vmax.f32 %v5684_v31, 0.0 }
 0x25f   :  { %v946_v55 = vpop.f32.mrf.mxu0  ;;  %v959_v57 = vpop.f32.mrf.mxu1 }
 0x260   :  { %vm991_vm5 = vcmp.ge.f32.partialorder %v946_v55, 0.0  ;;  %vm992_vm6 = vcmp.ge.f32.partialorder %v959_v57, 0.0 }
 0x261   :  { %v997_v61 = vsel %vm991_vm5, 0.007843138, %v8168_v60  ;;  %v998_v63 = vsel %vm992_vm6, 0.007843138, %v8168_v60 }
 0x262   :  { %v1003_v4 = vadd.f32 %v997_v61, %v8238_v43  ;;  %v1004_v38 = vadd.f32 %v998_v63, %v8245_v46 }
 0x264   :  { %v1039_v7 = vmax.f32 %v1003_v4, %v1021_v56  ;;  %v1040_v8 = vmax.f32 %v1004_v38, %v1022_v58  ;;  %v920_v9 = vpop.f32.mrf.mxu2  ;;  %v933_v10 = vpop.f32.mrf.mxu3 }
 0x265   :  { %vm989_vm7 = vcmp.ge.f32.partialorder %v920_v9, 0.0  ;;  %vm990_vm8 = vcmp.ge.f32.partialorder %v933_v10, 0.0 }
 0x266   :  { %v8297_v13 = vmin.f32 %v1039_v7, %v1033_v35  ;;  %v8299_v15 = vmin.f32 %v1040_v8, %v1034_v33  ;;  %v995_v43 = vsel %vm989_vm7, 0.007843138, %v8168_v60  ;;  %v996_v46 = vsel %vm990_vm8, 0.007843138, %v8168_v60 }
 0x267   :  { %v1001_v26 = vadd.f32 %v995_v43, %v8228_v32  ;;  %v1002_v28 = vadd.f32 %v996_v46, %v8231_v34  ;;  %v948_v18 = vpop.f32.mrf.mxu0  ;;  %v961_v19 = vpop.f32.mrf.mxu1  ;;  %v7627_v43 = vld [vmem:[#allocation10 + $0x164] sm:$0xf0]  ;;  %v7624_v46 = vld [vmem:[#allocation10 + $0x154] sm:$0xf] }
 0x268   :  { %v1063_v20 = vpack.c.bf16 %v8297_v13, %v8297_v13  ;;  %v1064_v21 = vpack.c.bf16 %v8299_v15, %v8299_v15  ;;  %v7618_v18 = vld [vmem:[#allocation10 + $0x124] sm:$0xf]  ;;  %v6026_v19 = vld [vmem:[#allocation10 + $0x138] sm:$0xf0] }
 0x269   :  { %v1037_v22 = vmax.f32 %v1001_v26, %v1019_v11  ;;  %v1038_v23 = vmax.f32 %v1002_v28, %v1020_v12  ;;  %v6048_v12 = vld [vmem:[#allocation10 + $0x150] sm:$0xf]  ;;  %v6050_v26 = vld [vmem:[#allocation10 + $0x168] sm:$0xf0]  ;;  %v7621_v28 = vld [vmem:[#allocation10 + $0x134] sm:$0xf0] }
 0x26a   :  { %1485 = vmatmul.bf16.vlgmr.msrb.gmra.mxu2 %v1063_v20  ;;  %1498 = vmatmul.bf16.vlgmr.msrb.gmra.mxu3 %v1064_v21  ;;  %v6029_v21 = vor.u32 %v7618_v18, %v6026_v19  ;;  %v7610_v18 = vld [vmem:[#allocation10 + $0xdc] sm:$0xf0] }
 0x26b   :  { %v8309_v25 = vmin.f32 %v1037_v22, %v1031_v16  ;;  %v8311_v27 = vmin.f32 %v1038_v23, %v1032_v17  ;;  %v6024_v16 = vld [vmem:[#allocation10 + $0x120] sm:$0xf]  ;;  %v6053_v17 = vor.u32 %v7624_v46, %v6050_v26  ;;  %v6000_v22 = vld [vmem:[#allocation10 + $0xf0] sm:$0xf]  ;;  %v7615_v23 = vld [vmem:[#allocation10 + $0x104] sm:$0xf0] }
 0x26c   :  { %v922_v32 = vpop.f32.mrf.mxu2  ;;  %v935_v29 = vpop.f32.mrf.mxu3  ;;  %v6025_v20 = vor.u32 %v7621_v28, %v6024_v16  ;;  %v6001_v39 = vor.u32 %v7615_v23, %v6000_v22  ;;  %v7591_v26 = vld [vmem:[#allocation10 + $0x44] sm:$0xf0]  ;;  %v7588_v16 = vld [vmem:[#allocation10 + $0x34] sm:$0xf]  ;;  %v5906_v28 = vld [vmem:[#allocation10 + $0x48] sm:$0xf0] }
 0x26d   :  { %v1061_v34 = vpack.c.bf16 %v8309_v25, %v8309_v25  ;;  %v1062_v30 = vpack.c.bf16 %v8311_v27, %v8311_v27  ;;  %1855 = vmatpush.bf16.msra.mxu3 %v6053_v17  ;;  %v7612_v32 = vld [vmem:[#allocation10 + $0xf4] sm:$0xf]  ;;  %v6002_v29 = vld [vmem:[#allocation10 + $0x108] sm:$0xf0]  ;;  %v5984_v17 = vld [vmem:[#allocation10 + $0xc8] sm:$0xf]  ;;  %v5909_v19 = vor.u32 %v7588_v16, %v5906_v28 }
 0x26e   :  { %v5986_v22 = vld [vmem:[#allocation10 + $0xe0] sm:$0xf0]  ;;  %v5992_v28 = vld [vmem:[#allocation10 + $0xd0] sm:$0xf] }
 0x26f   :  { %1459 = vmatmul.bf16.vlgmr.msrb.gmra.mxu0 %v1061_v34  ;;  %1472 = vmatmul.bf16.vlgmr.msrb.gmra.mxu1 %v1062_v30  ;;  %v6056_v34 = vld [vmem:[#allocation10 + $0x158] sm:$0xf]  ;;  %v7628_v30 = vld [vmem:[#allocation10 + $0x16c] sm:$0xf0] }
 0x270   :  { %v6057_v31 = vor.u32 %v7628_v30, %v6056_v34  ;;  %v7582_v34 = vld [vmem:[#allocation10 + $0x4] sm:$0xf] }
 0x271   :  { %1856 = vmatpush.bf16.msra.mxu3 %v6029_v21  ;;  %v7607_v21 = vld [vmem:[#allocation10 + $0xcc] sm:$0xf] }
 0x272   :  { %1868 = vmatpush.bf16.msrb.mxu0 %v6057_v31  ;;  %v5989_v23 = vor.u32 %v7607_v21, %v5986_v22  ;;  %v5882_v31 = vld [vmem:[#allocation10 + $0x18] sm:$0xf0]  ;;  %v5994_v21 = vld [vmem:[#allocation10 + $0xe8] sm:$0xf0] }
 0x274   :  { %v972_v40 = vpop.f32.mrf.mxu2  ;;  %v985_v41 = vpop.f32.mrf.mxu3 }
 0x275   :  { %vm993_vm9 = vcmp.ge.f32.partialorder %v972_v40, 0.0  ;;  %vm994_vm10 = vcmp.ge.f32.partialorder %v985_v41, 0.0  ;;  %v5976_v40 = vld [vmem:[#allocation10 + $0xc0] sm:$0xf]  ;;  %v7609_v41 = vld [vmem:[#allocation10 + $0xd4] sm:$0xf0] }
 0x276   :  { %v999_v45 = vsel %vm993_vm9, 0.007843138, %v8168_v60  ;;  %v1000_v47 = vsel %vm994_vm10, 0.007843138, %v8168_v60 }
 0x277   :  { %v1005_v24 = vadd.f32 %v999_v45, %v8256_v2  ;;  %v1006_v49 = vadd.f32 %v1000_v47, %v8259_v3  ;;  %v6032_v45 = vld [vmem:[#allocation10 + $0x128] sm:$0xf]  ;;  %v7622_v47 = vld [vmem:[#allocation10 + $0x13c] sm:$0xf0] }
 0x279   :  { %v1041_v51 = vmax.f32 %v1005_v24, %v1023_v42  ;;  %v1042_v62 = vmax.f32 %v1006_v49, %v1024_v44  ;;  %v6061_v42 = vor.u32 %v7625_v36, %v6058_v37  ;;  %v6005_v44 = vor.u32 %v7612_v32, %v6002_v29  ;;  %v7619_v24 = vld [vmem:[#allocation10 + $0x12c] sm:$0xf]  ;;  %v5978_v49 = vld [vmem:[#allocation10 + $0xd8] sm:$0xf0]  ;;  %v5880_v32 = vld [vmem:[#allocation10] sm:$0xf] }
 0x27a   :  { %v7585_v29 = vld [vmem:[#allocation10 + $0x14] sm:$0xf0]  ;;  %v7604_v37 = vld [vmem:[#allocation10 + $0xac] sm:$0xf0] }
 0x27b   :  { %v8325_v52 = vmin.f32 %v1041_v51, %v1035_v48  ;;  %v8327_v0 = vmin.f32 %v1042_v62, %v1036_v50  ;;  %v7606_v48 = vld [vmem:[#allocation10 + $0xc4] sm:$0xf]  ;;  %1881 = vmatpush.bf16.msrb.mxu1 %v6061_v42  ;;  %v6033_v50 = vor.u32 %v7622_v47, %v6032_v45  ;;  %1857 = vmatpush.bf16.msra.mxu3 %v6005_v44  ;;  %v5960_v36 = vld [vmem:[#allocation10 + $0x98] sm:$0xf]  ;;  %v5962_v42 = vld [vmem:[#allocation10 + $0xb0] sm:$0xf0] }
 0x27c   :  { %v974_v53 = vpop.f32.mrf.mxu2  ;;  %v987_v55 = vpop.f32.mrf.mxu3  ;;  %v6034_v51 = vld [vmem:[#allocation10 + $0x140] sm:$0xf0]  ;;  %v5881_v30 = vor.u32 %v7585_v29, %v5880_v32  ;;  %v6064_v44 = vld [vmem:[#allocation10 + $0x160] sm:$0xf]  ;;  %v7629_v47 = vld [vmem:[#allocation10 + $0x174] sm:$0xf0] }
 0x27d   :  { %v1065_v56 = vpack.c.bf16 %v8325_v52, %v8325_v52  ;;  %v1066_v57 = vpack.c.bf16 %v8327_v0, %v8327_v0  ;;  %v6037_v62 = vor.u32 %v7619_v24, %v6034_v51  ;;  %v5977_v53 = vor.u32 %v7609_v41, %v5976_v40  ;;  %1869 = vmatpush.bf16.msrb.mxu0 %v6033_v50  ;;  %v7601_v41 = vld [vmem:[#allocation10 + $0x9c] sm:$0xf]  ;;  %v7626_v24 = vld [vmem:[#allocation10 + $0x164] sm:$0xf]  ;;  %v5936_v51 = vld [vmem:[#allocation10 + $0x68] sm:$0xf] }
 0x27e   :  { %v5981_v55 = vor.u32 %v7606_v48, %v5978_v49  ;;  %v5961_v40 = vor.u32 %v7604_v37, %v5960_v36  ;;  %v5965_v45 = vor.u32 %v7601_v41, %v5962_v42  ;;  %v6066_v48 = vld [vmem:[#allocation10 + $0x178] sm:$0xf0]  ;;  %v6065_v49 = vor.u32 %v7629_v47, %v6064_v44  ;;  %v7605_v32 = vld [vmem:[#allocation10 + $0xb4] sm:$0xf0]  ;;  %v7602_v29 = vld [vmem:[#allocation10 + $0xa4] sm:$0xf] }
 0x27f   :  { %1511 = vmatmul.bf16.vlgmr.msra.gmra.mxu0 %v1065_v56  ;;  %1524 = vmatmul.bf16.vlgmr.msra.gmra.mxu1 %v1066_v57  ;;  %v5952_v56 = vld [vmem:[#allocation10 + $0x90] sm:$0xf]  ;;  %v7603_v57 = vld [vmem:[#allocation10 + $0xa4] sm:$0xf0]  ;;  %v6069_v50 = vor.u32 %v7626_v24, %v6066_v48  ;;  %v5920_v44 = vld [vmem:[#allocation10 + $0x40] sm:$0xf] }
 0x280   :  { %1882 = vmatpush.bf16.msrb.mxu1 %v6037_v62  ;;  %1858 = vmatpush.bf16.msra.mxu3 %v5981_v55  ;;  %v7598_v62 = vld [vmem:[#allocation10 + $0x7c] sm:$0xf0]  ;;  %v5944_v36 = vld [vmem:[#allocation10 + $0x70] sm:$0xf]  ;;  %v7599_v37 = vld [vmem:[#allocation10 + $0x84] sm:$0xf0] }
 0x281   :  { %v5937_v55 = vor.u32 %v7598_v62, %v5936_v51  ;;  %v5945_v41 = vor.u32 %v7599_v37, %v5944_v36  ;;  %v7590_v47 = vld [vmem:[#allocation10 + $0x44] sm:$0xf]  ;;  %v5922_v24 = vld [vmem:[#allocation10 + $0x58] sm:$0xf0]  ;;  %v5896_v51 = vld [vmem:[#allocation10 + $0x10] sm:$0xf] }
 0x282   :  { %v7587_v62 = vld [vmem:[#allocation10 + $0x24] sm:$0xf0]  ;;  %v7648_v36 = vld [vmem:[#allocation9 + $0x90] sm:$0xff] }
 0x283   :  { %v7656_v37 = vld [vmem:[#allocation9 + $0xd0] sm:$0xff] }
 0x2ec   :  { %v1460_v2 = vpop.f32.mrf.mxu0  ;;  %v1473_v58 = vpop.f32.mrf.mxu1 }
 0x2ed   :  { %v1486_v3 = vpop.f32.mrf.mxu2  ;;  %v1499_v59 = vpop.f32.mrf.mxu3  ;;  %v1461_v61 = vadd.f32 %v8268_v14, %v1460_v2  ;;  %v6049_v14 = vor.u32 %v7627_v43, %v6048_v12  ;;  %v7600_v2 = vld [vmem:[#allocation10 + $0x94] sm:$0xf] }
 0x2ee   :  { %v6010_v43 = vld [vmem:[#allocation10 + $0x110] sm:$0xf0] }
 0x2ef   :  { %v1474_v63 = vadd.f32 %v1473_v58, %v1461_v61  ;;  %1842 = vmatpush.bf16.msra.mxu2 %v6049_v14  ;;  %v5954_v58 = vld [vmem:[#allocation10 + $0xa8] sm:$0xf0]  ;;  %v5928_v61 = vld [vmem:[#allocation10 + $0x60] sm:$0xf]  ;;  %v5904_v14 = vld [vmem:[#allocation10 + $0x30] sm:$0xf] }
 0x2f1   :  { %v1487_v33 = vadd.f32 %v1486_v3, %v1474_v63  ;;  %v5953_v3 = vor.u32 %v7603_v57, %v5952_v56  ;;  %v7597_v63 = vld [vmem:[#allocation10 + $0x74] sm:$0xf0]  ;;  %v5938_v56 = vld [vmem:[#allocation10 + $0x80] sm:$0xf0]  ;;  %v6040_v57 = vld [vmem:[#allocation10 + $0x130] sm:$0xf] }
 0x2f3   :  { %v1500_v5 = vadd.f32 %v1499_v59, %v1487_v33  ;;  %1843 = vmatpush.bf16.msra.mxu2 %v6025_v20  ;;  %v5957_v59 = vor.u32 %v7600_v2, %v5954_v58  ;;  %v5985_v20 = vor.u32 %v7610_v18, %v5984_v17  ;;  %v7623_v2 = vld [vmem:[#allocation10 + $0x144] sm:$0xf0] }
 0x2f4   :  { %v1462_v1 = vpop.f32.mrf.mxu0  ;;  %v1475_v4 = vpop.f32.mrf.mxu1  ;;  %v7611_v17 = vld [vmem:[#allocation10 + $0xe4] sm:$0xf0] }
 0x2f5   :  { %v1488_v35 = vpop.f32.mrf.mxu2  ;;  %v1501_v38 = vpop.f32.mrf.mxu3  ;;  %v7594_v1 = vld [vmem:[#allocation10 + $0x64] sm:$0xf]  ;;  %v5930_v4 = vld [vmem:[#allocation10 + $0x78] sm:$0xf0]  ;;  %1859 = vmatpush.bf16.msra.mxu3 %v5957_v59  ;;  %v7620_v59 = vld [vmem:[#allocation10 + $0x134] sm:$0xf] }
 0x2f6   :  { %v5929_v35 = vor.u32 %v7597_v63, %v5928_v61  ;;  %v5933_v33 = vor.u32 %v7594_v1, %v5930_v4  ;;  %v6042_v61 = vld [vmem:[#allocation10 + $0x148] sm:$0xf0]  ;;  %v5912_v1 = vld [vmem:[#allocation10 + $0x38] sm:$0xf]  ;;  %v7592_v4 = vld [vmem:[#allocation10 + $0x4c] sm:$0xf0] }
 0x2f7   :  { %1844 = vmatpush.bf16.msra.mxu2 %v6001_v39  ;;  %v5885_v39 = vor.u32 %v7582_v34, %v5882_v31  ;;  %v6045_v63 = vor.u32 %v7620_v59, %v6042_v61  ;;  %v7645_v59 = vld [vmem:[#allocation9 + $0x78] sm:$0xff] }
 0x2f9   :  { %1860 = vmatpush.bf16.msra.mxu3 %v5933_v33  ;;  %v5914_v33 = vld [vmem:[#allocation10 + $0x50] sm:$0xf0] }
 0x2fb   :  { %1845 = vmatpush.bf16.msra.mxu2 %v5977_v53  ;;  %v7595_v53 = vld [vmem:[#allocation10 + $0x6c] sm:$0xf] }
 0x2fc   :  { %v1512_v6 = vpop.f32.mrf.mxu0  ;;  %v1525_v7 = vpop.f32.mrf.mxu1  ;;  %v5941_v58 = vor.u32 %v7595_v53, %v5938_v56  ;;  %v7584_v53 = vld [vmem:[#allocation10 + $0x14] sm:$0xf]  ;;  %v5897_v56 = vor.u32 %v7587_v62, %v5896_v51  ;;  %v7675_v51 = vld [vmem:[#allocation9 + $0x168] sm:$0xff]  ;;  %v7666_v62 = vld [vmem:[#allocation9 + $0x120] sm:$0xff] }
 0x2fd   :  { %v1513_v8 = vadd.f32 %v1512_v6, %v1500_v5  ;;  %1861 = vmatpush.bf16.msra.mxu3 %v5909_v19  ;;  %v5993_v19 = vor.u32 %v7611_v17, %v5992_v28  ;;  %v7633_v28 = vld [vmem:[#allocation9 + $0x18] sm:$0xff] }
 0x2fe   :  { %v7641_v17 = vld [vmem:[#allocation9 + $0x58] sm:$0xff] }
 0x2ff   :  { %v8334_v9 = vadd.f32 %v1525_v7, %v1513_v8  ;;  %1846 = vmatpush.bf16.msra.mxu2 %v5953_v3  ;;  %v6008_v8 = vld [vmem:[#allocation10 + $0xf8] sm:$0xf]  ;;  %v6041_v3 = vor.u32 %v7623_v2, %v6040_v57 }
 0x301   :  { %1529 = vmax.xlane.f32.xlu1 %v8334_v9  ;;  %1862 = vmatpush.bf16.msra.mxu3 %v5885_v39  ;;  %v7596_v39 = vld [vmem:[#allocation10 + $0x74] sm:$0xf] }
 0x303   :  { %1847 = vmatpush.bf16.msra.mxu2 %v5929_v35  ;;  %v7589_v35 = vld [vmem:[#allocation10 + $0x3c] sm:$0xf] }
 0x304   :  { %v1514_v10 = vpop.f32.mrf.mxu0  ;;  %v1527_v11 = vpop.f32.mrf.mxu1 }
 0x305   :  { %v7616_v10 = vld [vmem:[#allocation10 + $0x10c] sm:$0xf0]  ;;  %v7613_v11 = vld [vmem:[#allocation10 + $0xfc] sm:$0xf]  ;;  %1907 = vmatpush.bf16.msrb.mxu3 %v6069_v50  ;;  %v5925_v50 = vor.u32 %v7590_v47, %v5922_v24 }
 0x306   :  { %v6009_v12 = vor.u32 %v7616_v10, %v6008_v8  ;;  %v6013_v46 = vor.u32 %v7613_v11, %v6010_v43  ;;  %v5917_v8 = vor.u32 %v7589_v35, %v5914_v33  ;;  %v7614_v11 = vld [vmem:[#allocation10 + $0x104] sm:$0xf]  ;;  %v7668_v47 = vld [vmem:[#allocation9 + $0x130] sm:$0xff] }
 0x307   :  { %v7676_v24 = vld [vmem:[#allocation9 + $0x170] sm:$0xff] }
 0x308   :  { %1870 = vmatpush.bf16.msrb.mxu0 %v6009_v12  ;;  %1883 = vmatpush.bf16.msrb.mxu1 %v6013_v46  ;;  %v6018_v12 = vld [vmem:[#allocation10 + $0x118] sm:$0xf0]  ;;  %v5888_v46 = vld [vmem:[#allocation10 + $0x8] sm:$0xf] }
 0x309   :  { %1908 = vmatpush.bf16.msrb.mxu3 %v6045_v63  ;;  %v6021_v43 = vor.u32 %v7614_v11, %v6018_v12  ;;  %v7636_v63 = vld [vmem:[#allocation9 + $0x30] sm:$0xff] }
 0x30c   :  { %1871 = vmatpush.bf16.msrb.mxu0 %v5985_v20  ;;  %1884 = vmatpush.bf16.msrb.mxu1 %v5989_v23  ;;  %v7608_v20 = vld [vmem:[#allocation10 + $0xd4] sm:$0xf]  ;;  %v5968_v23 = vld [vmem:[#allocation10 + $0xa0] sm:$0xf] }
 0x30d   :  { %1909 = vmatpush.bf16.msrb.mxu3 %v6021_v43  ;;  %v5997_v22 = vor.u32 %v7608_v20, %v5994_v21  ;;  %v5969_v34 = vor.u32 %v7605_v32, %v5968_v23  ;;  %v7634_v43 = vld [vmem:[#allocation9 + $0x20] sm:$0xff]  ;;  %v7640_v20 = vld [vmem:[#allocation9 + $0x50] sm:$0xff]  ;;  %v7651_v21 = vld [vmem:[#allocation9 + $0xa8] sm:$0xff] }
 0x30e   :  { %v7631_v23 = vld [vmem:[#allocation9 + $0x8] sm:$0xff] }
 0x30f   :  { %v7639_v32 = vld [vmem:[#allocation9 + $0x48] sm:$0xff] }
 0x310   :  { %1872 = vmatpush.bf16.msrb.mxu0 %v5961_v40  ;;  %1885 = vmatpush.bf16.msrb.mxu1 %v5965_v45  ;;  %v5946_v40 = vld [vmem:[#allocation10 + $0x88] sm:$0xf0]  ;;  %v7593_v45 = vld [vmem:[#allocation10 + $0x54] sm:$0xf0] }
 0x311   :  { %1910 = vmatpush.bf16.msrb.mxu3 %v5997_v22  ;;  %v5949_v42 = vor.u32 %v7596_v39, %v5946_v40  ;;  %v7659_v22 = vld [vmem:[#allocation9 + $0xe8] sm:$0xff]  ;;  %v7630_v39 = vld [vmem:[#allocation9] sm:$0xff] }
 0x312   :  { %v7638_v40 = vld [vmem:[#allocation9 + $0x40] sm:$0xff] }
 0x314   :  { %1873 = vmatpush.bf16.msrb.mxu0 %v5937_v55  ;;  %1886 = vmatpush.bf16.msrb.mxu1 %v5941_v58  ;;  %v5898_v55 = vld [vmem:[#allocation10 + $0x28] sm:$0xf0] }
 0x315   :  { %v5901_v57 = vor.u32 %v7584_v53, %v5898_v55  ;;  %v7674_v53 = vld [vmem:[#allocation9 + $0x160] sm:$0xff]  ;;  %v7665_v55 = vld [vmem:[#allocation9 + $0x118] sm:$0xff] }
 0x318   :  { %1887 = vmatpush.bf16.msrb.mxu1 %v5917_v8 }
 0x374   :  { %v1530_v38 = vpop.xlane.xlu1 %1529 }
 0x375   :  { %v1531_v5 = vsub.f32 %v8334_v9, %v1530_v38  ;;  %v5905_v9 = vor.u32 %v7591_v26, %v5904_v14  ;;  %v5913_v38 = vor.u32 %v7592_v4, %v5912_v1  ;;  %v7586_v14 = vld [vmem:[#allocation10 + $0x1c] sm:$0xf0]  ;;  %v7583_v26 = vld [vmem:[#allocation10 + $0xc] sm:$0xf]  ;;  %v7644_v1 = vld [vmem:[#allocation9 + $0x70] sm:$0xff] }
 0x376   :  { %v5889_v16 = vor.u32 %v7586_v14, %v5888_v46  ;;  %v7642_v46 = vld [vmem:[#allocation9 + $0x60] sm:$0xff] }
 0x377   :  { %v1532_v6 = vmul.f32 1.442695, %v1531_v5  ;;  %1848 = vmatpush.bf16.msra.mxu2 %v5905_v9  ;;  %v6016_v5 = vld [vmem:[#allocation10 + $0x100] sm:$0xf]  ;;  %1874 = vmatpush.bf16.msrb.mxu0 %v5913_v38  ;;  %v5890_v9 = vld [vmem:[#allocation10 + $0x20] sm:$0xf0] }
 0x378   :  { %v5893_v18 = vor.u32 %v7583_v26, %v5890_v9  ;;  %v7661_v9 = vld [vmem:[#allocation9 + $0xf8] sm:$0xff] }
 0x379   :  { %7986 = vpow2.f32 %v1532_v6  ;;  %v7617_v6 = vld [vmem:[#allocation10 + $0x114] sm:$0xf0] }
 0x37a   :  { %v6017_v10 = vor.u32 %v7617_v6, %v6016_v5  ;;  %1888 = vmatpush.bf16.msrb.mxu1 %v5893_v18  ;;  %v7635_v5 = vld [vmem:[#allocation9 + $0x28] sm:$0xff]  ;;  %v7660_v18 = vld [vmem:[#allocation9 + $0xf0] sm:$0xff] }
 0x37b   :  { %1849 = vmatpush.bf16.msra.mxu2 %v5881_v30  ;;  %1875 = vmatpush.bf16.msrb.mxu0 %v5889_v16  ;;  %v5970_v30 = vld [vmem:[#allocation10 + $0xb8] sm:$0xf0]  ;;  %v7643_v6 = vld [vmem:[#allocation9 + $0x68] sm:$0xff] }
 0x37c   :  { %v5973_v31 = vor.u32 %v7602_v29, %v5970_v30  ;;  %v7653_v16 = vld [vmem:[#allocation9 + $0xb8] sm:$0xff]  ;;  %v7650_v29 = vld [vmem:[#allocation9 + $0xa0] sm:$0xff] }
 0x37d   :  { %v7649_v30 = vld [vmem:[#allocation9 + $0x98] sm:$0xff] }
 0x37e   :  { %1911 = vmatpush.bf16.msrb.mxu3 %v5973_v31  ;;  %2395 = vmatpush.bf16.msra.mxu1 %v7645_v59  ;;  %v7657_v31 = vld [vmem:[#allocation9 + $0xd8] sm:$0xff]  ;;  %v1940_v59 = vld [vmem:[#allocation4 + $0x10] sm:$0xff] }
 0x37f   :  { %v8338_v7 = vpop.eup %7986  ;;  %1894 = vmatpush.bf16.msrb.mxu2 %v6065_v49  ;;  %v5921_v49 = vor.u32 %v7593_v45, %v5920_v44  ;;  %v7647_v44 = vld [vmem:[#allocation9 + $0x88] sm:$0xff] }
 0x380   :  { %1534 = vadd.xlane.f32.xlu2 %v8338_v7  ;;  %v7655_v45 = vld [vmem:[#allocation9 + $0xc8] sm:$0xff] }
 0x382   :  { %1912 = vmatpush.bf16.msrb.mxu3 %v5949_v42  ;;  %2396 = vmatpush.bf16.msra.mxu1 %v7644_v1  ;;  %v7677_v42 = vld [vmem:[#allocation9 + $0x178] sm:$0xff]  ;;  %v7662_v1 = vld [vmem:[#allocation9 + $0x100] sm:$0xff] }
 0x383   :  { %1895 = vmatpush.bf16.msrb.mxu2 %v6041_v3  ;;  %v7637_v3 = vld [vmem:[#allocation9 + $0x38] sm:$0xff] }
 0x384   :  { %2382 = vmatpush.bf16.msra.mxu0 %v7637_v3  ;;  %v7671_v3 = vld [vmem:[#allocation9 + $0x148] sm:$0xff] }
 0x386   :  { %1913 = vmatpush.bf16.msrb.mxu3 %v5925_v50  ;;  %2397 = vmatpush.bf16.msra.mxu1 %v7643_v6  ;;  %v7667_v50 = vld [vmem:[#allocation9 + $0x128] sm:$0xff] }
 0x387   :  { %1896 = vmatpush.bf16.msrb.mxu2 %v6017_v10  ;;  %v1939_v6 = vld [vmem:[#allocation4 + $0x8] sm:$0xff] }
 0x388   :  { %2383 = vmatpush.bf16.msra.mxu0 %v7636_v63  ;;  %v6072_v63 = vadd.f32 -0.03137255, %v1940_v59 }
 0x38a   :  { %1914 = vmatpush.bf16.msrb.mxu3 %v5901_v57  ;;  %2398 = vmatpush.bf16.msra.mxu1 %v7642_v46  ;;  %v7664_v57 = vld [vmem:[#allocation9 + $0x110] sm:$0xff] }
 0x38b   :  { %1897 = vmatpush.bf16.msrb.mxu2 %v5993_v19  ;;  %v7632_v19 = vld [vmem:[#allocation9 + $0x10] sm:$0xff] }
 0x38c   :  { %2384 = vmatpush.bf16.msra.mxu0 %v7635_v5 }
 0x38e   :  { %2399 = vmatpush.bf16.msra.mxu1 %v7641_v17 }
 0x38f   :  { %1898 = vmatpush.bf16.msrb.mxu2 %v5969_v34  ;;  %v7658_v34 = vld [vmem:[#allocation9 + $0xe0] sm:$0xff] }
 0x390   :  { %2385 = vmatpush.bf16.msra.mxu0 %v7634_v43 }
 0x392   :  { %2400 = vmatpush.bf16.msra.mxu1 %v7640_v20 }
 0x393   :  { %1899 = vmatpush.bf16.msrb.mxu2 %v5945_v41  ;;  %v7669_v41 = vld [vmem:[#allocation9 + $0x138] sm:$0xff] }
 0x394   :  { %2386 = vmatpush.bf16.msra.mxu0 %v7633_v28 }
 0x396   :  { %2401 = vmatpush.bf16.msra.mxu1 %v7639_v32 }
 0x397   :  { %1900 = vmatpush.bf16.msrb.mxu2 %v5921_v49  ;;  %v7654_v49 = vld [vmem:[#allocation9 + $0xc0] sm:$0xff] }
 0x398   :  { %2387 = vmatpush.bf16.msra.mxu0 %v7632_v19 }
 0x39a   :  { %2402 = vmatpush.bf16.msra.mxu1 %v7638_v40 }
 0x39b   :  { %1901 = vmatpush.bf16.msrb.mxu2 %v5897_v56  ;;  %v7673_v56 = vld [vmem:[#allocation9 + $0x158] sm:$0xff] }
 0x39c   :  { %2388 = vmatpush.bf16.msra.mxu0 %v7631_v23 }
 0x3a0   :  { %2389 = vmatpush.bf16.msra.mxu0 %v7630_v39 }
 0x3f3   :  { %v1535_v48 = vpop.xlane.xlu2 %1534 }
 0x3f4   :  { %7988 = vrcp.f32 %v1535_v48  ;;  %v1547_v4 = vand.u32 2147483648, %v1535_v48  ;;  %v1545_v38 = vand.u32 2147483647, %v1535_v48  ;;  %vm1541_vm12 = vweird.f32 %v1535_v48 }
 0x3f6   :  { %v1548_v8 = vor.u32 1.1754944e-38, %v1547_v4  ;;  %vm1546_vm14 = vcmp.eq.f32.partialorder %v1545_v38, 8.507059e+37  ;;  %v7670_v4 = vld [vmem:[#allocation9 + $0x140] sm:$0xff] }
 0x3f7   :  { %v1938_v38 = vld [vmem:[#allocation4] sm:$0xff] }
 0x3f8   :  { %v6070_v43 = vadd.f32 -0.03137255, %v1938_v38 }
 0x3fa   :  { %v7989_v2 = vpop.eup %7988  ;;  %v1950_v23 = vmax.f32 %v6070_v43, 0.0 }
 0x3fb   :  { %v1537_v58 = vmul.f32 %v7989_v2, %v1535_v48  ;;  %vm1542_vm11 = vweird.f32 %v7989_v2  ;;  %v7646_v48 = vld [vmem:[#allocation9 + $0x80] sm:$0xff] }
 0x3fc   :  { %vm1543_vm13 = vmor %vm1541_vm12, %vm1542_vm11 }
 0x3fd   :  { %v1538_v61 = vsub.f32 1.0, %v1537_v58  ;;  %v7663_v58 = vld [vmem:[#allocation9 + $0x108] sm:$0xff] }
 0x3ff   :  { %v1539_v35 = vmul.f32 %v7989_v2, %v1538_v61  ;;  %v1941_v61 = vld [vmem:[#allocation4 + $0x18] sm:$0xff] }
 0x400   :  { %v1959_v5 = vadd.f32 0.03137255, %v1941_v61 }
 0x401   :  { %v1540_v33 = vadd.f32 %v7989_v2, %v1539_v35  ;;  %v6073_v35 = vadd.f32 -0.03137255, %v1941_v61 }
 0x402   :  { %v1965_v17 = vmin.f32 %v1959_v5, 1.0 }
 0x403   :  { %v1544_v10 = vsel %vm1543_vm13, %v7989_v2, %v1540_v33  ;;  %v7672_v2 = vld [vmem:[#allocation9 + $0x150] sm:$0xff]  ;;  %v1958_v33 = vadd.f32 0.03137255, %v1940_v59 }
 0x404   :  { %v1549_v11 = vsel %vm1546_vm14, %v1548_v8, %v1544_v10  ;;  %v1952_v10 = vmax.f32 %v6072_v63, 0.0 }
 0x405   :  { %v1550_v12 = vmul.f32 %v8338_v7, %v1549_v11  ;;  %v7652_v7 = vld [vmem:[#allocation9 + $0xb0] sm:$0xff] }
 0x407   :  { %v1552_v14 = vsub.f32 %v1550_v12, %v8281_v54  ;;  %v1953_v12 = vmax.f32 %v6073_v35, 0.0 }
 0x409   :  { %v1553_v26 = vpack.c.bf16 %v1552_v14, %v1552_v14 }
 0x40b   :  { %1850 = vmatmul.bf16.vlgmr.msra.gmra.mxu2 %v1553_v26  ;;  %1863 = vmatmul.bf16.vlgmr.msra.gmra.mxu3 %v1553_v26 }
 0x40c   :  { %1876 = vmatmul.bf16.vlgmr.msrb.gmra.mxu0 %v1553_v26  ;;  %1889 = vmatmul.bf16.vlgmr.msrb.gmra.mxu1 %v1553_v26 }
 0x40d   :  { %2408 = vmatpush.bf16.msra.mxu2 %v7653_v16  ;;  %2421 = vmatpush.bf16.msra.mxu3 %v7661_v9  ;;  %v1964_v9 = vmin.f32 %v1958_v33, 1.0 }
 0x40e   :  { %2434 = vmatpush.bf16.msrb.mxu0 %v7669_v41  ;;  %2447 = vmatpush.bf16.msrb.mxu1 %v7677_v42 }
 0x411   :  { %2409 = vmatpush.bf16.msra.mxu2 %v7652_v7  ;;  %2422 = vmatpush.bf16.msra.mxu3 %v7660_v18  ;;  %v1956_v7 = vadd.f32 0.03137255, %v1938_v38  ;;  %v1957_v18 = vadd.f32 0.03137255, %v1939_v6 }
 0x412   :  { %2435 = vmatpush.bf16.msrb.mxu0 %v7668_v47  ;;  %2448 = vmatpush.bf16.msrb.mxu1 %v7676_v24 }
 0x415   :  { %2410 = vmatpush.bf16.msra.mxu2 %v7651_v21  ;;  %2423 = vmatpush.bf16.msra.mxu3 %v7659_v22 }
 0x416   :  { %2436 = vmatpush.bf16.msrb.mxu0 %v7667_v50  ;;  %2449 = vmatpush.bf16.msrb.mxu1 %v7675_v51  ;;  %v1942_v50 = vld [vmem:[#allocation4 + $0x20] sm:$0xff]  ;;  %v1943_v51 = vld [vmem:[#allocation4 + $0x28] sm:$0xff] }
 0x419   :  { %2411 = vmatpush.bf16.msra.mxu2 %v7650_v29  ;;  %2424 = vmatpush.bf16.msra.mxu3 %v7658_v34 }
 0x41a   :  { %2437 = vmatpush.bf16.msrb.mxu0 %v7666_v62  ;;  %2450 = vmatpush.bf16.msrb.mxu1 %v7674_v53  ;;  %v6074_v62 = vadd.f32 -0.03137255, %v1942_v50  ;;  %v6075_v53 = vadd.f32 -0.03137255, %v1943_v51 }
 0x41b   :  { %1902 = vmatmul.bf16.vlgmr.msrb.gmra.mxu2 %v1553_v26  ;;  %1915 = vmatmul.bf16.vlgmr.msrb.gmra.mxu3 %v1553_v26  ;;  %v6071_v26 = vadd.f32 -0.03137255, %v1939_v6 }
 0x41d   :  { %2412 = vmatpush.bf16.msra.mxu2 %v7649_v30  ;;  %2425 = vmatpush.bf16.msra.mxu3 %v7657_v31  ;;  %v1951_v32 = vmax.f32 %v6071_v26, 0.0  ;;  %v1962_v31 = vmin.f32 %v1956_v7, 1.0 }
 0x41e   :  { %2438 = vmatpush.bf16.msrb.mxu0 %v7665_v55  ;;  %2451 = vmatpush.bf16.msrb.mxu1 %v7673_v56  ;;  %v1960_v55 = vadd.f32 0.03137255, %v1942_v50  ;;  %v1961_v56 = vadd.f32 0.03137255, %v1943_v51  ;;  %v6392_v50 = vld [vmem:[#allocation10 + $0x108] sm:$0xf0] }
 0x41f   :  { %v6446_v51 = vld [vmem:[#allocation10 + $0x158] sm:$0xf] }
 0x420   :  { %v1967_v35 = vmin.f32 %v1961_v56, 1.0  ;;  %v6448_v56 = vld [vmem:[#allocation10 + $0x170] sm:$0xf0] }
 0x421   :  { %2413 = vmatpush.bf16.msra.mxu2 %v7648_v36  ;;  %2426 = vmatpush.bf16.msra.mxu3 %v7656_v37  ;;  %v1963_v37 = vmin.f32 %v1957_v18, 1.0 }
 0x422   :  { %2439 = vmatpush.bf16.msrb.mxu0 %v7664_v57  ;;  %2452 = vmatpush.bf16.msrb.mxu1 %v7672_v2 }
 0x425   :  { %2414 = vmatpush.bf16.msra.mxu2 %v7647_v44  ;;  %2427 = vmatpush.bf16.msra.mxu3 %v7655_v45 }
 0x426   :  { %2440 = vmatpush.bf16.msrb.mxu0 %v7663_v58  ;;  %2453 = vmatpush.bf16.msrb.mxu1 %v7671_v3  ;;  %v1954_v58 = vmax.f32 %v6074_v62, 0.0  ;;  %v1955_v3 = vmax.f32 %v6075_v53, 0.0  ;;  %v7724_v62 = vld [vmem:[#allocation10 + $0x16c] sm:$0xf0] }
 0x427   :  { %v6447_v53 = vor.u32 %v7724_v62, %v6446_v51  ;;  %v7681_v51 = vld [vmem:[#allocation10 + $0x14] sm:$0xf0]  ;;  %v7678_v62 = vld [vmem:[#allocation10 + $0x4] sm:$0xf] }
 0x429   :  { %2415 = vmatpush.bf16.msra.mxu2 %v7646_v48  ;;  %2428 = vmatpush.bf16.msra.mxu3 %v7654_v49 }
 0x42a   :  { %2441 = vmatpush.bf16.msrb.mxu0 %v7662_v1  ;;  %2454 = vmatpush.bf16.msrb.mxu1 %v7670_v4  ;;  %v1966_v1 = vmin.f32 %v1960_v55, 1.0  ;;  %v7721_v55 = vld [vmem:[#allocation10 + $0x15c] sm:$0xf] }
 0x489   :  { %v1877_v8 = vpop.f32.mrf.mxu0  ;;  %v1890_v11 = vpop.f32.mrf.mxu1 }
 0x48a   :  { %vm1922_vm15 = vcmp.ge.f32.partialorder %v1877_v8, 0.0  ;;  %vm1923_vm0 = vcmp.ge.f32.partialorder %v1890_v11, 0.0 }
 0x48b   :  { %v1928_v46 = vsel %vm1922_vm15, 0.007843138, %v8168_v60  ;;  %v1929_v14 = vsel %vm1923_vm0, 0.007843138, %v8168_v60 }
 0x48c   :  { %v1934_v16 = vadd.f32 %v1928_v46, %v8297_v13  ;;  %v1935_v28 = vadd.f32 %v1929_v14, %v8299_v15  ;;  %v8382_v14 = vld [vmem:[%s8515_s5] ss:$0 sm:$0xff] }
 0x48e   :  { %v1970_v19 = vmax.f32 %v1934_v16, %v1952_v10  ;;  %v1971_v20 = vmax.f32 %v1935_v28, %v1953_v12  ;;  %v1851_v21 = vpop.f32.mrf.mxu2  ;;  %v1864_v22 = vpop.f32.mrf.mxu3 }
 0x48f   :  { %vm1920_vm1 = vcmp.ge.f32.partialorder %v1851_v21, 0.0  ;;  %vm1921_vm2 = vcmp.ge.f32.partialorder %v1864_v22, 0.0 }
 0x490   :  { %v8347_v29 = vmin.f32 %v1970_v19, %v1964_v9  ;;  %v8349_v34 = vmin.f32 %v1971_v20, %v1965_v17  ;;  %v1926_v13 = vsel %vm1920_vm1, 0.007843138, %v8168_v60  ;;  %v1927_v30 = vsel %vm1921_vm2, 0.007843138, %v8168_v60 }
 0x491   :  { %v1932_v15 = vadd.f32 %v1926_v13, %v8309_v25  ;;  %v1933_v36 = vadd.f32 %v1927_v30, %v8311_v27  ;;  %v1879_v39 = vpop.f32.mrf.mxu0  ;;  %v1892_v40 = vpop.f32.mrf.mxu1  ;;  %v6438_v30 = vld [vmem:[#allocation10 + $0x150] sm:$0xf] }
 0x492   :  { %v1994_v41 = vpack.c.bf16 %v8347_v29, %v8347_v29  ;;  %v1995_v42 = vpack.c.bf16 %v8349_v34, %v8349_v34  ;;  %v6414_v39 = vld [vmem:[#allocation10 + $0x120] sm:$0xf]  ;;  %v7717_v40 = vld [vmem:[#allocation10 + $0x134] sm:$0xf0] }
 0x493   :  { %v1968_v44 = vmax.f32 %v1932_v15, %v1950_v23  ;;  %v1969_v45 = vmax.f32 %v1933_v36, %v1951_v32  ;;  %v7723_v15 = vld [vmem:[#allocation10 + $0x164] sm:$0xf0] }
 0x494   :  { %2416 = vmatmul.bf16.vlgmr.msra.gmra.mxu2 %v1994_v41  ;;  %2429 = vmatmul.bf16.vlgmr.msra.gmra.mxu3 %v1995_v42  ;;  %v6439_v36 = vor.u32 %v7723_v15, %v6438_v30  ;;  %v7714_v42 = vld [vmem:[#allocation10 + $0x124] sm:$0xf]  ;;  %v7709_v30 = vld [vmem:[#allocation10 + $0xfc] sm:$0xf] }
 0x495   :  { %v8359_v47 = vmin.f32 %v1968_v44, %v1962_v31  ;;  %v8361_v24 = vmin.f32 %v1969_v45, %v1963_v37  ;;  %v7720_v31 = vld [vmem:[#allocation10 + $0x154] sm:$0xf]  ;;  %v6440_v37 = vld [vmem:[#allocation10 + $0x168] sm:$0xf0]  ;;  %v6416_v44 = vld [vmem:[#allocation10 + $0x138] sm:$0xf0]  ;;  %v6415_v45 = vor.u32 %v7717_v40, %v6414_v39 }
 0x496   :  { %v1853_v25 = vpop.f32.mrf.mxu2  ;;  %v1866_v48 = vpop.f32.mrf.mxu3  ;;  %v6443_v41 = vor.u32 %v7720_v31, %v6440_v37  ;;  %2773 = vmatpush.bf16.msrb.mxu2 %v6439_v36  ;;  %v6400_v31 = vld [vmem:[#allocation10 + $0x110] sm:$0xf0]  ;;  %v6294_v37 = vld [vmem:[#allocation10 + $0x30] sm:$0xf]  ;;  %v7687_v39 = vld [vmem:[#allocation10 + $0x44] sm:$0xf0] }
 0x497   :  { %v1992_v27 = vpack.c.bf16 %v8359_v47, %v8359_v47  ;;  %v1993_v49 = vpack.c.bf16 %v8361_v24, %v8361_v24  ;;  %v6419_v25 = vor.u32 %v7714_v42, %v6416_v44  ;;  %v6390_v48 = vld [vmem:[#allocation10 + $0xf0] sm:$0xf]  ;;  %v6403_v36 = vor.u32 %v7709_v30, %v6400_v31  ;;  %v7684_v40 = vld [vmem:[#allocation10 + $0x34] sm:$0xf]  ;;  %v6374_v42 = vld [vmem:[#allocation10 + $0xc8] sm:$0xf] }
 0x498   :  { %2786 = vmatpush.bf16.msrb.mxu3 %v6443_v41  ;;  %v6296_v41 = vld [vmem:[#allocation10 + $0x48] sm:$0xf0]  ;;  %v7706_v44 = vld [vmem:[#allocation10 + $0xdc] sm:$0xf0]  ;;  %v6408_v31 = vld [vmem:[#allocation10 + $0x118] sm:$0xf0] }
 0x499   :  { %2390 = vmatmul.bf16.vlgmr.msra.gmra.mxu0 %v1992_v27  ;;  %2403 = vmatmul.bf16.vlgmr.msra.gmra.mxu1 %v1993_v49  ;;  %v7711_v27 = vld [vmem:[#allocation10 + $0x104] sm:$0xf0]  ;;  %v7708_v49 = vld [vmem:[#allocation10 + $0xf4] sm:$0xf] }
 0x49a   :  { %2774 = vmatpush.bf16.msrb.mxu2 %v6415_v45  ;;  %2799 = vmatpush.bf16.msra.mxu0 %v6447_v53  ;;  %v6299_v45 = vor.u32 %v7684_v40, %v6296_v41  ;;  %v7679_v40 = vld [vmem:[#allocation10 + $0xc] sm:$0xf]  ;;  %v6280_v41 = vld [vmem:[#allocation10 + $0x20] sm:$0xf0] }
 0x49c   :  { %2787 = vmatpush.bf16.msrb.mxu3 %v6419_v25  ;;  %v6375_v25 = vor.u32 %v7706_v44, %v6374_v42  ;;  %v6382_v42 = vld [vmem:[#allocation10 + $0xd0] sm:$0xf]  ;;  %v7707_v44 = vld [vmem:[#allocation10 + $0xe4] sm:$0xf0] }
 0x49e   :  { %v1903_v57 = vpop.f32.mrf.mxu2  ;;  %v1916_v2 = vpop.f32.mrf.mxu3 }
 0x49f   :  { %vm1924_vm3 = vcmp.ge.f32.partialorder %v1903_v57, 0.0  ;;  %vm1925_vm4 = vcmp.ge.f32.partialorder %v1916_v2, 0.0  ;;  %v6391_v57 = vor.u32 %v7711_v27, %v6390_v48  ;;  %v6366_v2 = vld [vmem:[#allocation10 + $0xc0] sm:$0xf]  ;;  %v7703_v48 = vld [vmem:[#allocation10 + $0xcc] sm:$0xf] }
 0x4a0   :  { %v1930_v59 = vsel %vm1924_vm3, 0.007843138, %v8168_v60  ;;  %v1931_v61 = vsel %vm1925_vm4, 0.007843138, %v8168_v60  ;;  %v6376_v27 = vld [vmem:[#allocation10 + $0xe0] sm:$0xf0] }
 0x4a1   :  { %v1936_v63 = vadd.f32 %v1930_v59, %v8325_v52  ;;  %v1937_v4 = vadd.f32 %v1931_v61, %v8327_v0  ;;  %v6395_v59 = vor.u32 %v7708_v49, %v6392_v50  ;;  %v6422_v61 = vld [vmem:[#allocation10 + $0x128] sm:$0xf]  ;;  %2775 = vmatpush.bf16.msrb.mxu2 %v6391_v57  ;;  %v6379_v49 = vor.u32 %v7703_v48, %v6376_v27  ;;  %v6270_v50 = vld [vmem:[#allocation10] sm:$0xf]  ;;  %v7700_v57 = vld [vmem:[#allocation10 + $0xac] sm:$0xf0] }
 0x4a2   :  { %v6271_v53 = vor.u32 %v7681_v51, %v6270_v50  ;;  %v7704_v48 = vld [vmem:[#allocation10 + $0xd4] sm:$0xf]  ;;  %v6384_v27 = vld [vmem:[#allocation10 + $0xe8] sm:$0xf0]  ;;  %v6358_v50 = vld [vmem:[#allocation10 + $0xa0] sm:$0xf] }
 0x4a3   :  { %v1972_v38 = vmax.f32 %v1936_v63, %v1954_v58  ;;  %v1973_v33 = vmax.f32 %v1937_v4, %v1955_v3  ;;  %v7705_v58 = vld [vmem:[#allocation10 + $0xd4] sm:$0xf0]  ;;  %v6451_v3 = vor.u32 %v7721_v55, %v6448_v56  ;;  %v7718_v63 = vld [vmem:[#allocation10 + $0x13c] sm:$0xf0]  ;;  %v7702_v4 = vld [vmem:[#allocation10 + $0xc4] sm:$0xf]  ;;  %2788 = vmatpush.bf16.msrb.mxu3 %v6395_v59 }
 0x4a4   :  { %v6272_v55 = vld [vmem:[#allocation10 + $0x18] sm:$0xf0]  ;;  %v6350_v56 = vld [vmem:[#allocation10 + $0x98] sm:$0xf]  ;;  %v6352_v59 = vld [vmem:[#allocation10 + $0xb0] sm:$0xf0] }
 0x4a5   :  { %v8371_v5 = vmin.f32 %v1972_v38, %v1966_v1  ;;  %v8373_v6 = vmin.f32 %v1973_v33, %v1967_v35  ;;  %v7715_v1 = vld [vmem:[#allocation10 + $0x12c] sm:$0xf]  ;;  %v6368_v35 = vld [vmem:[#allocation10 + $0xd8] sm:$0xf0]  ;;  %2812 = vmatpush.bf16.msra.mxu1 %v6451_v3  ;;  %v6423_v38 = vor.u32 %v7718_v63, %v6422_v61  ;;  %v6424_v33 = vld [vmem:[#allocation10 + $0x140] sm:$0xf0] }
 0x4a6   :  { %v1905_v8 = vpop.f32.mrf.mxu2  ;;  %v1918_v10 = vpop.f32.mrf.mxu3  ;;  %v7697_v3 = vld [vmem:[#allocation10 + $0x9c] sm:$0xf]  ;;  %v6454_v61 = vld [vmem:[#allocation10 + $0x160] sm:$0xf]  ;;  %v7701_v51 = vld [vmem:[#allocation10 + $0xb4] sm:$0xf0] }
 0x4a7   :  { %v1996_v11 = vpack.c.bf16 %v8371_v5, %v8371_v5  ;;  %v1997_v12 = vpack.c.bf16 %v8373_v6, %v8373_v6  ;;  %v6427_v8 = vor.u32 %v7715_v1, %v6424_v33  ;;  %v6367_v10 = vor.u32 %v7705_v58, %v6366_v2  ;;  %2800 = vmatpush.bf16.msra.mxu0 %v6423_v38  ;;  %v7725_v1 = vld [vmem:[#allocation10 + $0x174] sm:$0xf0] }
 0x4a8   :  { %v6275_v2 = vor.u32 %v7678_v62, %v6272_v55  ;;  %v6351_v58 = vor.u32 %v7700_v57, %v6350_v56  ;;  %v6355_v63 = vor.u32 %v7697_v3, %v6352_v59  ;;  %v6455_v38 = vor.u32 %v7725_v1, %v6454_v61  ;;  %v7698_v62 = vld [vmem:[#allocation10 + $0xa4] sm:$0xf]  ;;  %v6360_v55 = vld [vmem:[#allocation10 + $0xb8] sm:$0xf0]  ;;  %v6334_v57 = vld [vmem:[#allocation10 + $0x70] sm:$0xf] }
 0x4a9   :  { %2442 = vmatmul.bf16.vlgmr.msrb.gmra.mxu0 %v1996_v11  ;;  %2455 = vmatmul.bf16.vlgmr.msrb.gmra.mxu1 %v1997_v12  ;;  %v6371_v11 = vor.u32 %v7702_v4, %v6368_v35  ;;  %v6342_v12 = vld [vmem:[#allocation10 + $0x90] sm:$0xf]  ;;  %v7722_v4 = vld [vmem:[#allocation10 + $0x164] sm:$0xf]  ;;  %v6456_v35 = vld [vmem:[#allocation10 + $0x178] sm:$0xf0]  ;;  %v6363_v56 = vor.u32 %v7698_v62, %v6360_v55 }
 0x4aa   :  { %2813 = vmatpush.bf16.msra.mxu1 %v6427_v8  ;;  %2776 = vmatpush.bf16.msrb.mxu2 %v6367_v10  ;;  %v6459_v33 = vor.u32 %v7722_v4, %v6456_v35  ;;  %v6326_v8 = vld [vmem:[#allocation10 + $0x68] sm:$0xf]  ;;  %v7694_v10 = vld [vmem:[#allocation10 + $0x7c] sm:$0xf0]  ;;  %v6336_v3 = vld [vmem:[#allocation10 + $0x88] sm:$0xf0] }
 0x4ab   :  { %2789 = vmatpush.bf16.msrb.mxu3 %v6371_v11  ;;  %v7691_v11 = vld [vmem:[#allocation10 + $0x6c] sm:$0xf]  ;;  %v7689_v1 = vld [vmem:[#allocation10 + $0x54] sm:$0xf0]  ;;  %v7686_v4 = vld [vmem:[#allocation10 + $0x44] sm:$0xf] }
 0x4ac   :  { %v6312_v35 = vld [vmem:[#allocation10 + $0x58] sm:$0xf0]  ;;  %v7735_v62 = vld [vmem:[#allocation9 + $0x48] sm:$0xff]  ;;  %v7754_v55 = vld [vmem:[#allocation9 + $0xe0] sm:$0xff] }
 0x4ae   :  { %2814 = vmatpush.bf16.msra.mxu1 %v6403_v36 }
 0x4b2   :  { %2815 = vmatpush.bf16.msra.mxu1 %v6379_v49  ;;  %v6387_v49 = vor.u32 %v7704_v48, %v6384_v27  ;;  %v7728_v48 = vld [vmem:[#allocation9 + $0x10] sm:$0xff] }
 0x4b3   :  { %v7736_v27 = vld [vmem:[#allocation9 + $0x50] sm:$0xff] }
 0x4b6   :  { %2816 = vmatpush.bf16.msra.mxu1 %v6355_v63  ;;  %v6310_v63 = vld [vmem:[#allocation10 + $0x40] sm:$0xf] }
 0x516   :  { %v2391_v52 = vpop.f32.mrf.mxu0  ;;  %v2404_v43 = vpop.f32.mrf.mxu1 }
 0x517   :  { %v2417_v0 = vpop.f32.mrf.mxu2  ;;  %v2430_v46 = vpop.f32.mrf.mxu3  ;;  %v2392_v26 = vadd.f32 %v8382_v14, %v2391_v52  ;;  %v7699_v52 = vld [vmem:[#allocation10 + $0xa4] sm:$0xf0] }
 0x519   :  { %v2405_v16 = vadd.f32 %v2404_v43, %v2392_v26  ;;  %v7696_v43 = vld [vmem:[#allocation10 + $0x94] sm:$0xf] }
 0x51b   :  { %v2418_v18 = vadd.f32 %v2417_v0, %v2405_v16  ;;  %v6344_v0 = vld [vmem:[#allocation10 + $0xa8] sm:$0xf0]  ;;  %v6318_v16 = vld [vmem:[#allocation10 + $0x60] sm:$0xf] }
 0x51c   :  { %v6347_v26 = vor.u32 %v7696_v43, %v6344_v0  ;;  %v6430_v43 = vld [vmem:[#allocation10 + $0x130] sm:$0xf]  ;;  %v7719_v0 = vld [vmem:[#allocation10 + $0x144] sm:$0xf0] }
 0x51d   :  { %v2431_v19 = vadd.f32 %v2430_v46, %v2418_v18  ;;  %v6343_v46 = vor.u32 %v7699_v52, %v6342_v12  ;;  %v6327_v12 = vor.u32 %v7694_v10, %v6326_v8  ;;  %v6328_v52 = vld [vmem:[#allocation10 + $0x80] sm:$0xf0]  ;;  %v6315_v8 = vor.u32 %v7686_v4, %v6312_v35  ;;  %v6286_v10 = vld [vmem:[#allocation10 + $0x10] sm:$0xf]  ;;  %v7751_v4 = vld [vmem:[#allocation9 + $0xc8] sm:$0xff] }
 0x51e   :  { %v2393_v9 = vpop.f32.mrf.mxu0  ;;  %v2406_v28 = vpop.f32.mrf.mxu1  ;;  %2790 = vmatpush.bf16.msrb.mxu3 %v6347_v26  ;;  %v6431_v26 = vor.u32 %v7719_v0, %v6430_v43  ;;  %v7764_v35 = vld [vmem:[#allocation9 + $0x130] sm:$0xff] }
 0x51f   :  { %v2419_v17 = vpop.f32.mrf.mxu2  ;;  %v2432_v7 = vpop.f32.mrf.mxu3  ;;  %v7693_v9 = vld [vmem:[#allocation10 + $0x74] sm:$0xf0]  ;;  %v7690_v28 = vld [vmem:[#allocation10 + $0x64] sm:$0xf]  ;;  %2777 = vmatpush.bf16.msrb.mxu2 %v6343_v46  ;;  %v6331_v46 = vor.u32 %v7691_v11, %v6328_v52  ;;  %v7683_v11 = vld [vmem:[#allocation10 + $0x24] sm:$0xf0] }
 0x520   :  { %v6320_v17 = vld [vmem:[#allocation10 + $0x78] sm:$0xf0]  ;;  %v6319_v7 = vor.u32 %v7693_v9, %v6318_v16  ;;  %v7716_v16 = vld [vmem:[#allocation10 + $0x134] sm:$0xf]  ;;  %v6432_v9 = vld [vmem:[#allocation10 + $0x148] sm:$0xf0]  ;;  %v6287_v43 = vor.u32 %v7683_v11, %v6286_v10 }
 0x521   :  { %2817 = vmatpush.bf16.msra.mxu1 %v6331_v46  ;;  %v6288_v52 = vld [vmem:[#allocation10 + $0x28] sm:$0xf0] }
 0x522   :  { %v7763_v10 = vld [vmem:[#allocation9 + $0x128] sm:$0xff] }
 0x523   :  { %2778 = vmatpush.bf16.msrb.mxu2 %v6319_v7  ;;  %v7688_v7 = vld [vmem:[#allocation10 + $0x4c] sm:$0xf0]  ;;  %v7771_v11 = vld [vmem:[#allocation9 + $0x168] sm:$0xff] }
 0x526   :  { %v2443_v20 = vpop.f32.mrf.mxu0  ;;  %v2456_v21 = vpop.f32.mrf.mxu1 }
 0x527   :  { %v2444_v22 = vadd.f32 %v2443_v20, %v2431_v19  ;;  %v6323_v19 = vor.u32 %v7690_v28, %v6320_v17  ;;  %v6435_v28 = vor.u32 %v7716_v16, %v6432_v9  ;;  %v6302_v17 = vld [vmem:[#allocation10 + $0x38] sm:$0xf] }
 0x528   :  { %v7733_v16 = vld [vmem:[#allocation9 + $0x38] sm:$0xff] }
 0x529   :  { %v8385_v23 = vadd.f32 %v2456_v21, %v2444_v22  ;;  %2791 = vmatpush.bf16.msrb.mxu3 %v6323_v19  ;;  %v6303_v19 = vor.u32 %v7688_v7, %v6302_v17  ;;  %v7741_v9 = vld [vmem:[#allocation9 + $0x78] sm:$0xff]  ;;  %v7732_v17 = vld [vmem:[#allocation9 + $0x30] sm:$0xff] }
 0x52a   :  { %v7740_v7 = vld [vmem:[#allocation9 + $0x70] sm:$0xff] }
 0x52b   :  { %2460 = vmax.xlane.f32.xlu2 %v8385_v23 }
 0x52d   :  { %2792 = vmatpush.bf16.msrb.mxu3 %v6299_v45  ;;  %v6283_v45 = vor.u32 %v7679_v40, %v6280_v41  ;;  %v7749_v41 = vld [vmem:[#allocation9 + $0xb8] sm:$0xff] }
 0x52e   :  { %v2445_v32 = vpop.f32.mrf.mxu0  ;;  %v2458_v13 = vpop.f32.mrf.mxu1 }
 0x52f   :  { %v6398_v32 = vld [vmem:[#allocation10 + $0xf8] sm:$0xf]  ;;  %v7712_v13 = vld [vmem:[#allocation10 + $0x10c] sm:$0xf0] }
 0x530   :  { %v6399_v15 = vor.u32 %v7712_v13, %v6398_v32  ;;  %v7713_v32 = vld [vmem:[#allocation10 + $0x114] sm:$0xf0] }
 0x531   :  { %2793 = vmatpush.bf16.msrb.mxu3 %v6275_v2  ;;  %v7695_v2 = vld [vmem:[#allocation10 + $0x84] sm:$0xf0] }
 0x532   :  { %2801 = vmatpush.bf16.msra.mxu0 %v6399_v15  ;;  %v7710_v15 = vld [vmem:[#allocation10 + $0x104] sm:$0xf]  ;;  %v6335_v59 = vor.u32 %v7695_v2, %v6334_v57  ;;  %v7753_v57 = vld [vmem:[#allocation9 + $0xd8] sm:$0xff]  ;;  %v7744_v2 = vld [vmem:[#allocation9 + $0x90] sm:$0xff] }
 0x533   :  { %v6411_v36 = vor.u32 %v7710_v15, %v6408_v31 }
 0x535   :  { %2838 = vmatpush.bf16.msra.mxu3 %v6459_v33  ;;  %v6311_v33 = vor.u32 %v7689_v1, %v6310_v63  ;;  %v7773_v63 = vld [vmem:[#allocation9 + $0x178] sm:$0xff]  ;;  %v7743_v1 = vld [vmem:[#allocation9 + $0x88] sm:$0xff] }
 0x536   :  { %2802 = vmatpush.bf16.msra.mxu0 %v6375_v25  ;;  %v6383_v25 = vor.u32 %v7707_v44, %v6382_v42  ;;  %v7757_v42 = vld [vmem:[#allocation9 + $0xf8] sm:$0xff] }
 0x537   :  { %v7729_v44 = vld [vmem:[#allocation9 + $0x18] sm:$0xff] }
 0x539   :  { %2839 = vmatpush.bf16.msra.mxu3 %v6435_v28 }
 0x53a   :  { %2803 = vmatpush.bf16.msra.mxu0 %v6351_v58  ;;  %v7692_v58 = vld [vmem:[#allocation10 + $0x74] sm:$0xf] }
 0x53b   :  { %v6339_v61 = vor.u32 %v7692_v58, %v6336_v3  ;;  %v7752_v58 = vld [vmem:[#allocation9 + $0xd0] sm:$0xff]  ;;  %v7726_v3 = vld [vmem:[#allocation9] sm:$0xff] }
 0x53d   :  { %2840 = vmatpush.bf16.msra.mxu3 %v6411_v36 }
 0x53e   :  { %2804 = vmatpush.bf16.msra.mxu0 %v6327_v12  ;;  %v7680_v12 = vld [vmem:[#allocation10 + $0x14] sm:$0xf] }
 0x53f   :  { %v6291_v0 = vor.u32 %v7680_v12, %v6288_v52  ;;  %v7762_v12 = vld [vmem:[#allocation9 + $0x120] sm:$0xff] }
 0x540   :  { %v7770_v52 = vld [vmem:[#allocation9 + $0x160] sm:$0xff] }
 0x541   :  { %2841 = vmatpush.bf16.msra.mxu3 %v6387_v49  ;;  %v7747_v49 = vld [vmem:[#allocation9 + $0xa8] sm:$0xff] }
 0x542   :  { %2805 = vmatpush.bf16.msra.mxu0 %v6303_v19 }
 0x545   :  { %2842 = vmatpush.bf16.msra.mxu3 %v6363_v56  ;;  %v7745_v56 = vld [vmem:[#allocation9 + $0x98] sm:$0xff] }
 0x549   :  { %2843 = vmatpush.bf16.msra.mxu3 %v6339_v61  ;;  %v7765_v61 = vld [vmem:[#allocation9 + $0x138] sm:$0xff] }
 0x54d   :  { %2844 = vmatpush.bf16.msra.mxu3 %v6315_v8  ;;  %v7750_v8 = vld [vmem:[#allocation9 + $0xc0] sm:$0xff] }
 0x551   :  { %2845 = vmatpush.bf16.msra.mxu3 %v6291_v0  ;;  %v7769_v0 = vld [vmem:[#allocation9 + $0x158] sm:$0xff] }
 0x59e   :  { %v2461_v18 = vpop.xlane.xlu2 %2460 }
 0x59f   :  { %v2462_v20 = vsub.f32 %v8385_v23, %v2461_v18  ;;  %v6295_v23 = vor.u32 %v7687_v39, %v6294_v37  ;;  %v7685_v18 = vld [vmem:[#allocation10 + $0x3c] sm:$0xf]  ;;  %v6278_v37 = vld [vmem:[#allocation10 + $0x8] sm:$0xf]  ;;  %v7682_v39 = vld [vmem:[#allocation10 + $0x1c] sm:$0xf0] }
 0x5a1   :  { %v2463_v21 = vmul.f32 1.442695, %v2462_v20  ;;  %2779 = vmatpush.bf16.msrb.mxu2 %v6295_v23  ;;  %v6304_v20 = vld [vmem:[#allocation10 + $0x50] sm:$0xf0]  ;;  %v6279_v23 = vor.u32 %v7682_v39, %v6278_v37  ;;  %v7730_v37 = vld [vmem:[#allocation9 + $0x20] sm:$0xff] }
 0x5a2   :  { %v6307_v13 = vor.u32 %v7685_v18, %v6304_v20  ;;  %v7738_v39 = vld [vmem:[#allocation9 + $0x60] sm:$0xff] }
 0x5a3   :  { %7990 = vpow2.f32 %v2463_v21  ;;  %v6406_v21 = vld [vmem:[#allocation10 + $0x100] sm:$0xf]  ;;  %2806 = vmatpush.bf16.msra.mxu0 %v6279_v23 }
 0x5a4   :  { %v6407_v30 = vor.u32 %v7713_v32, %v6406_v21  ;;  %2818 = vmatpush.bf16.msra.mxu1 %v6307_v13  ;;  %v7731_v32 = vld [vmem:[#allocation9 + $0x28] sm:$0xff] }
 0x5a5   :  { %2780 = vmatpush.bf16.msrb.mxu2 %v6271_v53  ;;  %v6359_v53 = vor.u32 %v7701_v51, %v6358_v50  ;;  %v7739_v13 = vld [vmem:[#allocation9 + $0x68] sm:$0xff] }
 0x5a6   :  { %v7755_v50 = vld [vmem:[#allocation9 + $0xe8] sm:$0xff] }
 0x5a7   :  { %3313 = vmatpush.bf16.msrb.mxu0 %v7733_v16  ;;  %v7727_v51 = vld [vmem:[#allocation9 + $0x8] sm:$0xff] }
 0x5a8   :  { %2819 = vmatpush.bf16.msra.mxu1 %v6283_v45  ;;  %v7737_v45 = vld [vmem:[#allocation9 + $0x58] sm:$0xff]  ;;  %v7759_v16 = vld [vmem:[#allocation9 + $0x108] sm:$0xff] }
 0x5a9   :  { %v8389_v22 = vpop.eup %7990  ;;  %2825 = vmatpush.bf16.msra.mxu2 %v6455_v38 }
 0x5aa   :  { %2465 = vadd.xlane.f32.xlu0 %v8389_v22 }
 0x5ab   :  { %3314 = vmatpush.bf16.msrb.mxu0 %v7732_v17  ;;  %v2872_v17 = vld [vmem:[#allocation4 + $0x18] sm:$0xff] }
 0x5ac   :  { %3326 = vmatpush.bf16.msrb.mxu1 %v7741_v9  ;;  %v7767_v9 = vld [vmem:[#allocation9 + $0x148] sm:$0xff] }
 0x5ad   :  { %2826 = vmatpush.bf16.msra.mxu2 %v6431_v26 }
 0x5af   :  { %3315 = vmatpush.bf16.msrb.mxu0 %v7731_v32 }
 0x5b0   :  { %3327 = vmatpush.bf16.msrb.mxu1 %v7740_v7 }
 0x5b1   :  { %2827 = vmatpush.bf16.msra.mxu2 %v6407_v30 }
 0x5b3   :  { %3316 = vmatpush.bf16.msrb.mxu0 %v7730_v37 }
 0x5b4   :  { %3328 = vmatpush.bf16.msrb.mxu1 %v7739_v13  ;;  %v2890_v13 = vadd.f32 0.03137255, %v2872_v17 }
 0x5b5   :  { %2828 = vmatpush.bf16.msra.mxu2 %v6383_v25  ;;  %v7756_v25 = vld [vmem:[#allocation9 + $0xf0] sm:$0xff] }
 0x5b7   :  { %3317 = vmatpush.bf16.msrb.mxu0 %v7729_v44 }
 0x5b8   :  { %3329 = vmatpush.bf16.msrb.mxu1 %v7738_v39 }
 0x5b9   :  { %2829 = vmatpush.bf16.msra.mxu2 %v6359_v53  ;;  %v7746_v53 = vld [vmem:[#allocation9 + $0xa0] sm:$0xff] }
 0x5bb   :  { %3318 = vmatpush.bf16.msrb.mxu0 %v7728_v48 }
 0x5bc   :  { %3330 = vmatpush.bf16.msrb.mxu1 %v7737_v45 }
 0x5bd   :  { %2830 = vmatpush.bf16.msra.mxu2 %v6335_v59  ;;  %v7734_v59 = vld [vmem:[#allocation9 + $0x40] sm:$0xff] }
 0x5bf   :  { %3319 = vmatpush.bf16.msrb.mxu0 %v7727_v51 }
 0x5c0   :  { %3331 = vmatpush.bf16.msrb.mxu1 %v7736_v27 }
 0x5c1   :  { %2831 = vmatpush.bf16.msra.mxu2 %v6311_v33  ;;  %v7742_v33 = vld [vmem:[#allocation9 + $0x80] sm:$0xff] }
 0x5c3   :  { %3320 = vmatpush.bf16.msrb.mxu0 %v7726_v3 }
 0x5c4   :  { %3332 = vmatpush.bf16.msrb.mxu1 %v7735_v62 }
 0x5c5   :  { %2832 = vmatpush.bf16.msra.mxu2 %v6287_v43  ;;  %v7761_v43 = vld [vmem:[#allocation9 + $0x118] sm:$0xff] }
 0x5c8   :  { %3333 = vmatpush.bf16.msrb.mxu1 %v7734_v59 }
 0x61d   :  { %v2466_v38 = vpop.xlane.xlu0 %2465 }
 0x61e   :  { %7992 = vrcp.f32 %v2466_v38  ;;  %v2478_v18 = vand.u32 2147483648, %v2466_v38  ;;  %v2476_v20 = vand.u32 2147483647, %v2466_v38  ;;  %vm2472_vm6 = vweird.f32 %v2466_v38 }
 0x620   :  { %v2479_v30 = vor.u32 1.1754944e-38, %v2478_v18  ;;  %vm2477_vm8 = vcmp.eq.f32.partialorder %v2476_v20, 8.507059e+37  ;;  %v7758_v18 = vld [vmem:[#allocation9 + $0x100] sm:$0xff]  ;;  %v6463_v20 = vadd.f32 -0.03137255, %v2872_v17 }
 0x622   :  { %v2884_v37 = vmax.f32 %v6463_v20, 0.0 }
 0x624   :  { %v7993_v46 = vpop.eup %7992 }
 0x625   :  { %v2468_v26 = vmul.f32 %v7993_v46, %v2466_v38  ;;  %vm2473_vm5 = vweird.f32 %v7993_v46  ;;  %v7772_v38 = vld [vmem:[#allocation9 + $0x170] sm:$0xff] }
 0x626   :  { %vm2474_vm7 = vmor %vm2472_vm6, %vm2473_vm5 }
 0x627   :  { %v2469_v28 = vsub.f32 1.0, %v2468_v26  ;;  %v7768_v26 = vld [vmem:[#allocation9 + $0x150] sm:$0xff] }
 0x629   :  { %v2470_v19 = vmul.f32 %v7993_v46, %v2469_v28  ;;  %v2871_v28 = vld [vmem:[#allocation4 + $0x10] sm:$0xff] }
 0x62a   :  { %v6462_v7 = vadd.f32 -0.03137255, %v2871_v28  ;;  %v2889_v32 = vadd.f32 0.03137255, %v2871_v28 }
 0x62b   :  { %v2471_v21 = vadd.f32 %v7993_v46, %v2470_v19  ;;  %v7766_v19 = vld [vmem:[#allocation9 + $0x140] sm:$0xff] }
 0x62c   :  { %v2895_v44 = vmin.f32 %v2889_v32, 1.0 }
 0x62d   :  { %v2475_v15 = vsel %vm2474_vm7, %v7993_v46, %v2471_v21  ;;  %v7760_v46 = vld [vmem:[#allocation9 + $0x110] sm:$0xff]  ;;  %v2869_v21 = vld [vmem:[#allocation4] sm:$0xff] }
 0x62e   :  { %v2480_v31 = vsel %vm2477_vm8, %v2479_v30, %v2475_v15  ;;  %v2870_v30 = vld [vmem:[#allocation4 + $0x8] sm:$0xff]  ;;  %v6460_v39 = vadd.f32 -0.03137255, %v2869_v21 }
 0x62f   :  { %v2481_v36 = vmul.f32 %v8389_v22, %v2480_v31  ;;  %v7748_v22 = vld [vmem:[#allocation9 + $0xb0] sm:$0xff]  ;;  %v2883_v31 = vmax.f32 %v6462_v7, 0.0  ;;  %v2888_v48 = vadd.f32 0.03137255, %v2870_v30 }
 0x630   :  { %v2881_v62 = vmax.f32 %v6460_v39, 0.0 }
 0x631   :  { %v2483_v40 = vsub.f32 %v2481_v36, %v8281_v54  ;;  %v2894_v3 = vmin.f32 %v2888_v48, 1.0 }
 0x633   :  { %v2484_v23 = vpack.c.bf16 %v2483_v40, %v2483_v40 }
 0x635   :  { %2781 = vmatmul.bf16.vlgmr.msrb.gmra.mxu2 %v2484_v23  ;;  %2794 = vmatmul.bf16.vlgmr.msrb.gmra.mxu3 %v2484_v23 }
 0x636   :  { %2807 = vmatmul.bf16.vlgmr.msra.gmra.mxu0 %v2484_v23  ;;  %2820 = vmatmul.bf16.vlgmr.msra.gmra.mxu1 %v2484_v23 }
 0x637   :  { %3339 = vmatpush.bf16.msrb.mxu2 %v7749_v41  ;;  %3352 = vmatpush.bf16.msrb.mxu3 %v7757_v42  ;;  %v6461_v41 = vadd.f32 -0.03137255, %v2870_v30 }
 0x638   :  { %3365 = vmatpush.bf16.msra.mxu0 %v7765_v61  ;;  %3378 = vmatpush.bf16.msra.mxu1 %v7773_v63 }
 0x63b   :  { %3340 = vmatpush.bf16.msrb.mxu2 %v7748_v22  ;;  %3353 = vmatpush.bf16.msrb.mxu3 %v7756_v25  ;;  %v2896_v22 = vmin.f32 %v2890_v13, 1.0  ;;  %v2887_v25 = vadd.f32 0.03137255, %v2869_v21 }
 0x63c   :  { %3366 = vmatpush.bf16.msra.mxu0 %v7764_v35  ;;  %3379 = vmatpush.bf16.msra.mxu1 %v7772_v38 }
 0x63f   :  { %3341 = vmatpush.bf16.msrb.mxu2 %v7747_v49  ;;  %3354 = vmatpush.bf16.msrb.mxu3 %v7755_v50 }
 0x640   :  { %3367 = vmatpush.bf16.msra.mxu0 %v7763_v10  ;;  %3380 = vmatpush.bf16.msra.mxu1 %v7771_v11  ;;  %v2873_v11 = vld [vmem:[#allocation4 + $0x20] sm:$0xff] }
 0x643   :  { %3342 = vmatpush.bf16.msrb.mxu2 %v7746_v53  ;;  %3355 = vmatpush.bf16.msrb.mxu3 %v7754_v55  ;;  %v2882_v53 = vmax.f32 %v6461_v41, 0.0 }
 0x644   :  { %3368 = vmatpush.bf16.msra.mxu0 %v7762_v12  ;;  %3381 = vmatpush.bf16.msra.mxu1 %v7770_v52  ;;  %v2874_v12 = vld [vmem:[#allocation4 + $0x28] sm:$0xff]  ;;  %v6464_v52 = vadd.f32 -0.03137255, %v2873_v11 }
 0x645   :  { %2833 = vmatmul.bf16.vlgmr.msra.gmra.mxu2 %v2484_v23  ;;  %2846 = vmatmul.bf16.vlgmr.msra.gmra.mxu3 %v2484_v23 }
 0x647   :  { %3343 = vmatpush.bf16.msrb.mxu2 %v7745_v56  ;;  %3356 = vmatpush.bf16.msrb.mxu3 %v7753_v57 }
 0x648   :  { %3369 = vmatpush.bf16.msra.mxu0 %v7761_v43  ;;  %3382 = vmatpush.bf16.msra.mxu1 %v7769_v0  ;;  %v6465_v43 = vadd.f32 -0.03137255, %v2874_v12  ;;  %v2891_v0 = vadd.f32 0.03137255, %v2873_v11  ;;  %v6836_v11 = vld [vmem:[#allocation10 + $0x158] sm:$0xf] }
 0x64a   :  { %v2886_v28 = vmax.f32 %v6465_v43, 0.0  ;;  %v7817_v43 = vld [vmem:[#allocation10 + $0x15c] sm:$0xf] }
 0x64b   :  { %3344 = vmatpush.bf16.msrb.mxu2 %v7744_v2  ;;  %3357 = vmatpush.bf16.msrb.mxu3 %v7752_v58  ;;  %v2893_v2 = vmin.f32 %v2887_v25, 1.0 }
 0x64c   :  { %3370 = vmatpush.bf16.msra.mxu0 %v7760_v46  ;;  %3383 = vmatpush.bf16.msra.mxu1 %v7768_v26  ;;  %v2892_v46 = vadd.f32 0.03137255, %v2874_v12  ;;  %v7820_v12 = vld [vmem:[#allocation10 + $0x16c] sm:$0xf0] }
 0x64e   :  { %v2898_v21 = vmin.f32 %v2892_v46, 1.0 }
 0x64f   :  { %3345 = vmatpush.bf16.msrb.mxu2 %v7743_v1  ;;  %3358 = vmatpush.bf16.msrb.mxu3 %v7751_v4 }
 0x650   :  { %3371 = vmatpush.bf16.msra.mxu0 %v7759_v16  ;;  %3384 = vmatpush.bf16.msra.mxu1 %v7767_v9  ;;  %v2885_v9 = vmax.f32 %v6464_v52, 0.0  ;;  %v6837_v52 = vor.u32 %v7820_v12, %v6836_v11  ;;  %v7774_v11 = vld [vmem:[#allocation10 + $0x4] sm:$0xf] }
 0x653   :  { %3346 = vmatpush.bf16.msrb.mxu2 %v7742_v33  ;;  %3359 = vmatpush.bf16.msrb.mxu3 %v7750_v8 }
 0x654   :  { %3372 = vmatpush.bf16.msra.mxu0 %v7758_v18  ;;  %3385 = vmatpush.bf16.msra.mxu1 %v7766_v19  ;;  %v2897_v19 = vmin.f32 %v2891_v0, 1.0  ;;  %v6838_v0 = vld [vmem:[#allocation10 + $0x170] sm:$0xf0] }
 0x6b3   :  { %v2808_v15 = vpop.f32.mrf.mxu0  ;;  %v2821_v36 = vpop.f32.mrf.mxu1 }
 0x6b4   :  { %vm2853_vm9 = vcmp.ge.f32.partialorder %v2808_v15, 0.0  ;;  %vm2854_vm10 = vcmp.ge.f32.partialorder %v2821_v36, 0.0 }
 0x6b5   :  { %v2859_v40 = vsel %vm2853_vm9, 0.007843138, %v8168_v60  ;;  %v2860_v23 = vsel %vm2854_vm10, 0.007843138, %v8168_v60 }
 0x6b6   :  { %v2865_v42 = vadd.f32 %v2859_v40, %v8347_v29  ;;  %v2866_v45 = vadd.f32 %v2860_v23, %v8349_v34 }
 0x6b8   :  { %v2901_v27 = vmax.f32 %v2865_v42, %v2883_v31  ;;  %v2902_v49 = vmax.f32 %v2866_v45, %v2884_v37  ;;  %v2782_v50 = vpop.f32.mrf.mxu2  ;;  %v2795_v51 = vpop.f32.mrf.mxu3 }
 0x6b9   :  { %vm2851_vm11 = vcmp.ge.f32.partialorder %v2782_v50, 0.0  ;;  %vm2852_vm12 = vcmp.ge.f32.partialorder %v2795_v51, 0.0 }
 0x6ba   :  { %v8398_v55 = vmin.f32 %v2901_v27, %v2895_v44  ;;  %v8400_v56 = vmin.f32 %v2902_v49, %v2896_v22  ;;  %v2857_v29 = vsel %vm2851_vm11, 0.007843138, %v8168_v60  ;;  %v2858_v57 = vsel %vm2852_vm12, 0.007843138, %v8168_v60 }
 0x6bb   :  { %v2863_v34 = vadd.f32 %v2857_v29, %v8359_v47  ;;  %v2864_v58 = vadd.f32 %v2858_v57, %v8361_v24  ;;  %v2810_v59 = vpop.f32.mrf.mxu0  ;;  %v2823_v61 = vpop.f32.mrf.mxu1  ;;  %v6828_v57 = vld [vmem:[#allocation10 + $0x150] sm:$0xf] }
 0x6bc   :  { %v2925_v63 = vpack.c.bf16 %v8398_v55, %v8398_v55  ;;  %v2926_v1 = vpack.c.bf16 %v8400_v56, %v8400_v56  ;;  %v7813_v59 = vld [vmem:[#allocation10 + $0x134] sm:$0xf0] }
 0x6bd   :  { %v2899_v4 = vmax.f32 %v2863_v34, %v2881_v62  ;;  %v2900_v35 = vmax.f32 %v2864_v58, %v2882_v53  ;;  %v7819_v34 = vld [vmem:[#allocation10 + $0x164] sm:$0xf0]  ;;  %v6830_v58 = vld [vmem:[#allocation10 + $0x168] sm:$0xf0] }
 0x6be   :  { %3347 = vmatmul.bf16.vlgmr.msrb.gmra.mxu2 %v2925_v63  ;;  %3360 = vmatmul.bf16.vlgmr.msrb.gmra.mxu3 %v2926_v1  ;;  %v7810_v63 = vld [vmem:[#allocation10 + $0x124] sm:$0xf]  ;;  %v6806_v1 = vld [vmem:[#allocation10 + $0x138] sm:$0xf0] }
 0x6bf   :  { %v8410_v38 = vmin.f32 %v2899_v4, %v2893_v2  ;;  %v8412_v33 = vmin.f32 %v2900_v35, %v2894_v3  ;;  %v7816_v2 = vld [vmem:[#allocation10 + $0x154] sm:$0xf]  ;;  %v6804_v3 = vld [vmem:[#allocation10 + $0x120] sm:$0xf]  ;;  %v6809_v35 = vor.u32 %v7810_v63, %v6806_v1 }
 0x6c0   :  { %v2784_v47 = vpop.f32.mrf.mxu2  ;;  %v2797_v8 = vpop.f32.mrf.mxu3  ;;  %v6833_v61 = vor.u32 %v7816_v2, %v6830_v58  ;;  %v6805_v4 = vor.u32 %v7813_v59, %v6804_v3  ;;  %v7783_v58 = vld [vmem:[#allocation10 + $0x44] sm:$0xf0]  ;;  %v7780_v3 = vld [vmem:[#allocation10 + $0x34] sm:$0xf]  ;;  %v6686_v59 = vld [vmem:[#allocation10 + $0x48] sm:$0xf0] }
 0x6c1   :  { %v2923_v24 = vpack.c.bf16 %v8410_v38, %v8410_v38  ;;  %v2924_v10 = vpack.c.bf16 %v8412_v33, %v8412_v33  ;;  %v6780_v47 = vld [vmem:[#allocation10 + $0xf0] sm:$0xf]  ;;  %v7807_v8 = vld [vmem:[#allocation10 + $0x104] sm:$0xf0]  ;;  %v7802_v63 = vld [vmem:[#allocation10 + $0xdc] sm:$0xf0]  ;;  %v6689_v1 = vor.u32 %v7780_v3, %v6686_v59 }
 0x6c2   :  { %3717 = vmatpush.bf16.msra.mxu3 %v6833_v61  ;;  %v6781_v46 = vor.u32 %v7807_v8, %v6780_v47  ;;  %v6764_v61 = vld [vmem:[#allocation10 + $0xc8] sm:$0xf]  ;;  %v6766_v47 = vld [vmem:[#allocation10 + $0xe0] sm:$0xf0]  ;;  %v6772_v59 = vld [vmem:[#allocation10 + $0xd0] sm:$0xf] }
 0x6c3   :  { %3321 = vmatmul.bf16.vlgmr.msrb.gmra.mxu0 %v2923_v24  ;;  %3334 = vmatmul.bf16.vlgmr.msrb.gmra.mxu1 %v2924_v10  ;;  %v7804_v24 = vld [vmem:[#allocation10 + $0xf4] sm:$0xf]  ;;  %v6782_v10 = vld [vmem:[#allocation10 + $0x108] sm:$0xf0] }
 0x6c4   :  { %3730 = vmatpush.bf16.msrb.mxu0 %v6837_v52  ;;  %v6662_v52 = vld [vmem:[#allocation10 + $0x18] sm:$0xf0] }
 0x6c6   :  { %3718 = vmatpush.bf16.msra.mxu3 %v6809_v35  ;;  %v7799_v35 = vld [vmem:[#allocation10 + $0xcc] sm:$0xf] }
 0x6c7   :  { %v6769_v8 = vor.u32 %v7799_v35, %v6766_v47  ;;  %v6774_v35 = vld [vmem:[#allocation10 + $0xe8] sm:$0xf0] }
 0x6c8   :  { %v2834_v26 = vpop.f32.mrf.mxu2  ;;  %v2847_v16 = vpop.f32.mrf.mxu3 }
 0x6c9   :  { %vm2855_vm13 = vcmp.ge.f32.partialorder %v2834_v26, 0.0  ;;  %vm2856_vm14 = vcmp.ge.f32.partialorder %v2847_v16, 0.0  ;;  %v6756_v26 = vld [vmem:[#allocation10 + $0xc0] sm:$0xf]  ;;  %v7801_v16 = vld [vmem:[#allocation10 + $0xd4] sm:$0xf0] }
 0x6ca   :  { %v2861_v17 = vsel %vm2855_vm13, 0.007843138, %v8168_v60  ;;  %v2862_v7 = vsel %vm2856_vm14, 0.007843138, %v8168_v60 }
 0x6cb   :  { %v2867_v18 = vadd.f32 %v2861_v17, %v8371_v5  ;;  %v2868_v20 = vadd.f32 %v2862_v7, %v8373_v6  ;;  %v6812_v17 = vld [vmem:[#allocation10 + $0x128] sm:$0xf]  ;;  %v7814_v7 = vld [vmem:[#allocation10 + $0x13c] sm:$0xf0] }
 0x6cd   :  { %v2903_v32 = vmax.f32 %v2867_v18, %v2885_v9  ;;  %v2904_v13 = vmax.f32 %v2868_v20, %v2886_v28  ;;  %v6841_v9 = vor.u32 %v7817_v43, %v6838_v0  ;;  %v6785_v28 = vor.u32 %v7804_v24, %v6782_v10  ;;  %v7811_v18 = vld [vmem:[#allocation10 + $0x12c] sm:$0xf]  ;;  %v6758_v20 = vld [vmem:[#allocation10 + $0xd8] sm:$0xf0]  ;;  %v6660_v24 = vld [vmem:[#allocation10] sm:$0xf] }
 0x6ce   :  { %v7777_v10 = vld [vmem:[#allocation10 + $0x14] sm:$0xf0]  ;;  %v7796_v0 = vld [vmem:[#allocation10 + $0xac] sm:$0xf0] }
 0x6cf   :  { %v8422_v30 = vmin.f32 %v2903_v32, %v2897_v19  ;;  %v8424_v15 = vmin.f32 %v2904_v13, %v2898_v21  ;;  %v7798_v19 = vld [vmem:[#allocation10 + $0xc4] sm:$0xf]  ;;  %3743 = vmatpush.bf16.msrb.mxu1 %v6841_v9  ;;  %v6813_v21 = vor.u32 %v7814_v7, %v6812_v17  ;;  %3719 = vmatpush.bf16.msra.mxu3 %v6785_v28  ;;  %v6740_v43 = vld [vmem:[#allocation10 + $0x98] sm:$0xf]  ;;  %v6742_v9 = vld [vmem:[#allocation10 + $0xb0] sm:$0xf0] }
 0x6d0   :  { %v2836_v31 = vpop.f32.mrf.mxu2  ;;  %v2849_v36 = vpop.f32.mrf.mxu3  ;;  %v6814_v32 = vld [vmem:[#allocation10 + $0x140] sm:$0xf0]  ;;  %v6661_v12 = vor.u32 %v7777_v10, %v6660_v24  ;;  %v6844_v28 = vld [vmem:[#allocation10 + $0x160] sm:$0xf]  ;;  %v7821_v7 = vld [vmem:[#allocation10 + $0x174] sm:$0xf0] }
 0x6d1   :  { %v2927_v37 = vpack.c.bf16 %v8422_v30, %v8422_v30  ;;  %v2928_v39 = vpack.c.bf16 %v8424_v15, %v8424_v15  ;;  %v6817_v13 = vor.u32 %v7811_v18, %v6814_v32  ;;  %v6757_v31 = vor.u32 %v7801_v16, %v6756_v26  ;;  %3731 = vmatpush.bf16.msrb.mxu0 %v6813_v21  ;;  %v7793_v16 = vld [vmem:[#allocation10 + $0x9c] sm:$0xf]  ;;  %v7818_v18 = vld [vmem:[#allocation10 + $0x164] sm:$0xf]  ;;  %v6716_v32 = vld [vmem:[#allocation10 + $0x68] sm:$0xf] }
 0x6d2   :  { %v6761_v36 = vor.u32 %v7798_v19, %v6758_v20  ;;  %v6741_v26 = vor.u32 %v7796_v0, %v6740_v43  ;;  %v6745_v17 = vor.u32 %v7793_v16, %v6742_v9  ;;  %v6846_v19 = vld [vmem:[#allocation10 + $0x178] sm:$0xf0]  ;;  %v6845_v20 = vor.u32 %v7821_v7, %v6844_v28  ;;  %v7797_v24 = vld [vmem:[#allocation10 + $0xb4] sm:$0xf0]  ;;  %v7794_v10 = vld [vmem:[#allocation10 + $0xa4] sm:$0xf] }
 0x6d3   :  { %3373 = vmatmul.bf16.vlgmr.msra.gmra.mxu0 %v2927_v37  ;;  %3386 = vmatmul.bf16.vlgmr.msra.gmra.mxu1 %v2928_v39  ;;  %v6732_v37 = vld [vmem:[#allocation10 + $0x90] sm:$0xf]  ;;  %v7795_v39 = vld [vmem:[#allocation10 + $0xa4] sm:$0xf0]  ;;  %v6849_v21 = vor.u32 %v7818_v18, %v6846_v19  ;;  %v6700_v28 = vld [vmem:[#allocation10 + $0x40] sm:$0xf] }
 0x6d4   :  { %3744 = vmatpush.bf16.msrb.mxu1 %v6817_v13  ;;  %3720 = vmatpush.bf16.msra.mxu3 %v6761_v36  ;;  %v7790_v13 = vld [vmem:[#allocation10 + $0x7c] sm:$0xf0]  ;;  %v6724_v43 = vld [vmem:[#allocation10 + $0x70] sm:$0xf]  ;;  %v7791_v0 = vld [vmem:[#allocation10 + $0x84] sm:$0xf0] }
 0x6d5   :  { %v6717_v36 = vor.u32 %v7790_v13, %v6716_v32  ;;  %v6725_v16 = vor.u32 %v7791_v0, %v6724_v43  ;;  %v7782_v7 = vld [vmem:[#allocation10 + $0x44] sm:$0xf]  ;;  %v6702_v18 = vld [vmem:[#allocation10 + $0x58] sm:$0xf0]  ;;  %v6676_v32 = vld [vmem:[#allocation10 + $0x10] sm:$0xf] }
 0x6d6   :  { %v7779_v13 = vld [vmem:[#allocation10 + $0x24] sm:$0xf0]  ;;  %v7840_v43 = vld [vmem:[#allocation9 + $0x90] sm:$0xff] }
 0x6d7   :  { %v7848_v0 = vld [vmem:[#allocation9 + $0xd0] sm:$0xff] }
 0x740   :  { %v3322_v5 = vpop.f32.mrf.mxu0  ;;  %v3335_v40 = vpop.f32.mrf.mxu1 }
 0x741   :  { %v3348_v6 = vpop.f32.mrf.mxu2  ;;  %v3361_v23 = vpop.f32.mrf.mxu3  ;;  %v3323_v41 = vadd.f32 %v8382_v14, %v3322_v5  ;;  %v6829_v14 = vor.u32 %v7819_v34, %v6828_v57  ;;  %v7792_v5 = vld [vmem:[#allocation10 + $0x94] sm:$0xf] }
 0x742   :  { %v6790_v34 = vld [vmem:[#allocation10 + $0x110] sm:$0xf0] }
 0x743   :  { %v3336_v42 = vadd.f32 %v3335_v40, %v3323_v41  ;;  %3704 = vmatpush.bf16.msra.mxu2 %v6829_v14  ;;  %v6734_v40 = vld [vmem:[#allocation10 + $0xa8] sm:$0xf0]  ;;  %v6708_v41 = vld [vmem:[#allocation10 + $0x60] sm:$0xf]  ;;  %v6684_v14 = vld [vmem:[#allocation10 + $0x30] sm:$0xf] }
 0x745   :  { %v3349_v48 = vadd.f32 %v3348_v6, %v3336_v42  ;;  %v6733_v6 = vor.u32 %v7795_v39, %v6732_v37  ;;  %v7789_v42 = vld [vmem:[#allocation10 + $0x74] sm:$0xf0]  ;;  %v6718_v37 = vld [vmem:[#allocation10 + $0x80] sm:$0xf0]  ;;  %v6820_v39 = vld [vmem:[#allocation10 + $0x130] sm:$0xf] }
 0x747   :  { %v3362_v27 = vadd.f32 %v3361_v23, %v3349_v48  ;;  %3705 = vmatpush.bf16.msra.mxu2 %v6805_v4  ;;  %v6737_v23 = vor.u32 %v7792_v5, %v6734_v40  ;;  %v6765_v4 = vor.u32 %v7802_v63, %v6764_v61  ;;  %v7815_v5 = vld [vmem:[#allocation10 + $0x144] sm:$0xf0] }
 0x748   :  { %v3324_v44 = vpop.f32.mrf.mxu0  ;;  %v3337_v45 = vpop.f32.mrf.mxu1  ;;  %v7803_v61 = vld [vmem:[#allocation10 + $0xe4] sm:$0xf0] }
 0x749   :  { %v3350_v22 = vpop.f32.mrf.mxu2  ;;  %v3363_v25 = vpop.f32.mrf.mxu3  ;;  %v7786_v44 = vld [vmem:[#allocation10 + $0x64] sm:$0xf]  ;;  %v6710_v45 = vld [vmem:[#allocation10 + $0x78] sm:$0xf0]  ;;  %3721 = vmatpush.bf16.msra.mxu3 %v6737_v23  ;;  %v7812_v23 = vld [vmem:[#allocation10 + $0x134] sm:$0xf] }
 0x74a   :  { %v6709_v22 = vor.u32 %v7789_v42, %v6708_v41  ;;  %v6713_v48 = vor.u32 %v7786_v44, %v6710_v45  ;;  %v6822_v41 = vld [vmem:[#allocation10 + $0x148] sm:$0xf0]  ;;  %v6692_v44 = vld [vmem:[#allocation10 + $0x38] sm:$0xf]  ;;  %v7784_v45 = vld [vmem:[#allocation10 + $0x4c] sm:$0xf0] }
 0x74b   :  { %3706 = vmatpush.bf16.msra.mxu2 %v6781_v46  ;;  %v6665_v46 = vor.u32 %v7774_v11, %v6662_v52  ;;  %v6825_v42 = vor.u32 %v7812_v23, %v6822_v41  ;;  %v7837_v23 = vld [vmem:[#allocation9 + $0x78] sm:$0xff] }
 0x74d   :  { %3722 = vmatpush.bf16.msra.mxu3 %v6713_v48  ;;  %v6694_v48 = vld [vmem:[#allocation10 + $0x50] sm:$0xf0] }
 0x74f   :  { %3707 = vmatpush.bf16.msra.mxu2 %v6757_v31  ;;  %v7787_v31 = vld [vmem:[#allocation10 + $0x6c] sm:$0xf] }
 0x750   :  { %v3374_v49 = vpop.f32.mrf.mxu0  ;;  %v3387_v50 = vpop.f32.mrf.mxu1  ;;  %v6721_v40 = vor.u32 %v7787_v31, %v6718_v37  ;;  %v7776_v31 = vld [vmem:[#allocation10 + $0x14] sm:$0xf]  ;;  %v6677_v37 = vor.u32 %v7779_v13, %v6676_v32  ;;  %v7867_v32 = vld [vmem:[#allocation9 + $0x168] sm:$0xff]  ;;  %v7858_v13 = vld [vmem:[#allocation9 + $0x120] sm:$0xff] }
 0x751   :  { %v3375_v51 = vadd.f32 %v3374_v49, %v3362_v27  ;;  %3723 = vmatpush.bf16.msra.mxu3 %v6689_v1  ;;  %v6773_v1 = vor.u32 %v7803_v61, %v6772_v59  ;;  %v7825_v59 = vld [vmem:[#allocation9 + $0x18] sm:$0xff] }
 0x752   :  { %v7833_v61 = vld [vmem:[#allocation9 + $0x58] sm:$0xff] }
 0x753   :  { %v8431_v62 = vadd.f32 %v3387_v50, %v3375_v51  ;;  %3708 = vmatpush.bf16.msra.mxu2 %v6733_v6  ;;  %v6788_v51 = vld [vmem:[#allocation10 + $0xf8] sm:$0xf]  ;;  %v6821_v6 = vor.u32 %v7815_v5, %v6820_v39 }
 0x755   :  { %3391 = vmax.xlane.f32.xlu2 %v8431_v62  ;;  %3724 = vmatpush.bf16.msra.mxu3 %v6665_v46  ;;  %v7788_v46 = vld [vmem:[#allocation10 + $0x74] sm:$0xf] }
 0x757   :  { %3709 = vmatpush.bf16.msra.mxu2 %v6709_v22  ;;  %v7781_v22 = vld [vmem:[#allocation10 + $0x3c] sm:$0xf] }
 0x758   :  { %v3376_v53 = vpop.f32.mrf.mxu0  ;;  %v3389_v29 = vpop.f32.mrf.mxu1 }
 0x759   :  { %v7808_v53 = vld [vmem:[#allocation10 + $0x10c] sm:$0xf0]  ;;  %v7805_v29 = vld [vmem:[#allocation10 + $0xfc] sm:$0xf]  ;;  %3769 = vmatpush.bf16.msrb.mxu3 %v6849_v21  ;;  %v6705_v21 = vor.u32 %v7782_v7, %v6702_v18 }
 0x75a   :  { %v6789_v57 = vor.u32 %v7808_v53, %v6788_v51  ;;  %v6793_v2 = vor.u32 %v7805_v29, %v6790_v34  ;;  %v6697_v51 = vor.u32 %v7781_v22, %v6694_v48  ;;  %v7806_v29 = vld [vmem:[#allocation10 + $0x104] sm:$0xf]  ;;  %v7860_v7 = vld [vmem:[#allocation9 + $0x130] sm:$0xff] }
 0x75b   :  { %v7868_v18 = vld [vmem:[#allocation9 + $0x170] sm:$0xff] }
 0x75c   :  { %3732 = vmatpush.bf16.msrb.mxu0 %v6789_v57  ;;  %3745 = vmatpush.bf16.msrb.mxu1 %v6793_v2  ;;  %v6798_v57 = vld [vmem:[#allocation10 + $0x118] sm:$0xf0]  ;;  %v6668_v2 = vld [vmem:[#allocation10 + $0x8] sm:$0xf] }
 0x75d   :  { %3770 = vmatpush.bf16.msrb.mxu3 %v6825_v42  ;;  %v6801_v34 = vor.u32 %v7806_v29, %v6798_v57  ;;  %v7828_v42 = vld [vmem:[#allocation9 + $0x30] sm:$0xff] }
 0x760   :  { %3733 = vmatpush.bf16.msrb.mxu0 %v6765_v4  ;;  %3746 = vmatpush.bf16.msrb.mxu1 %v6769_v8  ;;  %v7800_v4 = vld [vmem:[#allocation10 + $0xd4] sm:$0xf]  ;;  %v6748_v8 = vld [vmem:[#allocation10 + $0xa0] sm:$0xf] }
 0x761   :  { %3771 = vmatpush.bf16.msrb.mxu3 %v6801_v34  ;;  %v6777_v47 = vor.u32 %v7800_v4, %v6774_v35  ;;  %v6749_v11 = vor.u32 %v7797_v24, %v6748_v8  ;;  %v7826_v34 = vld [vmem:[#allocation9 + $0x20] sm:$0xff]  ;;  %v7832_v4 = vld [vmem:[#allocation9 + $0x50] sm:$0xff]  ;;  %v7843_v35 = vld [vmem:[#allocation9 + $0xa8] sm:$0xff] }
 0x762   :  { %v7823_v8 = vld [vmem:[#allocation9 + $0x8] sm:$0xff] }
 0x763   :  { %v7831_v24 = vld [vmem:[#allocation9 + $0x48] sm:$0xff] }
 0x764   :  { %3734 = vmatpush.bf16.msrb.mxu0 %v6741_v26  ;;  %3747 = vmatpush.bf16.msrb.mxu1 %v6745_v17  ;;  %v6726_v26 = vld [vmem:[#allocation10 + $0x88] sm:$0xf0]  ;;  %v7785_v17 = vld [vmem:[#allocation10 + $0x54] sm:$0xf0] }
 0x765   :  { %3772 = vmatpush.bf16.msrb.mxu3 %v6777_v47  ;;  %v6729_v9 = vor.u32 %v7788_v46, %v6726_v26  ;;  %v7851_v47 = vld [vmem:[#allocation9 + $0xe8] sm:$0xff]  ;;  %v7822_v46 = vld [vmem:[#allocation9] sm:$0xff] }
 0x766   :  { %v7830_v26 = vld [vmem:[#allocation9 + $0x40] sm:$0xff] }
 0x768   :  { %3735 = vmatpush.bf16.msrb.mxu0 %v6717_v36  ;;  %3748 = vmatpush.bf16.msrb.mxu1 %v6721_v40  ;;  %v6678_v36 = vld [vmem:[#allocation10 + $0x28] sm:$0xf0] }
 0x769   :  { %v6681_v39 = vor.u32 %v7776_v31, %v6678_v36  ;;  %v7866_v31 = vld [vmem:[#allocation9 + $0x160] sm:$0xff]  ;;  %v7857_v36 = vld [vmem:[#allocation9 + $0x118] sm:$0xff] }
 0x76c   :  { %3749 = vmatpush.bf16.msrb.mxu1 %v6697_v51 }
 0x7c8   :  { %v3392_v25 = vpop.xlane.xlu2 %3391 }
 0x7c9   :  { %v3393_v27 = vsub.f32 %v8431_v62, %v3392_v25  ;;  %v6685_v62 = vor.u32 %v7783_v58, %v6684_v14  ;;  %v6693_v25 = vor.u32 %v7784_v45, %v6692_v44  ;;  %v7778_v14 = vld [vmem:[#allocation10 + $0x1c] sm:$0xf0]  ;;  %v7775_v58 = vld [vmem:[#allocation10 + $0xc] sm:$0xf]  ;;  %v7836_v44 = vld [vmem:[#allocation9 + $0x70] sm:$0xff] }
 0x7ca   :  { %v6669_v3 = vor.u32 %v7778_v14, %v6668_v2  ;;  %v7834_v2 = vld [vmem:[#allocation9 + $0x60] sm:$0xff] }
 0x7cb   :  { %v3394_v49 = vmul.f32 1.442695, %v3393_v27  ;;  %3710 = vmatpush.bf16.msra.mxu2 %v6685_v62  ;;  %v6796_v27 = vld [vmem:[#allocation10 + $0x100] sm:$0xf]  ;;  %3736 = vmatpush.bf16.msrb.mxu0 %v6693_v25  ;;  %v6670_v62 = vld [vmem:[#allocation10 + $0x20] sm:$0xf0] }
 0x7cc   :  { %v6673_v63 = vor.u32 %v7775_v58, %v6670_v62  ;;  %v7853_v62 = vld [vmem:[#allocation9 + $0xf8] sm:$0xff] }
 0x7cd   :  { %7994 = vpow2.f32 %v3394_v49  ;;  %v7809_v49 = vld [vmem:[#allocation10 + $0x114] sm:$0xf0] }
 0x7ce   :  { %v6797_v53 = vor.u32 %v7809_v49, %v6796_v27  ;;  %3750 = vmatpush.bf16.msrb.mxu1 %v6673_v63  ;;  %v7827_v27 = vld [vmem:[#allocation9 + $0x28] sm:$0xff]  ;;  %v7852_v63 = vld [vmem:[#allocation9 + $0xf0] sm:$0xff] }
 0x7cf   :  { %3711 = vmatpush.bf16.msra.mxu2 %v6661_v12  ;;  %3737 = vmatpush.bf16.msrb.mxu0 %v6669_v3  ;;  %v6750_v12 = vld [vmem:[#allocation10 + $0xb8] sm:$0xf0]  ;;  %v7835_v49 = vld [vmem:[#allocation9 + $0x68] sm:$0xff] }
 0x7d0   :  { %v6753_v52 = vor.u32 %v7794_v10, %v6750_v12  ;;  %v7845_v3 = vld [vmem:[#allocation9 + $0xb8] sm:$0xff]  ;;  %v7842_v10 = vld [vmem:[#allocation9 + $0xa0] sm:$0xff] }
 0x7d1   :  { %v7841_v12 = vld [vmem:[#allocation9 + $0x98] sm:$0xff] }
 0x7d2   :  { %3773 = vmatpush.bf16.msrb.mxu3 %v6753_v52  ;;  %4257 = vmatpush.bf16.msra.mxu1 %v7837_v23  ;;  %v7849_v52 = vld [vmem:[#allocation9 + $0xd8] sm:$0xff]  ;;  %v3802_v23 = vld [vmem:[#allocation4 + $0x10] sm:$0xff] }
 0x7d3   :  { %v8435_v50 = vpop.eup %7994  ;;  %3756 = vmatpush.bf16.msrb.mxu2 %v6845_v20  ;;  %v6701_v20 = vor.u32 %v7785_v17, %v6700_v28  ;;  %v7839_v28 = vld [vmem:[#allocation9 + $0x88] sm:$0xff] }
 0x7d4   :  { %3396 = vadd.xlane.f32.xlu0 %v8435_v50  ;;  %v7847_v17 = vld [vmem:[#allocation9 + $0xc8] sm:$0xff] }
 0x7d6   :  { %3774 = vmatpush.bf16.msrb.mxu3 %v6729_v9  ;;  %4258 = vmatpush.bf16.msra.mxu1 %v7836_v44  ;;  %v7869_v9 = vld [vmem:[#allocation9 + $0x178] sm:$0xff]  ;;  %v7854_v44 = vld [vmem:[#allocation9 + $0x100] sm:$0xff] }
 0x7d7   :  { %3757 = vmatpush.bf16.msrb.mxu2 %v6821_v6  ;;  %v7829_v6 = vld [vmem:[#allocation9 + $0x38] sm:$0xff] }
 0x7d8   :  { %4244 = vmatpush.bf16.msra.mxu0 %v7829_v6  ;;  %v7863_v6 = vld [vmem:[#allocation9 + $0x148] sm:$0xff] }
 0x7da   :  { %3775 = vmatpush.bf16.msrb.mxu3 %v6705_v21  ;;  %4259 = vmatpush.bf16.msra.mxu1 %v7835_v49  ;;  %v7859_v21 = vld [vmem:[#allocation9 + $0x128] sm:$0xff] }
 0x7db   :  { %3758 = vmatpush.bf16.msrb.mxu2 %v6797_v53  ;;  %v3801_v49 = vld [vmem:[#allocation4 + $0x8] sm:$0xff] }
 0x7dc   :  { %4245 = vmatpush.bf16.msra.mxu0 %v7828_v42  ;;  %v6852_v42 = vadd.f32 -0.03137255, %v3802_v23 }
 0x7de   :  { %3776 = vmatpush.bf16.msrb.mxu3 %v6681_v39  ;;  %4260 = vmatpush.bf16.msra.mxu1 %v7834_v2  ;;  %v7856_v39 = vld [vmem:[#allocation9 + $0x110] sm:$0xff] }
 0x7df   :  { %3759 = vmatpush.bf16.msrb.mxu2 %v6773_v1  ;;  %v7824_v1 = vld [vmem:[#allocation9 + $0x10] sm:$0xff] }
 0x7e0   :  { %4246 = vmatpush.bf16.msra.mxu0 %v7827_v27 }
 0x7e2   :  { %4261 = vmatpush.bf16.msra.mxu1 %v7833_v61 }
 0x7e3   :  { %3760 = vmatpush.bf16.msrb.mxu2 %v6749_v11  ;;  %v7850_v11 = vld [vmem:[#allocation9 + $0xe0] sm:$0xff] }
 0x7e4   :  { %4247 = vmatpush.bf16.msra.mxu0 %v7826_v34 }
 0x7e6   :  { %4262 = vmatpush.bf16.msra.mxu1 %v7832_v4 }
 0x7e7   :  { %3761 = vmatpush.bf16.msrb.mxu2 %v6725_v16  ;;  %v7861_v16 = vld [vmem:[#allocation9 + $0x138] sm:$0xff] }
 0x7e8   :  { %4248 = vmatpush.bf16.msra.mxu0 %v7825_v59 }
 0x7ea   :  { %4263 = vmatpush.bf16.msra.mxu1 %v7831_v24 }
 0x7eb   :  { %3762 = vmatpush.bf16.msrb.mxu2 %v6701_v20  ;;  %v7846_v20 = vld [vmem:[#allocation9 + $0xc0] sm:$0xff] }
 0x7ec   :  { %4249 = vmatpush.bf16.msra.mxu0 %v7824_v1 }
 0x7ee   :  { %4264 = vmatpush.bf16.msra.mxu1 %v7830_v26 }
 0x7ef   :  { %3763 = vmatpush.bf16.msrb.mxu2 %v6677_v37  ;;  %v7865_v37 = vld [vmem:[#allocation9 + $0x158] sm:$0xff] }
 0x7f0   :  { %4250 = vmatpush.bf16.msra.mxu0 %v7823_v8 }
 0x7f4   :  { %4251 = vmatpush.bf16.msra.mxu0 %v7822_v46 }
 0x847   :  { %v3397_v19 = vpop.xlane.xlu0 %3396 }
 0x848   :  { %7996 = vrcp.f32 %v3397_v19  ;;  %v3409_v45 = vand.u32 2147483648, %v3397_v19  ;;  %v3407_v25 = vand.u32 2147483647, %v3397_v19  ;;  %vm3403_vm0 = vweird.f32 %v3397_v19 }
 0x84a   :  { %v3410_v51 = vor.u32 1.1754944e-38, %v3409_v45  ;;  %vm3408_vm2 = vcmp.eq.f32.partialorder %v3407_v25, 8.507059e+37  ;;  %v7862_v45 = vld [vmem:[#allocation9 + $0x140] sm:$0xff] }
 0x84b   :  { %v3800_v25 = vld [vmem:[#allocation4] sm:$0xff] }
 0x84c   :  { %v6850_v34 = vadd.f32 -0.03137255, %v3800_v25 }
 0x84e   :  { %v7997_v5 = vpop.eup %7996  ;;  %v3812_v8 = vmax.f32 %v6850_v34, 0.0 }
 0x84f   :  { %v3399_v40 = vmul.f32 %v7997_v5, %v3397_v19  ;;  %vm3404_vm15 = vweird.f32 %v7997_v5  ;;  %v7838_v19 = vld [vmem:[#allocation9 + $0x80] sm:$0xff] }
 0x850   :  { %vm3405_vm1 = vmor %vm3403_vm0, %vm3404_vm15 }
 0x851   :  { %v3400_v41 = vsub.f32 1.0, %v3399_v40  ;;  %v7855_v40 = vld [vmem:[#allocation9 + $0x108] sm:$0xff] }
 0x853   :  { %v3401_v22 = vmul.f32 %v7997_v5, %v3400_v41  ;;  %v3803_v41 = vld [vmem:[#allocation4 + $0x18] sm:$0xff] }
 0x854   :  { %v3821_v27 = vadd.f32 0.03137255, %v3803_v41 }
 0x855   :  { %v3402_v48 = vadd.f32 %v7997_v5, %v3401_v22  ;;  %v6853_v22 = vadd.f32 -0.03137255, %v3803_v41 }
 0x856   :  { %v3827_v61 = vmin.f32 %v3821_v27, 1.0 }
 0x857   :  { %v3406_v53 = vsel %vm3405_vm1, %v7997_v5, %v3402_v48  ;;  %v7864_v5 = vld [vmem:[#allocation9 + $0x150] sm:$0xff]  ;;  %v3820_v48 = vadd.f32 0.03137255, %v3802_v23 }
 0x858   :  { %v3411_v29 = vsel %vm3408_vm2, %v3410_v51, %v3406_v53  ;;  %v3814_v53 = vmax.f32 %v6852_v42, 0.0 }
 0x859   :  { %v3412_v57 = vmul.f32 %v8435_v50, %v3411_v29  ;;  %v7844_v50 = vld [vmem:[#allocation9 + $0xb0] sm:$0xff] }
 0x85b   :  { %v3414_v14 = vsub.f32 %v3412_v57, %v8281_v54  ;;  %v3815_v57 = vmax.f32 %v6853_v22, 0.0 }
 0x85d   :  { %v3415_v58 = vpack.c.bf16 %v3414_v14, %v3414_v14 }
 0x85f   :  { %3712 = vmatmul.bf16.vlgmr.msra.gmra.mxu2 %v3415_v58  ;;  %3725 = vmatmul.bf16.vlgmr.msra.gmra.mxu3 %v3415_v58 }
 0x860   :  { %3738 = vmatmul.bf16.vlgmr.msrb.gmra.mxu0 %v3415_v58  ;;  %3751 = vmatmul.bf16.vlgmr.msrb.gmra.mxu1 %v3415_v58 }
 0x861   :  { %4270 = vmatpush.bf16.msra.mxu2 %v7845_v3  ;;  %4283 = vmatpush.bf16.msra.mxu3 %v7853_v62  ;;  %v3826_v62 = vmin.f32 %v3820_v48, 1.0 }
 0x862   :  { %4296 = vmatpush.bf16.msrb.mxu0 %v7861_v16  ;;  %4309 = vmatpush.bf16.msrb.mxu1 %v7869_v9 }
 0x865   :  { %4271 = vmatpush.bf16.msra.mxu2 %v7844_v50  ;;  %4284 = vmatpush.bf16.msra.mxu3 %v7852_v63  ;;  %v3818_v50 = vadd.f32 0.03137255, %v3800_v25  ;;  %v3819_v63 = vadd.f32 0.03137255, %v3801_v49 }
 0x866   :  { %4297 = vmatpush.bf16.msrb.mxu0 %v7860_v7  ;;  %4310 = vmatpush.bf16.msrb.mxu1 %v7868_v18 }
 0x869   :  { %4272 = vmatpush.bf16.msra.mxu2 %v7843_v35  ;;  %4285 = vmatpush.bf16.msra.mxu3 %v7851_v47 }
 0x86a   :  { %4298 = vmatpush.bf16.msrb.mxu0 %v7859_v21  ;;  %4311 = vmatpush.bf16.msrb.mxu1 %v7867_v32  ;;  %v3804_v21 = vld [vmem:[#allocation4 + $0x20] sm:$0xff]  ;;  %v3805_v32 = vld [vmem:[#allocation4 + $0x28] sm:$0xff] }
 0x86d   :  { %4273 = vmatpush.bf16.msra.mxu2 %v7842_v10  ;;  %4286 = vmatpush.bf16.msra.mxu3 %v7850_v11 }
 0x86e   :  { %4299 = vmatpush.bf16.msrb.mxu0 %v7858_v13  ;;  %4312 = vmatpush.bf16.msrb.mxu1 %v7866_v31  ;;  %v6854_v13 = vadd.f32 -0.03137255, %v3804_v21  ;;  %v6855_v31 = vadd.f32 -0.03137255, %v3805_v32 }
 0x86f   :  { %3764 = vmatmul.bf16.vlgmr.msrb.gmra.mxu2 %v3415_v58  ;;  %3777 = vmatmul.bf16.vlgmr.msrb.gmra.mxu3 %v3415_v58  ;;  %v6851_v58 = vadd.f32 -0.03137255, %v3801_v49 }
 0x871   :  { %4274 = vmatpush.bf16.msra.mxu2 %v7841_v12  ;;  %4287 = vmatpush.bf16.msra.mxu3 %v7849_v52  ;;  %v3813_v24 = vmax.f32 %v6851_v58, 0.0  ;;  %v3824_v52 = vmin.f32 %v3818_v50, 1.0 }
 0x872   :  { %4300 = vmatpush.bf16.msrb.mxu0 %v7857_v36  ;;  %4313 = vmatpush.bf16.msrb.mxu1 %v7865_v37  ;;  %v3822_v36 = vadd.f32 0.03137255, %v3804_v21  ;;  %v3823_v37 = vadd.f32 0.03137255, %v3805_v32  ;;  %v7172_v21 = vld [vmem:[#allocation10 + $0x108] sm:$0xf0] }
 0x873   :  { %v7226_v32 = vld [vmem:[#allocation10 + $0x158] sm:$0xf] }
 0x874   :  { %v3829_v22 = vmin.f32 %v3823_v37, 1.0  ;;  %v7228_v37 = vld [vmem:[#allocation10 + $0x170] sm:$0xf0] }
 0x875   :  { %4275 = vmatpush.bf16.msra.mxu2 %v7840_v43  ;;  %4288 = vmatpush.bf16.msra.mxu3 %v7848_v0  ;;  %v3825_v0 = vmin.f32 %v3819_v63, 1.0 }
 0x876   :  { %4301 = vmatpush.bf16.msrb.mxu0 %v7856_v39  ;;  %4314 = vmatpush.bf16.msrb.mxu1 %v7864_v5 }
 0x879   :  { %4276 = vmatpush.bf16.msra.mxu2 %v7839_v28  ;;  %4289 = vmatpush.bf16.msra.mxu3 %v7847_v17 }
 0x87a   :  { %4302 = vmatpush.bf16.msrb.mxu0 %v7855_v40  ;;  %4315 = vmatpush.bf16.msrb.mxu1 %v7863_v6  ;;  %v3816_v40 = vmax.f32 %v6854_v13, 0.0  ;;  %v3817_v6 = vmax.f32 %v6855_v31, 0.0  ;;  %v7916_v13 = vld [vmem:[#allocation10 + $0x16c] sm:$0xf0] }
 0x87b   :  { %v7227_v31 = vor.u32 %v7916_v13, %v7226_v32  ;;  %v7873_v32 = vld [vmem:[#allocation10 + $0x14] sm:$0xf0]  ;;  %v7870_v13 = vld [vmem:[#allocation10 + $0x4] sm:$0xf] }
 0x87d   :  { %4277 = vmatpush.bf16.msra.mxu2 %v7838_v19  ;;  %4290 = vmatpush.bf16.msra.mxu3 %v7846_v20 }
 0x87e   :  { %4303 = vmatpush.bf16.msrb.mxu0 %v7854_v44  ;;  %4316 = vmatpush.bf16.msrb.mxu1 %v7862_v45  ;;  %v3828_v44 = vmin.f32 %v3822_v36, 1.0  ;;  %v7913_v36 = vld [vmem:[#allocation10 + $0x15c] sm:$0xf] }
 0x8dd   :  { %v3739_v51 = vpop.f32.mrf.mxu0  ;;  %v3752_v29 = vpop.f32.mrf.mxu1 }
 0x8de   :  { %vm3784_vm3 = vcmp.ge.f32.partialorder %v3739_v51, 0.0  ;;  %vm3785_vm4 = vcmp.ge.f32.partialorder %v3752_v29, 0.0 }
 0x8df   :  { %v3790_v2 = vsel %vm3784_vm3, 0.007843138, %v8168_v60  ;;  %v3791_v14 = vsel %vm3785_vm4, 0.007843138, %v8168_v60 }
 0x8e0   :  { %v3796_v3 = vadd.f32 %v3790_v2, %v8398_v55  ;;  %v3797_v59 = vadd.f32 %v3791_v14, %v8400_v56  ;;  %v8479_v14 = vld [vmem:[%s8515_s5] ss:$0 sm:$0xff]  ;;  %s8169_s5 = smov [#allocation13]  }
 0x8e1   :  { %s5276_s28 = sshll.u32 %s8169_s5, 4  ;;  %s5277_s28 = int_to_ptr.vmem [resolvable:$true] %s5276_s28 }
 0x8e2   :  { %v3832_v1 = vmax.f32 %v3796_v3, %v3814_v53  ;;  %v3833_v4 = vmax.f32 %v3797_v59, %v3815_v57  ;;  %v3713_v35 = vpop.f32.mrf.mxu2  ;;  %v3726_v47 = vpop.f32.mrf.mxu3 }
 0x8e3   :  { %vm3782_vm5 = vcmp.ge.f32.partialorder %v3713_v35, 0.0  ;;  %vm3783_vm6 = vcmp.ge.f32.partialorder %v3726_v47, 0.0 }
 0x8e4   :  { %v8444_v10 = vmin.f32 %v3832_v1, %v3826_v62  ;;  %v8446_v11 = vmin.f32 %v3833_v4, %v3827_v61  ;;  %v3788_v55 = vsel %vm3782_vm5, 0.007843138, %v8168_v60  ;;  %v3789_v12 = vsel %vm3783_vm6, 0.007843138, %v8168_v60 }
 0x8e5   :  { %v3794_v56 = vadd.f32 %v3788_v55, %v8410_v38  ;;  %v3795_v43 = vadd.f32 %v3789_v12, %v8412_v33  ;;  %v3741_v46 = vpop.f32.mrf.mxu0  ;;  %v3754_v26 = vpop.f32.mrf.mxu1  ;;  %v7218_v12 = vld [vmem:[#allocation10 + $0x150] sm:$0xf] }
 0x8e6   :  { %v3856_v16 = vpack.c.bf16 %v8444_v10, %v8444_v10  ;;  %v3857_v9 = vpack.c.bf16 %v8446_v11, %v8446_v11  ;;  %v7194_v46 = vld [vmem:[#allocation10 + $0x120] sm:$0xf]  ;;  %v7909_v26 = vld [vmem:[#allocation10 + $0x134] sm:$0xf0] }
 0x8e7   :  { %v3830_v28 = vmax.f32 %v3794_v56, %v3812_v8  ;;  %v3831_v17 = vmax.f32 %v3795_v43, %v3813_v24  ;;  %v7915_v56 = vld [vmem:[#allocation10 + $0x164] sm:$0xf0] }
 0x8e8   :  { %4278 = vmatmul.bf16.vlgmr.msra.gmra.mxu2 %v3856_v16  ;;  %4291 = vmatmul.bf16.vlgmr.msra.gmra.mxu3 %v3857_v9  ;;  %v7219_v43 = vor.u32 %v7915_v56, %v7218_v12  ;;  %v7906_v9 = vld [vmem:[#allocation10 + $0x124] sm:$0xf]  ;;  %v7901_v12 = vld [vmem:[#allocation10 + $0xfc] sm:$0xf] }
 0x8e9   :  { %v8456_v7 = vmin.f32 %v3830_v28, %v3824_v52  ;;  %v8458_v18 = vmin.f32 %v3831_v17, %v3825_v0  ;;  %v7912_v52 = vld [vmem:[#allocation10 + $0x154] sm:$0xf]  ;;  %v7220_v0 = vld [vmem:[#allocation10 + $0x168] sm:$0xf0]  ;;  %v7196_v28 = vld [vmem:[#allocation10 + $0x138] sm:$0xf0]  ;;  %v7195_v17 = vor.u32 %v7909_v26, %v7194_v46 }
 0x8ea   :  { %v3715_v38 = vpop.f32.mrf.mxu2  ;;  %v3728_v19 = vpop.f32.mrf.mxu3  ;;  %v7223_v16 = vor.u32 %v7912_v52, %v7220_v0  ;;  %4635 = vmatpush.bf16.msrb.mxu2 %v7219_v43  ;;  %v7180_v52 = vld [vmem:[#allocation10 + $0x110] sm:$0xf0]  ;;  %v7074_v0 = vld [vmem:[#allocation10 + $0x30] sm:$0xf]  ;;  %v7879_v46 = vld [vmem:[#allocation10 + $0x44] sm:$0xf0] }
 0x8eb   :  { %v3854_v33 = vpack.c.bf16 %v8456_v7, %v8456_v7  ;;  %v3855_v20 = vpack.c.bf16 %v8458_v18, %v8458_v18  ;;  %v7199_v38 = vor.u32 %v7906_v9, %v7196_v28  ;;  %v7170_v19 = vld [vmem:[#allocation10 + $0xf0] sm:$0xf]  ;;  %v7183_v43 = vor.u32 %v7901_v12, %v7180_v52  ;;  %v7876_v26 = vld [vmem:[#allocation10 + $0x34] sm:$0xf]  ;;  %v7154_v9 = vld [vmem:[#allocation10 + $0xc8] sm:$0xf] }
 0x8ec   :  { %4648 = vmatpush.bf16.msrb.mxu3 %v7223_v16  ;;  %v7076_v16 = vld [vmem:[#allocation10 + $0x48] sm:$0xf0]  ;;  %v7898_v28 = vld [vmem:[#allocation10 + $0xdc] sm:$0xf0]  ;;  %v7188_v52 = vld [vmem:[#allocation10 + $0x118] sm:$0xf0] }
 0x8ed   :  { %4252 = vmatmul.bf16.vlgmr.msra.gmra.mxu0 %v3854_v33  ;;  %4265 = vmatmul.bf16.vlgmr.msra.gmra.mxu1 %v3855_v20  ;;  %v7903_v33 = vld [vmem:[#allocation10 + $0x104] sm:$0xf0]  ;;  %v7900_v20 = vld [vmem:[#allocation10 + $0xf4] sm:$0xf] }
 0x8ee   :  { %4636 = vmatpush.bf16.msrb.mxu2 %v7195_v17  ;;  %4661 = vmatpush.bf16.msra.mxu0 %v7227_v31  ;;  %v7079_v17 = vor.u32 %v7876_v26, %v7076_v16  ;;  %v7871_v26 = vld [vmem:[#allocation10 + $0xc] sm:$0xf]  ;;  %v7060_v16 = vld [vmem:[#allocation10 + $0x20] sm:$0xf0] }
 0x8f0   :  { %4649 = vmatpush.bf16.msrb.mxu3 %v7199_v38  ;;  %v7155_v38 = vor.u32 %v7898_v28, %v7154_v9  ;;  %v7162_v9 = vld [vmem:[#allocation10 + $0xd0] sm:$0xf]  ;;  %v7899_v28 = vld [vmem:[#allocation10 + $0xe4] sm:$0xf0] }
 0x8f2   :  { %v3765_v39 = vpop.f32.mrf.mxu2  ;;  %v3778_v5 = vpop.f32.mrf.mxu3 }
 0x8f3   :  { %vm3786_vm7 = vcmp.ge.f32.partialorder %v3765_v39, 0.0  ;;  %vm3787_vm8 = vcmp.ge.f32.partialorder %v3778_v5, 0.0  ;;  %v7171_v39 = vor.u32 %v7903_v33, %v7170_v19  ;;  %v7146_v5 = vld [vmem:[#allocation10 + $0xc0] sm:$0xf]  ;;  %v7895_v19 = vld [vmem:[#allocation10 + $0xcc] sm:$0xf] }
 0x8f4   :  { %v3792_v23 = vsel %vm3786_vm7, 0.007843138, %v8168_v60  ;;  %v3793_v41 = vsel %vm3787_vm8, 0.007843138, %v8168_v60  ;;  %v7156_v33 = vld [vmem:[#allocation10 + $0xe0] sm:$0xf0] }
 0x8f5   :  { %v3798_v42 = vadd.f32 %v3792_v23, %v8422_v30  ;;  %v3799_v45 = vadd.f32 %v3793_v41, %v8424_v15  ;;  %v7175_v23 = vor.u32 %v7900_v20, %v7172_v21  ;;  %v7202_v41 = vld [vmem:[#allocation10 + $0x128] sm:$0xf]  ;;  %4637 = vmatpush.bf16.msrb.mxu2 %v7171_v39  ;;  %v7159_v20 = vor.u32 %v7895_v19, %v7156_v33  ;;  %v7050_v21 = vld [vmem:[#allocation10] sm:$0xf]  ;;  %v7892_v39 = vld [vmem:[#allocation10 + $0xac] sm:$0xf0] }
 0x8f6   :  { %v7051_v31 = vor.u32 %v7873_v32, %v7050_v21  ;;  %v7896_v19 = vld [vmem:[#allocation10 + $0xd4] sm:$0xf]  ;;  %v7164_v33 = vld [vmem:[#allocation10 + $0xe8] sm:$0xf0]  ;;  %v7138_v21 = vld [vmem:[#allocation10 + $0xa0] sm:$0xf] }
 0x8f7   :  { %v3834_v25 = vmax.f32 %v3798_v42, %v3816_v40  ;;  %v3835_v48 = vmax.f32 %v3799_v45, %v3817_v6  ;;  %v7897_v40 = vld [vmem:[#allocation10 + $0xd4] sm:$0xf0]  ;;  %v7231_v6 = vor.u32 %v7913_v36, %v7228_v37  ;;  %v7910_v42 = vld [vmem:[#allocation10 + $0x13c] sm:$0xf0]  ;;  %v7894_v45 = vld [vmem:[#allocation10 + $0xc4] sm:$0xf]  ;;  %4650 = vmatpush.bf16.msrb.mxu3 %v7175_v23 }
 0x8f8   :  { %v7052_v36 = vld [vmem:[#allocation10 + $0x18] sm:$0xf0]  ;;  %v7130_v37 = vld [vmem:[#allocation10 + $0x98] sm:$0xf]  ;;  %v7132_v23 = vld [vmem:[#allocation10 + $0xb0] sm:$0xf0] }
 0x8f9   :  { %v8468_v27 = vmin.f32 %v3834_v25, %v3828_v44  ;;  %v8470_v49 = vmin.f32 %v3835_v48, %v3829_v22  ;;  %v7907_v44 = vld [vmem:[#allocation10 + $0x12c] sm:$0xf]  ;;  %v7148_v22 = vld [vmem:[#allocation10 + $0xd8] sm:$0xf0]  ;;  %4674 = vmatpush.bf16.msra.mxu1 %v7231_v6  ;;  %v7203_v25 = vor.u32 %v7910_v42, %v7202_v41  ;;  %v7204_v48 = vld [vmem:[#allocation10 + $0x140] sm:$0xf0] }
 0x8fa   :  { %v3767_v51 = vpop.f32.mrf.mxu2  ;;  %v3780_v53 = vpop.f32.mrf.mxu3  ;;  %v7889_v6 = vld [vmem:[#allocation10 + $0x9c] sm:$0xf]  ;;  %v7234_v41 = vld [vmem:[#allocation10 + $0x160] sm:$0xf]  ;;  %v7893_v32 = vld [vmem:[#allocation10 + $0xb4] sm:$0xf0] }
 0x8fb   :  { %v3858_v29 = vpack.c.bf16 %v8468_v27, %v8468_v27  ;;  %v3859_v57 = vpack.c.bf16 %v8470_v49, %v8470_v49  ;;  %v7207_v51 = vor.u32 %v7907_v44, %v7204_v48  ;;  %v7147_v53 = vor.u32 %v7897_v40, %v7146_v5  ;;  %4662 = vmatpush.bf16.msra.mxu0 %v7203_v25  ;;  %v7917_v44 = vld [vmem:[#allocation10 + $0x174] sm:$0xf0] }
 0x8fc   :  { %v7055_v5 = vor.u32 %v7870_v13, %v7052_v36  ;;  %v7131_v40 = vor.u32 %v7892_v39, %v7130_v37  ;;  %v7135_v42 = vor.u32 %v7889_v6, %v7132_v23  ;;  %v7235_v25 = vor.u32 %v7917_v44, %v7234_v41  ;;  %v7890_v13 = vld [vmem:[#allocation10 + $0xa4] sm:$0xf]  ;;  %v7140_v36 = vld [vmem:[#allocation10 + $0xb8] sm:$0xf0]  ;;  %v7114_v39 = vld [vmem:[#allocation10 + $0x70] sm:$0xf] }
 0x8fd   :  { %4304 = vmatmul.bf16.vlgmr.msrb.gmra.mxu0 %v3858_v29  ;;  %4317 = vmatmul.bf16.vlgmr.msrb.gmra.mxu1 %v3859_v57  ;;  %v7151_v29 = vor.u32 %v7894_v45, %v7148_v22  ;;  %v7122_v57 = vld [vmem:[#allocation10 + $0x90] sm:$0xf]  ;;  %v7914_v45 = vld [vmem:[#allocation10 + $0x164] sm:$0xf]  ;;  %v7236_v22 = vld [vmem:[#allocation10 + $0x178] sm:$0xf0]  ;;  %v7143_v37 = vor.u32 %v7890_v13, %v7140_v36 }
 0x8fe   :  { %4675 = vmatpush.bf16.msra.mxu1 %v7207_v51  ;;  %4638 = vmatpush.bf16.msrb.mxu2 %v7147_v53  ;;  %v7239_v48 = vor.u32 %v7914_v45, %v7236_v22  ;;  %v7106_v51 = vld [vmem:[#allocation10 + $0x68] sm:$0xf]  ;;  %v7886_v53 = vld [vmem:[#allocation10 + $0x7c] sm:$0xf0]  ;;  %v7116_v6 = vld [vmem:[#allocation10 + $0x88] sm:$0xf0] }
 0x8ff   :  { %4651 = vmatpush.bf16.msrb.mxu3 %v7151_v29  ;;  %v7883_v29 = vld [vmem:[#allocation10 + $0x6c] sm:$0xf]  ;;  %v7881_v44 = vld [vmem:[#allocation10 + $0x54] sm:$0xf0]  ;;  %v7878_v45 = vld [vmem:[#allocation10 + $0x44] sm:$0xf] }
 0x900   :  { %v7092_v22 = vld [vmem:[#allocation10 + $0x58] sm:$0xf0]  ;;  %v7938_v13 = vld [vmem:[#allocation9 + $0xa0] sm:$0xff] }
 0x901   :  { %v7937_v36 = vld [vmem:[#allocation9 + $0x98] sm:$0xff] }
 0x902   :  { %4676 = vmatpush.bf16.msra.mxu1 %v7183_v43 }
 0x906   :  { %4677 = vmatpush.bf16.msra.mxu1 %v7159_v20  ;;  %v7167_v20 = vor.u32 %v7896_v19, %v7164_v33  ;;  %v7920_v19 = vld [vmem:[#allocation9 + $0x10] sm:$0xff] }
 0x907   :  { %v7928_v33 = vld [vmem:[#allocation9 + $0x50] sm:$0xff] }
 0x90a   :  { %4678 = vmatpush.bf16.msra.mxu1 %v7135_v42  ;;  %v7090_v42 = vld [vmem:[#allocation10 + $0x40] sm:$0xf] }
 0x96a   :  { %v4253_v30 = vpop.f32.mrf.mxu0  ;;  %v4266_v34 = vpop.f32.mrf.mxu1 }
 0x96b   :  { %v4279_v15 = vpop.f32.mrf.mxu2  ;;  %v4292_v2 = vpop.f32.mrf.mxu3  ;;  %v4254_v58 = vadd.f32 %v8479_v14, %v4253_v30  ;;  %v7891_v30 = vld [vmem:[#allocation10 + $0xa4] sm:$0xf0] }
 0x96d   :  { %v4267_v3 = vadd.f32 %v4266_v34, %v4254_v58  ;;  %v7888_v34 = vld [vmem:[#allocation10 + $0x94] sm:$0xf] }
 0x96f   :  { %v4280_v63 = vadd.f32 %v4279_v15, %v4267_v3  ;;  %v7124_v15 = vld [vmem:[#allocation10 + $0xa8] sm:$0xf0]  ;;  %v7098_v3 = vld [vmem:[#allocation10 + $0x60] sm:$0xf] }
 0x970   :  { %v7127_v58 = vor.u32 %v7888_v34, %v7124_v15  ;;  %v7210_v34 = vld [vmem:[#allocation10 + $0x130] sm:$0xf]  ;;  %v7911_v15 = vld [vmem:[#allocation10 + $0x144] sm:$0xf0] }
 0x971   :  { %v4293_v1 = vadd.f32 %v4292_v2, %v4280_v63  ;;  %v7123_v2 = vor.u32 %v7891_v30, %v7122_v57  ;;  %v7107_v57 = vor.u32 %v7886_v53, %v7106_v51  ;;  %v7108_v30 = vld [vmem:[#allocation10 + $0x80] sm:$0xf0]  ;;  %v7095_v51 = vor.u32 %v7878_v45, %v7092_v22  ;;  %v7066_v53 = vld [vmem:[#allocation10 + $0x10] sm:$0xf] }
 0x972   :  { %v4255_v62 = vpop.f32.mrf.mxu0  ;;  %v4268_v59 = vpop.f32.mrf.mxu1  ;;  %4652 = vmatpush.bf16.msrb.mxu3 %v7127_v58  ;;  %v7211_v58 = vor.u32 %v7911_v15, %v7210_v34  ;;  %v7956_v45 = vld [vmem:[#allocation9 + $0x130] sm:$0xff] }
 0x973   :  { %v4281_v61 = vpop.f32.mrf.mxu2  ;;  %v4294_v50 = vpop.f32.mrf.mxu3  ;;  %v7885_v62 = vld [vmem:[#allocation10 + $0x74] sm:$0xf0]  ;;  %v7882_v59 = vld [vmem:[#allocation10 + $0x64] sm:$0xf]  ;;  %4639 = vmatpush.bf16.msrb.mxu2 %v7123_v2  ;;  %v7111_v2 = vor.u32 %v7883_v29, %v7108_v30  ;;  %v7875_v29 = vld [vmem:[#allocation10 + $0x24] sm:$0xf0] }
 0x974   :  { %v7100_v61 = vld [vmem:[#allocation10 + $0x78] sm:$0xf0]  ;;  %v7099_v50 = vor.u32 %v7885_v62, %v7098_v3  ;;  %v7908_v3 = vld [vmem:[#allocation10 + $0x134] sm:$0xf]  ;;  %v7212_v62 = vld [vmem:[#allocation10 + $0x148] sm:$0xf0]  ;;  %v7067_v34 = vor.u32 %v7875_v29, %v7066_v53 }
 0x975   :  { %4679 = vmatpush.bf16.msra.mxu1 %v7111_v2  ;;  %v7068_v30 = vld [vmem:[#allocation10 + $0x28] sm:$0xf0]  ;;  %v7964_v22 = vld [vmem:[#allocation9 + $0x170] sm:$0xff]  ;;  %v7954_v29 = vld [vmem:[#allocation9 + $0x120] sm:$0xff] }
 0x976   :  { %v7963_v53 = vld [vmem:[#allocation9 + $0x168] sm:$0xff] }
 0x977   :  { %4640 = vmatpush.bf16.msrb.mxu2 %v7099_v50  ;;  %v7880_v50 = vld [vmem:[#allocation10 + $0x4c] sm:$0xf0] }
 0x97a   :  { %v4305_v4 = vpop.f32.mrf.mxu0  ;;  %v4318_v35 = vpop.f32.mrf.mxu1 }
 0x97b   :  { %v4306_v47 = vadd.f32 %v4305_v4, %v4293_v1  ;;  %v7103_v1 = vor.u32 %v7882_v59, %v7100_v61  ;;  %v7215_v59 = vor.u32 %v7908_v3, %v7212_v62  ;;  %v7082_v61 = vld [vmem:[#allocation10 + $0x38] sm:$0xf] }
 0x97c   :  { %v7925_v3 = vld [vmem:[#allocation9 + $0x38] sm:$0xff] }
 0x97d   :  { %v8482_v8 = vadd.f32 %v4318_v35, %v4306_v47  ;;  %4653 = vmatpush.bf16.msrb.mxu3 %v7103_v1  ;;  %v7083_v1 = vor.u32 %v7880_v50, %v7082_v61  ;;  %v7933_v62 = vld [vmem:[#allocation9 + $0x78] sm:$0xff]  ;;  %v7924_v61 = vld [vmem:[#allocation9 + $0x30] sm:$0xff] }
 0x97e   :  { %v7932_v50 = vld [vmem:[#allocation9 + $0x70] sm:$0xff] }
 0x97f   :  { %4322 = vmax.xlane.f32.xlu2 %v8482_v8 }
 0x981   :  { %4654 = vmatpush.bf16.msrb.mxu3 %v7079_v17  ;;  %v7063_v17 = vor.u32 %v7871_v26, %v7060_v16  ;;  %v7941_v16 = vld [vmem:[#allocation9 + $0xb8] sm:$0xff] }
 0x982   :  { %v4307_v24 = vpop.f32.mrf.mxu0  ;;  %v4320_v55 = vpop.f32.mrf.mxu1 }
 0x983   :  { %v7178_v24 = vld [vmem:[#allocation10 + $0xf8] sm:$0xf]  ;;  %v7904_v55 = vld [vmem:[#allocation10 + $0x10c] sm:$0xf0] }
 0x984   :  { %v7179_v56 = vor.u32 %v7904_v55, %v7178_v24  ;;  %v7905_v24 = vld [vmem:[#allocation10 + $0x114] sm:$0xf0] }
 0x985   :  { %4655 = vmatpush.bf16.msrb.mxu3 %v7055_v5  ;;  %v7887_v5 = vld [vmem:[#allocation10 + $0x84] sm:$0xf0] }
 0x986   :  { %4663 = vmatpush.bf16.msra.mxu0 %v7179_v56  ;;  %v7902_v56 = vld [vmem:[#allocation10 + $0x104] sm:$0xf]  ;;  %v7115_v23 = vor.u32 %v7887_v5, %v7114_v39  ;;  %v7936_v39 = vld [vmem:[#allocation9 + $0x90] sm:$0xff] }
 0x987   :  { %v7191_v43 = vor.u32 %v7902_v56, %v7188_v52  ;;  %v7944_v5 = vld [vmem:[#allocation9 + $0xd0] sm:$0xff] }
 0x989   :  { %4700 = vmatpush.bf16.msra.mxu3 %v7239_v48  ;;  %v7091_v48 = vor.u32 %v7881_v44, %v7090_v42  ;;  %v7935_v42 = vld [vmem:[#allocation9 + $0x88] sm:$0xff] }
 0x98a   :  { %4664 = vmatpush.bf16.msra.mxu0 %v7155_v38  ;;  %v7163_v38 = vor.u32 %v7899_v28, %v7162_v9  ;;  %v7949_v9 = vld [vmem:[#allocation9 + $0xf8] sm:$0xff]  ;;  %v7943_v44 = vld [vmem:[#allocation9 + $0xc8] sm:$0xff] }
 0x98b   :  { %v7921_v28 = vld [vmem:[#allocation9 + $0x18] sm:$0xff] }
 0x98d   :  { %4701 = vmatpush.bf16.msra.mxu3 %v7215_v59 }
 0x98e   :  { %4665 = vmatpush.bf16.msra.mxu0 %v7131_v40  ;;  %v7884_v40 = vld [vmem:[#allocation10 + $0x74] sm:$0xf] }
 0x98f   :  { %v7119_v41 = vor.u32 %v7884_v40, %v7116_v6  ;;  %v7918_v40 = vld [vmem:[#allocation9] sm:$0xff] }
 0x990   :  { %v7926_v6 = vld [vmem:[#allocation9 + $0x40] sm:$0xff] }
 0x991   :  { %4702 = vmatpush.bf16.msra.mxu3 %v7191_v43 }
 0x992   :  { %4666 = vmatpush.bf16.msra.mxu0 %v7107_v57  ;;  %v7872_v57 = vld [vmem:[#allocation10 + $0x14] sm:$0xf] }
 0x993   :  { %v7071_v15 = vor.u32 %v7872_v57, %v7068_v30  ;;  %v7962_v57 = vld [vmem:[#allocation9 + $0x160] sm:$0xff]  ;;  %v7953_v30 = vld [vmem:[#allocation9 + $0x118] sm:$0xff] }
 0x995   :  { %4703 = vmatpush.bf16.msra.mxu3 %v7167_v20  ;;  %v7947_v20 = vld [vmem:[#allocation9 + $0xe8] sm:$0xff] }
 0x996   :  { %4667 = vmatpush.bf16.msra.mxu0 %v7083_v1 }
 0x999   :  { %4704 = vmatpush.bf16.msra.mxu3 %v7143_v37  ;;  %v7945_v37 = vld [vmem:[#allocation9 + $0xd8] sm:$0xff] }
 0x99d   :  { %4705 = vmatpush.bf16.msra.mxu3 %v7119_v41  ;;  %v7965_v41 = vld [vmem:[#allocation9 + $0x178] sm:$0xff] }
 0x9a1   :  { %4706 = vmatpush.bf16.msra.mxu3 %v7095_v51  ;;  %v7955_v51 = vld [vmem:[#allocation9 + $0x128] sm:$0xff] }
 0x9a5   :  { %4707 = vmatpush.bf16.msra.mxu3 %v7071_v15  ;;  %v7952_v15 = vld [vmem:[#allocation9 + $0x110] sm:$0xff] }
 0x9f2   :  { %v4323_v63 = vpop.xlane.xlu2 %4322 }
 0x9f3   :  { %v4324_v4 = vsub.f32 %v8482_v8, %v4323_v63  ;;  %v7075_v8 = vor.u32 %v7879_v46, %v7074_v0  ;;  %v7877_v63 = vld [vmem:[#allocation10 + $0x3c] sm:$0xf]  ;;  %v7058_v0 = vld [vmem:[#allocation10 + $0x8] sm:$0xf]  ;;  %v7874_v46 = vld [vmem:[#allocation10 + $0x1c] sm:$0xf0] }
 0x9f5   :  { %v4325_v35 = vmul.f32 1.442695, %v4324_v4  ;;  %4641 = vmatpush.bf16.msrb.mxu2 %v7075_v8  ;;  %v7084_v4 = vld [vmem:[#allocation10 + $0x50] sm:$0xf0]  ;;  %v7059_v8 = vor.u32 %v7874_v46, %v7058_v0  ;;  %v7922_v0 = vld [vmem:[#allocation9 + $0x20] sm:$0xff] }
 0x9f6   :  { %v7087_v55 = vor.u32 %v7877_v63, %v7084_v4  ;;  %v7930_v46 = vld [vmem:[#allocation9 + $0x60] sm:$0xff] }
 0x9f7   :  { %7998 = vpow2.f32 %v4325_v35  ;;  %v7186_v35 = vld [vmem:[#allocation10 + $0x100] sm:$0xf]  ;;  %4668 = vmatpush.bf16.msra.mxu0 %v7059_v8 }
 0x9f8   :  { %v7187_v12 = vor.u32 %v7905_v24, %v7186_v35  ;;  %4680 = vmatpush.bf16.msra.mxu1 %v7087_v55  ;;  %v7923_v24 = vld [vmem:[#allocation9 + $0x28] sm:$0xff] }
 0x9f9   :  { %4642 = vmatpush.bf16.msrb.mxu2 %v7051_v31  ;;  %v7139_v31 = vor.u32 %v7893_v32, %v7138_v21  ;;  %v7931_v55 = vld [vmem:[#allocation9 + $0x68] sm:$0xff] }
 0x9fa   :  { %v7919_v21 = vld [vmem:[#allocation9 + $0x8] sm:$0xff] }
 0x9fb   :  { %5181 = vmatpush.bf16.msrb.mxu0 %v7925_v3  ;;  %v7927_v32 = vld [vmem:[#allocation9 + $0x48] sm:$0xff] }
 0x9fc   :  { %4681 = vmatpush.bf16.msra.mxu1 %v7063_v17  ;;  %v7929_v17 = vld [vmem:[#allocation9 + $0x58] sm:$0xff]  ;;  %v7951_v3 = vld [vmem:[#allocation9 + $0x108] sm:$0xff] }
 0x9fd   :  { %v8486_v47 = vpop.eup %7998  ;;  %4687 = vmatpush.bf16.msra.mxu2 %v7235_v25 }
 0x9fe   :  { %4327 = vadd.xlane.f32.xlu0 %v8486_v47 }
 0x9ff   :  { %5182 = vmatpush.bf16.msrb.mxu0 %v7924_v61 }
 0xa00   :  { %5194 = vmatpush.bf16.msrb.mxu1 %v7933_v62  ;;  %v7959_v62 = vld [vmem:[#allocation9 + $0x148] sm:$0xff] }
 0xa01   :  { %4688 = vmatpush.bf16.msra.mxu2 %v7211_v58 }
 0xa03   :  { %5183 = vmatpush.bf16.msrb.mxu0 %v7923_v24 }
 0xa04   :  { %5195 = vmatpush.bf16.msrb.mxu1 %v7932_v50 }
 0xa05   :  { %4689 = vmatpush.bf16.msra.mxu2 %v7187_v12 }
 0xa07   :  { %5184 = vmatpush.bf16.msrb.mxu0 %v7922_v0 }
 0xa08   :  { %5196 = vmatpush.bf16.msrb.mxu1 %v7931_v55  ;;  %v4732_v55 = vld [vmem:[#allocation4 + $0x8] sm:$0xff] }
 0xa09   :  { %4690 = vmatpush.bf16.msra.mxu2 %v7163_v38  ;;  %v7948_v38 = vld [vmem:[#allocation9 + $0xf0] sm:$0xff] }
 0xa0b   :  { %5185 = vmatpush.bf16.msrb.mxu0 %v7921_v28 }
 0xa0c   :  { %5197 = vmatpush.bf16.msrb.mxu1 %v7930_v46 }
 0xa0d   :  { %4691 = vmatpush.bf16.msra.mxu2 %v7139_v31  ;;  %v7946_v31 = vld [vmem:[#allocation9 + $0xe0] sm:$0xff] }
 0xa0f   :  { %5186 = vmatpush.bf16.msrb.mxu0 %v7920_v19 }
 0xa10   :  { %5198 = vmatpush.bf16.msrb.mxu1 %v7929_v17 }
 0xa11   :  { %4692 = vmatpush.bf16.msra.mxu2 %v7115_v23  ;;  %v7957_v23 = vld [vmem:[#allocation9 + $0x138] sm:$0xff] }
 0xa13   :  { %5187 = vmatpush.bf16.msrb.mxu0 %v7919_v21 }
 0xa14   :  { %5199 = vmatpush.bf16.msrb.mxu1 %v7928_v33 }
 0xa15   :  { %4693 = vmatpush.bf16.msra.mxu2 %v7091_v48  ;;  %v7942_v48 = vld [vmem:[#allocation9 + $0xc0] sm:$0xff] }
 0xa17   :  { %5188 = vmatpush.bf16.msrb.mxu0 %v7918_v40 }
 0xa18   :  { %5200 = vmatpush.bf16.msrb.mxu1 %v7927_v32 }
 0xa19   :  { %4694 = vmatpush.bf16.msra.mxu2 %v7067_v34  ;;  %v7961_v34 = vld [vmem:[#allocation9 + $0x158] sm:$0xff] }
 0xa1c   :  { %5201 = vmatpush.bf16.msrb.mxu1 %v7926_v6 }
 0xa71   :  { %v4328_v25 = vpop.xlane.xlu0 %4327 }
 0xa72   :  { %8000 = vrcp.f32 %v4328_v25  ;;  %v4340_v63 = vand.u32 2147483648, %v4328_v25  ;;  %v4338_v4 = vand.u32 2147483647, %v4328_v25  ;;  %vm4334_vm10 = vweird.f32 %v4328_v25 }
 0xa74   :  { %v4341_v12 = vor.u32 1.1754944e-38, %v4340_v63  ;;  %vm4339_vm12 = vcmp.eq.f32.partialorder %v4338_v4, 8.507059e+37  ;;  %v7950_v63 = vld [vmem:[#allocation9 + $0x100] sm:$0xff] }
 0xa75   :  { %v4731_v4 = vld [vmem:[#allocation4] sm:$0xff] }
 0xa76   :  { %v7240_v0 = vadd.f32 -0.03137255, %v4731_v4 }
 0xa78   :  { %v8001_v2 = vpop.eup %8000  ;;  %v4743_v21 = vmax.f32 %v7240_v0, 0.0 }
 0xa79   :  { %v4330_v58 = vmul.f32 %v8001_v2, %v4328_v25  ;;  %vm4335_vm9 = vweird.f32 %v8001_v2  ;;  %v7934_v25 = vld [vmem:[#allocation9 + $0x80] sm:$0xff] }
 0xa7a   :  { %vm4336_vm11 = vmor %vm4334_vm10, %vm4335_vm9 }
 0xa7b   :  { %v4331_v59 = vsub.f32 1.0, %v4330_v58  ;;  %v4733_v58 = vld [vmem:[#allocation4 + $0x10] sm:$0xff] }
 0xa7c   :  { %v7242_v61 = vadd.f32 -0.03137255, %v4733_v58 }
 0xa7d   :  { %v4332_v1 = vmul.f32 %v8001_v2, %v4331_v59  ;;  %v4734_v59 = vld [vmem:[#allocation4 + $0x18] sm:$0xff] }
 0xa7e   :  { %v7243_v50 = vadd.f32 -0.03137255, %v4734_v59  ;;  %v4752_v24 = vadd.f32 0.03137255, %v4734_v59 }
 0xa7f   :  { %v4333_v35 = vadd.f32 %v8001_v2, %v4332_v1  ;;  %v7958_v1 = vld [vmem:[#allocation9 + $0x140] sm:$0xff] }
 0xa80   :  { %v4758_v17 = vmin.f32 %v4752_v24, 1.0 }
 0xa81   :  { %v4337_v56 = vsel %vm4336_vm11, %v8001_v2, %v4333_v35  ;;  %v7960_v2 = vld [vmem:[#allocation9 + $0x150] sm:$0xff]  ;;  %v4751_v35 = vadd.f32 0.03137255, %v4733_v58 }
 0xa82   :  { %v4342_v52 = vsel %vm4339_vm12, %v4341_v12, %v4337_v56  ;;  %v4745_v56 = vmax.f32 %v7242_v61, 0.0 }
 0xa83   :  { %v4343_v43 = vmul.f32 %v8486_v47, %v4342_v52  ;;  %v7940_v47 = vld [vmem:[#allocation9 + $0xb0] sm:$0xff] }
 0xa85   :  { %v4345_v26 = vsub.f32 %v4343_v43, %v8281_v54  ;;  %v7939_v54 = vld [vmem:[#allocation9 + $0xa8] sm:$0xff]  ;;  %v4746_v43 = vmax.f32 %v7243_v50, 0.0 }
 0xa87   :  { %v4346_v8 = vpack.c.bf16 %v4345_v26, %v4345_v26 }
 0xa89   :  { %4643 = vmatmul.bf16.vlgmr.msrb.gmra.mxu2 %v4346_v8  ;;  %4656 = vmatmul.bf16.vlgmr.msrb.gmra.mxu3 %v4346_v8 }
 0xa8a   :  { %4669 = vmatmul.bf16.vlgmr.msra.gmra.mxu0 %v4346_v8  ;;  %4682 = vmatmul.bf16.vlgmr.msra.gmra.mxu1 %v4346_v8 }
 0xa8b   :  { %5207 = vmatpush.bf16.msrb.mxu2 %v7941_v16  ;;  %5220 = vmatpush.bf16.msrb.mxu3 %v7949_v9  ;;  %v4757_v9 = vmin.f32 %v4751_v35, 1.0 }
 0xa8c   :  { %5233 = vmatpush.bf16.msra.mxu0 %v7957_v23  ;;  %5246 = vmatpush.bf16.msra.mxu1 %v7965_v41 }
 0xa8f   :  { %5208 = vmatpush.bf16.msrb.mxu2 %v7940_v47  ;;  %5221 = vmatpush.bf16.msrb.mxu3 %v7948_v38  ;;  %v4749_v47 = vadd.f32 0.03137255, %v4731_v4  ;;  %v4750_v38 = vadd.f32 0.03137255, %v4732_v55 }
 0xa90   :  { %5234 = vmatpush.bf16.msra.mxu0 %v7956_v45  ;;  %5247 = vmatpush.bf16.msra.mxu1 %v7964_v22 }
 0xa93   :  { %5209 = vmatpush.bf16.msrb.mxu2 %v7939_v54  ;;  %5222 = vmatpush.bf16.msrb.mxu3 %v7947_v20 }
 0xa94   :  { %5235 = vmatpush.bf16.msra.mxu0 %v7955_v51  ;;  %5248 = vmatpush.bf16.msra.mxu1 %v7963_v53  ;;  %v4736_v53 = vld [vmem:[#allocation4 + $0x28] sm:$0xff] }
 0xa97   :  { %5210 = vmatpush.bf16.msrb.mxu2 %v7938_v13  ;;  %5223 = vmatpush.bf16.msrb.mxu3 %v7946_v31 }
 0xa98   :  { %5236 = vmatpush.bf16.msra.mxu0 %v7954_v29  ;;  %5249 = vmatpush.bf16.msra.mxu1 %v7962_v57  ;;  %v7245_v57 = vadd.f32 -0.03137255, %v4736_v53 }
 0xa99   :  { %4695 = vmatmul.bf16.vlgmr.msra.gmra.mxu2 %v4346_v8  ;;  %4708 = vmatmul.bf16.vlgmr.msra.gmra.mxu3 %v4346_v8  ;;  %v7241_v8 = vadd.f32 -0.03137255, %v4732_v55 }
 0xa9b   :  { %5211 = vmatpush.bf16.msrb.mxu2 %v7937_v36  ;;  %5224 = vmatpush.bf16.msrb.mxu3 %v7945_v37  ;;  %v4744_v32 = vmax.f32 %v7241_v8, 0.0 }
 0xa9c   :  { %5237 = vmatpush.bf16.msra.mxu0 %v7953_v30  ;;  %5250 = vmatpush.bf16.msra.mxu1 %v7961_v34  ;;  %v4754_v34 = vadd.f32 0.03137255, %v4736_v53 }
 0xa9f   :  { %5212 = vmatpush.bf16.msrb.mxu2 %v7936_v39  ;;  %5225 = vmatpush.bf16.msrb.mxu3 %v7944_v5  ;;  %v4756_v5 = vmin.f32 %v4750_v38, 1.0 }
 0xaa0   :  { %5238 = vmatpush.bf16.msra.mxu0 %v7952_v15  ;;  %5251 = vmatpush.bf16.msra.mxu1 %v7960_v2 }
 0xaa3   :  { %5213 = vmatpush.bf16.msrb.mxu2 %v7935_v42  ;;  %5226 = vmatpush.bf16.msrb.mxu3 %v7943_v44 }
 0xaa4   :  { %5239 = vmatpush.bf16.msra.mxu0 %v7951_v3  ;;  %5252 = vmatpush.bf16.msra.mxu1 %v7959_v62  ;;  %v4748_v3 = vmax.f32 %v7245_v57, 0.0 }
 0xaa7   :  { %5214 = vmatpush.bf16.msrb.mxu2 %v7934_v25  ;;  %5227 = vmatpush.bf16.msrb.mxu3 %v7942_v48 }
 0xaa8   :  { %5240 = vmatpush.bf16.msra.mxu0 %v7950_v63  ;;  %5253 = vmatpush.bf16.msra.mxu1 %v7958_v1  ;;  %v4760_v1 = vmin.f32 %v4754_v34, 1.0 }
 0xb07   :  { %v4670_v12 = vpop.f32.mrf.mxu0  ;;  %v4683_v52 = vpop.f32.mrf.mxu1 }
 0xb08   :  { %vm4715_vm13 = vcmp.ge.f32.partialorder %v4670_v12, 0.0  ;;  %vm4716_vm14 = vcmp.ge.f32.partialorder %v4683_v52, 0.0 }
 0xb09   :  { %v4721_v46 = vsel %vm4715_vm13, 0.007843138, %v8168_v60  ;;  %v4722_v26 = vsel %vm4716_vm14, 0.007843138, %v8168_v60 }
 0xb0a   :  { %v4727_v16 = vadd.f32 %v4721_v46, %v8444_v10  ;;  %v4728_v28 = vadd.f32 %v4722_v26, %v8446_v11  ;;  %v4755_v11 = vmin.f32 %v4749_v47, 1.0 }
 0xb0c   :  { %v4763_v19 = vmax.f32 %v4727_v16, %v4745_v56  ;;  %v4764_v33 = vmax.f32 %v4728_v28, %v4746_v43  ;;  %v4644_v54 = vpop.f32.mrf.mxu2  ;;  %v4657_v20 = vpop.f32.mrf.mxu3 }
 0xb0d   :  { %vm4713_vm15 = vcmp.ge.f32.partialorder %v4644_v54, 0.0  ;;  %vm4714_vm0 = vcmp.ge.f32.partialorder %v4657_v20, 0.0 }
 0xb0e   :  { %v4769_v13 = vmin.f32 %v4763_v19, %v4757_v9  ;;  %v4770_v31 = vmin.f32 %v4764_v33, %v4758_v17  ;;  %v4719_v36 = vsel %vm4713_vm15, 0.007843138, %v8168_v60  ;;  %v4720_v10 = vsel %vm4714_vm0, 0.007843138, %v8168_v60 }
 0xb0f   :  { %v4725_v37 = vadd.f32 %v4719_v36, %v8456_v7  ;;  %v4726_v39 = vadd.f32 %v4720_v10, %v8458_v18  ;;  %v4672_v40 = vpop.f32.mrf.mxu0  ;;  %v4685_v6 = vpop.f32.mrf.mxu1  ;;  %v4735_v18 = vld [vmem:[#allocation4 + $0x20] sm:$0xff] }
 0xb10   :  { %4787 = vst [vmem:[#allocation13 + $0x10] sm:$0xff] %v4769_v13  ;;  %v4793_v23 = vpack.c.bf16 %v4769_v13, %v4769_v13  ;;  %v4794_v41 = vpack.c.bf16 %v4770_v31, %v4770_v31  ;;  %v7244_v29 = vadd.f32 -0.03137255, %v4735_v18  ;;  %v4753_v30 = vadd.f32 0.03137255, %v4735_v18 }
 0xb11   :  { %4788 = vst [vmem:[#allocation13 + $0x18] sm:$0xff] %v4770_v31  ;;  %v4761_v42 = vmax.f32 %v4725_v37, %v4743_v21  ;;  %v4762_v44 = vmax.f32 %v4726_v39, %v4744_v32 }
 0xb12   :  { %5215 = vmatmul.bf16.vlgmr.msrb.gmra.mxu2 %v4793_v23  ;;  %5228 = vmatmul.bf16.vlgmr.msrb.gmra.mxu3 %v4794_v41  ;;  %v4747_v58 = vmax.f32 %v7244_v29, 0.0  ;;  %v4759_v50 = vmin.f32 %v4753_v30, 1.0 }
 0xb13   :  { %v4767_v45 = vmin.f32 %v4761_v42, %v4755_v11  ;;  %v4768_v22 = vmin.f32 %v4762_v44, %v4756_v5 }
 0xb14   :  { %v4646_v25 = vpop.f32.mrf.mxu2  ;;  %v4659_v48 = vpop.f32.mrf.mxu3 }
 0xb15   :  { %4785 = vst [vmem:[#allocation13] sm:$0xff] %v4767_v45  ;;  %v4791_v7 = vpack.c.bf16 %v4767_v45, %v4767_v45  ;;  %v4792_v51 = vpack.c.bf16 %v4768_v22, %v4768_v22 }
 0xb16   :  { %4786 = vst [vmem:[#allocation13 + $0x8] sm:$0xff] %v4768_v22 }
 0xb17   :  { %5189 = vmatmul.bf16.vlgmr.msrb.gmra.mxu0 %v4791_v7  ;;  %5202 = vmatmul.bf16.vlgmr.msrb.gmra.mxu1 %v4792_v51 }
 0xb1c   :  { %v4696_v15 = vpop.f32.mrf.mxu2  ;;  %v4709_v2 = vpop.f32.mrf.mxu3 }
 0xb1d   :  { %vm4717_vm1 = vcmp.ge.f32.partialorder %v4696_v15, 0.0  ;;  %vm4718_vm2 = vcmp.ge.f32.partialorder %v4709_v2, 0.0 }
 0xb1e   :  { %v4723_v62 = vsel %vm4717_vm1, 0.007843138, %v8168_v60  ;;  %v4724_v59 = vsel %vm4718_vm2, 0.007843138, %v8168_v60 }
 0xb1f   :  { %v4729_v61 = vadd.f32 %v4723_v62, %v8468_v27  ;;  %v4730_v63 = vadd.f32 %v4724_v59, %v8470_v49 }
 0xb21   :  { %v4765_v4 = vmax.f32 %v4729_v61, %v4747_v58  ;;  %v4766_v35 = vmax.f32 %v4730_v63, %v4748_v3 }
 0xb23   :  { %v4771_v24 = vmin.f32 %v4765_v4, %v4759_v50  ;;  %v4772_v55 = vmin.f32 %v4766_v35, %v4760_v1 }
 0xb24   :  { %v4698_v12 = vpop.f32.mrf.mxu2  ;;  %v4711_v56 = vpop.f32.mrf.mxu3 }
 0xb25   :  { %4789 = vst [vmem:[#allocation13 + $0x20] sm:$0xff] %v4771_v24  ;;  %v4795_v52 = vpack.c.bf16 %v4771_v24, %v4771_v24  ;;  %v4796_v43 = vpack.c.bf16 %v4772_v55, %v4772_v55 }
 0xb26   :  { %4790 = vst [vmem:[#allocation13 + $0x28] sm:$0xff] %v4772_v55 }
 0xb27   :  { %5241 = vmatmul.bf16.vlgmr.msra.gmra.mxu0 %v4795_v52  ;;  %5254 = vmatmul.bf16.vlgmr.msra.gmra.mxu1 %v4796_v43  ;;  %5281 = dma.vmem_to_hbm [thread:$0]  %s5277_s28, 768, %s5279_s8, [#allocation14]  }
 0xb94   :  { %v5190_v60 = vpop.f32.mrf.mxu0  ;;  %v5203_v27 = vpop.f32.mrf.mxu1 }
 0xb95   :  { %v5216_v49 = vpop.f32.mrf.mxu2  ;;  %v5229_v0 = vpop.f32.mrf.mxu3  ;;  %v5191_v46 = vadd.f32 %v8479_v14, %v5190_v60 }
 0xb97   :  { %v5204_v26 = vadd.f32 %v5203_v27, %v5191_v46 }
 0xb99   :  { %v5217_v17 = vadd.f32 %v5216_v49, %v5204_v26 }
 0xb9b   :  { %v5230_v47 = vadd.f32 %v5229_v0, %v5217_v17 }
 0xb9c   :  { %v5192_v8 = vpop.f32.mrf.mxu0  ;;  %v5205_v16 = vpop.f32.mrf.mxu1 }
 0xb9d   :  { %v5218_v9 = vpop.f32.mrf.mxu2  ;;  %v5231_v28 = vpop.f32.mrf.mxu3 }
 0xba4   :  { %v5242_v38 = vpop.f32.mrf.mxu0  ;;  %v5255_v19 = vpop.f32.mrf.mxu1 }
 0xba5   :  { %v5243_v33 = vadd.f32 %v5242_v38, %v5230_v47 }
 0xba7   :  { %v5256_v54 = vadd.f32 %v5255_v19, %v5243_v33 }
 0xba9   :  { %5259 = vst [vmem:[#allocation12] sm:$0xff] %v5256_v54 }
 0xbaa   :  { %5270 = dma.vmem_to_hbm [thread:$0]  %s5266_s7, 128, %s5268_s12, [#allocation6]  }
 0xbac   :  { %v5244_v14 = vpop.f32.mrf.mxu0  ;;  %v5257_v20 = vpop.f32.mrf.mxu1 }
 0xbad   :  { %8154 = dma.done.wait [#allocation6], 128  }
 0xbae   :  { %8155 = vsyncadd [#allocation6], 4294967168 }
 0xbaf   :  { %8156 = dma.done.wait [#allocation14], 768  }
 0xbb0   :  { %8157 = vsyncadd [#allocation14], 4294966528 }
 0xbb1   :  { %5290 = vsyncpa [#allocation5], 1 }
 0xbb2   :  { %5291 = vsyncpa [#allocation8], 1 }
 0xbb3   :  { %5292 = vsyncpa [#allocation11], 1 }
 0xbb4   :  { %5293 = vsyncpa [#allocation6], 1 }
 0xbb5   :  { %5294 = vsyncpa [#allocation14], 1 }

</bundles_post_ra>
